<compile_context>
chip_gen: v7x
topology: tpu7x:2x2x1
jax: 0.10.0
libtpu: 0.0.40
codegen_flags: <defaults>
</compile_context>

<pallas_src>
import functools
import math

import numpy as np

import jax
import jax.numpy as jnp
from jax import lax
from jax.experimental import pallas as pl
from jax.experimental.pallas import tpu as pltpu


LANE = 128   # TPU lane width; channel dims are zero-padded to a multiple of this


def _round_up(x, m):
    return (x + m - 1) // m * m


def _gelu_tanh(x):
    # tanh-form GELU: the transcendental runs on the EUP (its own VLIW slot); max abs
    # deviation from the exact erf GELU is a few 1e-4.
    c = jnp.float32(0.7978845608028654)   # sqrt(2/pi)
    return 0.5 * x * (1.0 + jnp.tanh(c * x * (1.0 + jnp.float32(0.044715) * x * x)))


# ----------------------------------------------------------------------------
# Kernel: grid = (number of hidden-channel tiles,)  ["arbitrary" reduction axis]
# ----------------------------------------------------------------------------
def alpffn_kernel(x_ref, w1_ref, v12_ref, w2_ref, rmask_ref, red_ref, bc_ref,
                  w3_ref, v3_ref, o_ref, *, W):
    i = pl.program_id(0)
    R = x_ref.shape[0]                     # batch * spatial rows

    red0 = red_ref[0:1, :]                 # (1, R), every entry = 1/R

    def bn(z, gamma, beta, eps=1e-5):
        # Training-mode BatchNorm2d statistics computed on the MXU (ones-row matmuls)
        # so the XLU stays free for the depthwise rolls.  Two-pass form; var clamped,
        # all statistics in f32.
        mean = jnp.dot(red0, z, preferred_element_type=jnp.float32)       # (1, C)
        diff = z - mean
        var = jnp.dot(red0, diff * diff, preferred_element_type=jnp.float32)
        var = jnp.maximum(var, 0.0)
        return diff * lax.rsqrt(var + jnp.float32(eps)) * gamma + beta

    # ---- conv1 (1x1): lane-dense MXU matmul (bf16 operands, f32 accumulate) ----
    h = jnp.dot(x_ref[...], w1_ref[...], preferred_element_type=jnp.float32)
    h = _gelu_tanh(bn(h + v12_ref[0:1, :], v12_ref[1:2, :], v12_ref[2:3, :]))

    # ---- conv2: depthwise 3x3 with padding 1, separable (dx then dy) form.
    # Stage 1: g_dx[s] = colvalid(s,dx) * h[s+dx]           (2 rolls, 2 mask bcasts)
    # Stage 2: m_dy    = sum_dx w2[dy,dx] * g_dx            (9 per-channel FMAs)
    # Stage 3: out[r]  = sum_dy rowvalid(r,dy) * m_dy[r+dy*W] (2 rolls, 2 mask bcasts)
    # The masks also cover batch boundaries / roll wrap-around (every wrapped row is
    # out of the image by construction).  All XLU + VPU work; no MXU, no (R,R) ops.
    cvm = rmask_ref[:, 0:1]                # column shift dx=-1 valid
    cvp = rmask_ref[:, 1:2]                # column shift dx=+1 valid
    rvm = rmask_ref[:, 2:3]                # row shift dy=-1 valid
    rvp = rmask_ref[:, 3:4]                # row shift dy=+1 valid

    g_m = cvm * pltpu.roll(h, shift=1, axis=0)            # h[r-1]
    g_p = cvp * pltpu.roll(h, shift=R - 1, axis=0)        # h[r+1]

    def tap(t):                                           # per-channel tap weight row
        return w2_ref[t:t + 1, :]

    m_m = tap(0) * g_m + tap(1) * h + tap(2) * g_p        # dy = -1 taps
    m_0 = tap(3) * g_m + tap(4) * h + tap(5) * g_p        # dy =  0 taps
    m_p = tap(6) * g_m + tap(7) * h + tap(8) * g_p        # dy = +1 taps

    h = (m_0
         + rvm * pltpu.roll(m_m, shift=W, axis=0)         # m_m[r - W]
         + rvp * pltpu.roll(m_p, shift=R - W, axis=0))    # m_p[r + W]
    h = _gelu_tanh(bn(h + v12_ref[3:4, :], v12_ref[4:5, :], v12_ref[5:6, :]))

    # ---- conv3 (1x1): partial sum over this hidden tile, accumulated in place in the
    # resident output block (constant index_map across the "arbitrary" grid axis) ----
    partial = jnp.dot(h.astype(w3_ref.dtype), w3_ref[...],
                      preferred_element_type=jnp.float32)

    @pl.when(i == 0)
    def _():
        o_ref[...] = partial

    @pl.when(i != 0)
    def _():
        o_ref[...] = o_ref[...] + partial

    # ---- finalize on the last hidden tile: BN3 + per-batch token-mean residual mix.
    # Token means via two tiny matmuls (segmented-mean rows of `red`, broadcast-back
    # columns of `bc`), then one unmasked full-slab lane-dense store.
    @pl.when(i == pl.num_programs(0) - 1)
    def _():
        z = bn(o_ref[...] + v3_ref[0:1, :], v3_ref[1:2, :], v3_ref[2:3, :])
        tok = jnp.dot(red_ref[...], z, preferred_element_type=jnp.float32)  # rows 1..B
        mix = jnp.dot(bc_ref[...], tok, preferred_element_type=jnp.float32)
        o_ref[...] = (z + mix) * 0.5


# ----------------------------------------------------------------------------
# Wrapper: padding, row tables, BlockSpecs, pallas_call
# ----------------------------------------------------------------------------
def build_row_tables(B, H, W, red_rows):
    """Small constant tables indexed by slab row r = b*H*W + h*W + w.

    rmask (R, 8):  cols 0..3 = validity of the dx=-1 / dx=+1 / dy=-1 / dy=+1 shifts.
    red (red_rows, R): row 0 = 1/R (BatchNorm mean row); row 1+b = 1/N on batch b's rows.
    bc  (R, red_rows): bc[r, 1+b(r)] = 1  (broadcast each batch's token mean back).
    """
    N = H * W
    R = B * N
    r = np.arange(R)
    h_r = (r % N) // W
    w_r = r % W
    b_r = r // N

    rmask = np.zeros((R, 8), np.float32)
    rmask[:, 0] = (w_r - 1 >= 0)
    rmask[:, 1] = (w_r + 1 < W)
    rmask[:, 2] = (h_r - 1 >= 0)
    rmask[:, 3] = (h_r + 1 < H)

    red = np.zeros((red_rows, R), np.float32)
    red[0, :] = 1.0 / R
    red[1 + b_r, r] = 1.0 / N

    bc = np.zeros((R, red_rows), np.float32)
    bc[r, 1 + b_r] = 1.0
    return jnp.asarray(rmask), jnp.asarray(red), jnp.asarray(bc)


def alpffn_forward(x, params, *, matmul_dtype=jnp.bfloat16):
    """x: (B, n, k) with n a perfect square.  Returns (B, n, out_features)."""
    B, n, k = x.shape
    H = W = int(round(math.sqrt(n)))
    assert H * W == n, "n must be a perfect square"
    R = B * n

    w1, b1, w2, b2, w3, b3, g1, be1, g2, be2, g3, be3 = params
    chid = w1.shape[1]
    cout = w3.shape[1]

    # 256-wide hidden tiles fill the 2x256^2 MXU on v6e/v7x; 128 matches v5e's 4x128^2.
    tile = 128 if chid <= 128 else 256
    cin_p = _round_up(k, LANE)
    chid_p = _round_up(chid, tile)
    cout_p = _round_up(cout, LANE)
    n_tiles = chid_p // tile
    red_rows = _round_up(B + 1, 8)

    f32 = jnp.float32

    def pad2(a, rows, cols, dtype=f32):
        return jnp.pad(a.astype(f32),
                       ((0, rows - a.shape[0]), (0, cols - a.shape[1]))).astype(dtype)

    def padv(v, cols, fill=0.0):
        return jnp.pad(v.astype(f32), (0, cols - v.shape[0]), constant_values=fill)

    # Correctness invariant: gamma pads with 1.0, bias/beta/weights pad with 0.0 so the
    # zero-padded channels stay exactly zero through every BN / GELU / conv stage.
    x2d = pad2(x.reshape(R, k), R, cin_p, matmul_dtype)
    w1p = pad2(w1, cin_p, chid_p, matmul_dtype)
    w3p = pad2(w3, chid_p, cout_p, matmul_dtype)
    w2p = pad2(w2, 16, chid_p)                                  # 9 taps, sublane-padded
    v12 = jnp.stack([padv(b1, chid_p), padv(g1, chid_p, 1.0), padv(be1, chid_p),
                     padv(b2, chid_p), padv(g2, chid_p, 1.0), padv(be2, chid_p),
                     jnp.zeros((chid_p,), f32), jnp.zeros((chid_p,), f32)])
    v3 = jnp.stack([padv(b3, cout_p), padv(g3, cout_p, 1.0), padv(be3, cout_p)]
                   + [jnp.zeros((cout_p,), f32)] * 5)
    rmask, red, bc = build_row_tables(B, H, W, red_rows)

    # Advisory cost estimate for the XLA scheduler.
    opd_bytes = jnp.dtype(matmul_dtype).itemsize
    flops = int(2 * R * chid_p * (cin_p + cout_p)               # 1x1 convs
                + 8 * R * chid_p + 4 * R * cout_p               # BN stat matmuls
                + 2 * R * red_rows * cout_p                     # token-mean matmuls
                + 30 * R * chid_p + 10 * R * cout_p)            # depthwise / elementwise
    transcendentals = int(2 * R * chid_p)                       # two tanh-GELUs
    bytes_accessed = int((x2d.size + w1p.size + w3p.size) * opd_bytes
                         + 4 * (w2p.size + v12.size + v3.size + rmask.size
                                + red.size + bc.size + R * cout_p))

    out2d = pl.pallas_call(
        functools.partial(alpffn_kernel, W=W),
        out_shape=jax.ShapeDtypeStruct((R, cout_p), jnp.float32),
        grid=(n_tiles,),
        in_specs=[
            pl.BlockSpec((R, cin_p), lambda i: (0, 0)),         # x slab (resident)
            pl.BlockSpec((cin_p, tile), lambda i: (0, i)),      # w1 tile
            pl.BlockSpec((8, tile), lambda i: (0, i)),          # b1,g1,be1,b2,g2,be2
            pl.BlockSpec((16, tile), lambda i: (0, i)),         # depthwise tap weights
            pl.BlockSpec((R, 8), lambda i: (0, 0)),             # border masks (resident)
            pl.BlockSpec((red_rows, R), lambda i: (0, 0)),      # reduction rows
            pl.BlockSpec((R, red_rows), lambda i: (0, 0)),      # token-mean broadcast
            pl.BlockSpec((tile, cout_p), lambda i: (i, 0)),     # w3 tile
            pl.BlockSpec((8, cout_p), lambda i: (0, 0)),        # b3,g3,be3
        ],
        out_specs=pl.BlockSpec((R, cout_p), lambda i: (0, 0)),  # resident accumulator
        compiler_params=pltpu.CompilerParams(
            dimension_semantics=("arbitrary",),                 # conv3 reduction axis
            # Safe on every generation (v7x has 64 MiB/TC); raise toward ~96 MiB on
            # v5e/v6e for production row counts.
            vmem_limit_bytes=48 * 1024 * 1024),
        cost_estimate=pl.CostEstimate(flops=flops,
                                      transcendentals=transcendentals,
                                      bytes_accessed=bytes_accessed),
    )(x2d, w1p, v12, w2p, rmask, red, bc, w3p, v3)

    return out2d[:, :cout].reshape(B, n, cout)


# ----------------------------------------------------------------------------
# Pure-JAX reference (mirrors the PyTorch forward in training mode, exact erf GELU)
# ----------------------------------------------------------------------------
def alpffn_reference(x, torch_params):
    w1_t, b1, w2_t, b2, w3_t, b3, g1, be1, g2, be2, g3, be3 = torch_params
    B, n, k = x.shape
    H = W = int(round(math.sqrt(n)))
    chid = w1_t.shape[0]
    cout = w3_t.shape[0]

    xi = x.reshape(B, H, W, k).transpose(0, 3, 1, 2)            # NCHW

    def conv1x1(z, w_t, b):
        return jnp.einsum('bchw,oc->bohw', z, w_t[:, :, 0, 0]) + b[None, :, None, None]

    def bn(z, g, be, eps=1e-5):
        mean = z.mean(axis=(0, 2, 3), keepdims=True)
        var = ((z - mean) ** 2).mean(axis=(0, 2, 3), keepdims=True)
        return (z - mean) * lax.rsqrt(var + eps) * g[None, :, None, None] \
            + be[None, :, None, None]

    gelu = lambda z: jax.nn.gelu(z, approximate=False)

    h = gelu(bn(conv1x1(xi, w1_t, b1), g1, be1))
    h = lax.conv_general_dilated(
        h, w2_t, window_strides=(1, 1), padding=((1, 1), (1, 1)),
        feature_group_count=chid, dimension_numbers=('NCHW', 'OIHW', 'NCHW')) \
        + b2[None, :, None, None]
    h = gelu(bn(h, g2, be2))
    h = bn(conv1x1(h, w3_t, b3), g3, be3)

    y = h.reshape(B, cout, n).transpose(0, 2, 1)                # (B, n, cout)
    return (y + y.mean(axis=1, keepdims=True)) * 0.5


# ----------------------------------------------------------------------------
def _run_case(key, B, H, W, cin, chid, cout, matmul_dtype, tol):
    n = H * W
    ks = jax.random.split(key, 13)

    # PyTorch-layout parameters (deterministic synthetic init)
    w1_t = 0.3 * jax.random.normal(ks[0], (chid, cin, 1, 1), jnp.float32)
    b1 = 0.1 * jax.random.normal(ks[1], (chid,), jnp.float32)
    w2_t = 0.3 * jax.random.normal(ks[2], (chid, 1, 3, 3), jnp.float32)
    b2 = 0.1 * jax.random.normal(ks[3], (chid,), jnp.float32)
    w3_t = 0.3 * jax.random.normal(ks[4], (cout, chid, 1, 1), jnp.float32)
    b3 = 0.1 * jax.random.normal(ks[5], (cout,), jnp.float32)
    g1 = 1.0 + 0.1 * jax.random.normal(ks[6], (chid,), jnp.float32)
    be1 = 0.1 * jax.random.normal(ks[7], (chid,), jnp.float32)
    g2 = 1.0 + 0.1 * jax.random.normal(ks[8], (chid,), jnp.float32)
    be2 = 0.1 * jax.random.normal(ks[9], (chid,), jnp.float32)
    g3 = 1.0 + 0.1 * jax.random.normal(ks[10], (cout,), jnp.float32)
    be3 = 0.1 * jax.random.normal(ks[11], (cout,), jnp.float32)

    # Kernel-layout parameters
    w1 = w1_t[:, :, 0, 0].T                       # (cin, chid)
    w2 = w2_t[:, 0].reshape(chid, 9).T            # (9, chid), tap index = ky*3 + kx
    w3 = w3_t[:, :, 0, 0].T                       # (chid, cout)

    x = jax.random.normal(ks[12], (B, n, cin), jnp.float32)

    out = alpffn_forward(x, (w1, b1, w2, b2, w3, b3, g1, be1, g2, be2, g3, be3),
                         matmul_dtype=matmul_dtype)
    out = jax.block_until_ready(out)
    ref = jax.block_until_ready(
        alpffn_reference(x, (w1_t, b1, w2_t, b2, w3_t, b3, g1, be1, g2, be2, g3, be3)))

    assert out.shape == (B, n, cout), out.shape
    assert bool(jnp.all(jnp.isfinite(out))), "non-finite output"
    err = float(jnp.max(jnp.abs(out - ref)))
    assert err < tol, f"max abs error {err} (tol {tol})"
    return err


if __name__ == "__main__":
    key = jax.random.PRNGKey(0)
    k1, k2, k3 = jax.random.split(key, 3)
    # f32-operand path: tight checks of the fused math, single-tile and multi-tile
    # (chid=320 -> two 256-wide hidden tiles, exercising the conv3 accumulation +
    # finalize-on-last-tile path).  Tolerance covers tanh-GELU vs exact erf-GELU.
    _run_case(k1, B=2, H=8, W=8, cin=8, chid=16, cout=8,
              matmul_dtype=jnp.float32, tol=8e-3)
    _run_case(k2, B=2, H=8, W=8, cin=8, chid=320, cout=8,
              matmul_dtype=jnp.float32, tol=8e-3)
    # Production bf16-operand path (MXU-native on v5e/v6e/v7x); looser tolerance for
    # bf16 rounding amplified through three BatchNorm renormalizations.
    _run_case(k3, B=2, H=8, W=8, cin=8, chid=16, cout=8,
              matmul_dtype=jnp.bfloat16, tol=1.5e-1)
    print("KERNEL_OK")
</pallas_src>

<mosaic_0001>
module attributes {stable_mosaic.version = 11 : i64} {
  func.func @alpffn_kernel(%arg0: i32, %arg1: memref<128x128xf32, #tpu.memory_space<vmem>>, %arg2: memref<128x128xf32, #tpu.memory_space<vmem>>, %arg3: memref<8x128xf32, #tpu.memory_space<vmem>>, %arg4: memref<16x128xf32, #tpu.memory_space<vmem>>, %arg5: memref<128x8xf32, #tpu.memory_space<vmem>>, %arg6: memref<8x128xf32, #tpu.memory_space<vmem>>, %arg7: memref<128x8xf32, #tpu.memory_space<vmem>>, %arg8: memref<128x128xf32, #tpu.memory_space<vmem>>, %arg9: memref<8x128xf32, #tpu.memory_space<vmem>>, %arg10: memref<128x128xf32, #tpu.memory_space<vmem>>) attributes {dimension_semantics = [#tpu.dimension_semantics<arbitrary>], iteration_bounds = array<i64: 1>, scalar_prefetch = 0 : i64, scratch_operands = 0 : i64, tpu.core_type = #tpu.core_type<tc>, window_params = [{pipeline_mode = #tpu.pipeline_mode<synchronous>, transform_indices = @transform_0, window_bounds = array<i64: 128, 128>}, {transform_indices = @transform_1, window_bounds = array<i64: 128, 128>}, {transform_indices = @transform_2, window_bounds = array<i64: 8, 128>}, {transform_indices = @transform_3, window_bounds = array<i64: 16, 128>}, {pipeline_mode = #tpu.pipeline_mode<synchronous>, transform_indices = @transform_4, window_bounds = array<i64: 128, 8>}, {pipeline_mode = #tpu.pipeline_mode<synchronous>, transform_indices = @transform_5, window_bounds = array<i64: 8, 128>}, {pipeline_mode = #tpu.pipeline_mode<synchronous>, transform_indices = @transform_6, window_bounds = array<i64: 128, 8>}, {transform_indices = @transform_7, window_bounds = array<i64: 128, 128>}, {pipeline_mode = #tpu.pipeline_mode<synchronous>, transform_indices = @transform_8, window_bounds = array<i64: 8, 128>}, {pipeline_mode = #tpu.pipeline_mode<synchronous>, transform_indices = @transform_9, window_bounds = array<i64: 128, 128>}]} {
    %c0 = arith.constant 0 : index
    %c0_0 = arith.constant 0 : index
    %0 = vector.load %arg6[%c0, %c0_0] : memref<8x128xf32, #tpu.memory_space<vmem>>, vector<1x128xf32>
    %c0_1 = arith.constant 0 : index
    %c0_2 = arith.constant 0 : index
    %1 = vector.load %arg1[%c0_1, %c0_2] : memref<128x128xf32, #tpu.memory_space<vmem>>, vector<128x128xf32>
    %c0_3 = arith.constant 0 : index
    %c0_4 = arith.constant 0 : index
    %2 = vector.load %arg2[%c0_3, %c0_4] : memref<128x128xf32, #tpu.memory_space<vmem>>, vector<128x128xf32>
    %cst = arith.constant dense<0.000000e+00> : vector<128x128xf32>
    %3 = tpu.matmul %1, %2, %cst {dimension_numbers = #tpu.dot_dimension_numbers<[1], [0], [0], [1], [0, 0, 1, 1], [], []>} : vector<128x128xf32>, vector<128x128xf32>, vector<128x128xf32> -> vector<128x128xf32>
    %c0_5 = arith.constant 0 : index
    %c0_6 = arith.constant 0 : index
    %4 = vector.load %arg3[%c0_5, %c0_6] : memref<8x128xf32, #tpu.memory_space<vmem>>, vector<1x128xf32>
    %5 = vector.broadcast %4 : vector<1x128xf32> to vector<128x128xf32>
    %6 = arith.addf %3, %5 : vector<128x128xf32>
    %c1 = arith.constant 1 : index
    %c0_7 = arith.constant 0 : index
    %7 = vector.load %arg3[%c1, %c0_7] : memref<8x128xf32, #tpu.memory_space<vmem>>, vector<1x128xf32>
    %c2 = arith.constant 2 : index
    %c0_8 = arith.constant 0 : index
    %8 = vector.load %arg3[%c2, %c0_8] : memref<8x128xf32, #tpu.memory_space<vmem>>, vector<1x128xf32>
    %cst_9 = arith.constant dense<0.000000e+00> : vector<1x128xf32>
    %9 = tpu.matmul %0, %6, %cst_9 {dimension_numbers = #tpu.dot_dimension_numbers<[1], [0], [0], [1], [0, 0, 1, 1], [], []>} : vector<1x128xf32>, vector<128x128xf32>, vector<1x128xf32> -> vector<1x128xf32>
    %10 = vector.broadcast %9 : vector<1x128xf32> to vector<128x128xf32>
    %11 = arith.subf %6, %10 : vector<128x128xf32>
    %12 = arith.mulf %11, %11 : vector<128x128xf32>
    %cst_10 = arith.constant dense<0.000000e+00> : vector<1x128xf32>
    %13 = tpu.matmul %0, %12, %cst_10 {dimension_numbers = #tpu.dot_dimension_numbers<[1], [0], [0], [1], [0, 0, 1, 1], [], []>} : vector<1x128xf32>, vector<128x128xf32>, vector<1x128xf32> -> vector<1x128xf32>
    %cst_11 = arith.constant 0.000000e+00 : f32
    %14 = vector.broadcast %cst_11 : f32 to vector<1x128xf32>
    %15 = arith.maximumf %13, %14 : vector<1x128xf32>
    %cst_12 = arith.constant 9.99999974E-6 : f32
    %16 = vector.broadcast %cst_12 : f32 to vector<1x128xf32>
    %17 = arith.addf %15, %16 : vector<1x128xf32>
    %18 = math.rsqrt %17 : vector<1x128xf32>
    %19 = vector.broadcast %18 : vector<1x128xf32> to vector<128x128xf32>
    %20 = arith.mulf %11, %19 : vector<128x128xf32>
    %21 = vector.broadcast %7 : vector<1x128xf32> to vector<128x128xf32>
    %22 = arith.mulf %20, %21 : vector<128x128xf32>
    %23 = vector.broadcast %8 : vector<1x128xf32> to vector<128x128xf32>
    %24 = arith.addf %22, %23 : vector<128x128xf32>
    %cst_13 = arith.constant 5.000000e-01 : f32
    %25 = vector.broadcast %cst_13 : f32 to vector<128x128xf32>
    %26 = arith.mulf %25, %24 : vector<128x128xf32>
    %cst_14 = arith.constant 0.797884583 : f32
    %27 = vector.broadcast %cst_14 : f32 to vector<128x128xf32>
    %28 = arith.mulf %27, %24 : vector<128x128xf32>
    %cst_15 = arith.constant 4.471500e-02 : f32
    %29 = vector.broadcast %cst_15 : f32 to vector<128x128xf32>
    %30 = arith.mulf %29, %24 : vector<128x128xf32>
    %31 = arith.mulf %30, %24 : vector<128x128xf32>
    %cst_16 = arith.constant 1.000000e+00 : f32
    %32 = vector.broadcast %cst_16 : f32 to vector<128x128xf32>
    %33 = arith.addf %32, %31 : vector<128x128xf32>
    %34 = arith.mulf %28, %33 : vector<128x128xf32>
    %35 = math.tanh %34 : vector<128x128xf32>
    %cst_17 = arith.constant 1.000000e+00 : f32
    %36 = vector.broadcast %cst_17 : f32 to vector<128x128xf32>
    %37 = arith.addf %36, %35 : vector<128x128xf32>
    %38 = arith.mulf %26, %37 : vector<128x128xf32>
    %c0_18 = arith.constant 0 : index
    %c0_19 = arith.constant 0 : index
    %39 = vector.load %arg5[%c0_18, %c0_19] : memref<128x8xf32, #tpu.memory_space<vmem>>, vector<128x1xf32>
    %c0_20 = arith.constant 0 : index
    %c1_21 = arith.constant 1 : index
    %40 = vector.load %arg5[%c0_20, %c1_21] : memref<128x8xf32, #tpu.memory_space<vmem>>, vector<128x1xf32>
    %c0_22 = arith.constant 0 : index
    %c2_23 = arith.constant 2 : index
    %41 = vector.load %arg5[%c0_22, %c2_23] : memref<128x8xf32, #tpu.memory_space<vmem>>, vector<128x1xf32>
    %c0_24 = arith.constant 0 : index
    %c3 = arith.constant 3 : index
    %42 = vector.load %arg5[%c0_24, %c3] : memref<128x8xf32, #tpu.memory_space<vmem>>, vector<128x1xf32>
    %c1_i32 = arith.constant 1 : i32
    %43 = tpu.dynamic_rotate %38 by %c1_i32 dim 0 : vector<128x128xf32>, i32 -> vector<128x128xf32>
    %44 = vector.broadcast %39 : vector<128x1xf32> to vector<128x128xf32>
    %45 = arith.mulf %44, %43 : vector<128x128xf32>
    %c127_i32 = arith.constant 127 : i32
    %46 = tpu.dynamic_rotate %38 by %c127_i32 dim 0 : vector<128x128xf32>, i32 -> vector<128x128xf32>
    %47 = vector.broadcast %40 : vector<128x1xf32> to vector<128x128xf32>
    %48 = arith.mulf %47, %46 : vector<128x128xf32>
    %c0_25 = arith.constant 0 : index
    %c0_26 = arith.constant 0 : index
    %49 = vector.load %arg4[%c0_25, %c0_26] : memref<16x128xf32, #tpu.memory_space<vmem>>, vector<1x128xf32>
    %50 = vector.broadcast %49 : vector<1x128xf32> to vector<128x128xf32>
    %51 = arith.mulf %50, %45 : vector<128x128xf32>
    %c1_27 = arith.constant 1 : index
    %c0_28 = arith.constant 0 : index
    %52 = vector.load %arg4[%c1_27, %c0_28] : memref<16x128xf32, #tpu.memory_space<vmem>>, vector<1x128xf32>
    %53 = vector.broadcast %52 : vector<1x128xf32> to vector<128x128xf32>
    %54 = arith.mulf %53, %38 : vector<128x128xf32>
    %55 = arith.addf %51, %54 : vector<128x128xf32>
    %c2_29 = arith.constant 2 : index
    %c0_30 = arith.constant 0 : index
    %56 = vector.load %arg4[%c2_29, %c0_30] : memref<16x128xf32, #tpu.memory_space<vmem>>, vector<1x128xf32>
    %57 = vector.broadcast %56 : vector<1x128xf32> to vector<128x128xf32>
    %58 = arith.mulf %57, %48 : vector<128x128xf32>
    %59 = arith.addf %55, %58 : vector<128x128xf32>
    %c3_31 = arith.constant 3 : index
    %c0_32 = arith.constant 0 : index
    %60 = vector.load %arg4[%c3_31, %c0_32] : memref<16x128xf32, #tpu.memory_space<vmem>>, vector<1x128xf32>
    %61 = vector.broadcast %60 : vector<1x128xf32> to vector<128x128xf32>
    %62 = arith.mulf %61, %45 : vector<128x128xf32>
    %c4 = arith.constant 4 : index
    %c0_33 = arith.constant 0 : index
    %63 = vector.load %arg4[%c4, %c0_33] : memref<16x128xf32, #tpu.memory_space<vmem>>, vector<1x128xf32>
    %64 = vector.broadcast %63 : vector<1x128xf32> to vector<128x128xf32>
    %65 = arith.mulf %64, %38 : vector<128x128xf32>
    %66 = arith.addf %62, %65 : vector<128x128xf32>
    %c5 = arith.constant 5 : index
    %c0_34 = arith.constant 0 : index
    %67 = vector.load %arg4[%c5, %c0_34] : memref<16x128xf32, #tpu.memory_space<vmem>>, vector<1x128xf32>
    %68 = vector.broadcast %67 : vector<1x128xf32> to vector<128x128xf32>
    %69 = arith.mulf %68, %48 : vector<128x128xf32>
    %70 = arith.addf %66, %69 : vector<128x128xf32>
    %c6 = arith.constant 6 : index
    %c0_35 = arith.constant 0 : index
    %71 = vector.load %arg4[%c6, %c0_35] : memref<16x128xf32, #tpu.memory_space<vmem>>, vector<1x128xf32>
    %72 = vector.broadcast %71 : vector<1x128xf32> to vector<128x128xf32>
    %73 = arith.mulf %72, %45 : vector<128x128xf32>
    %c7 = arith.constant 7 : index
    %c0_36 = arith.constant 0 : index
    %74 = vector.load %arg4[%c7, %c0_36] : memref<16x128xf32, #tpu.memory_space<vmem>>, vector<1x128xf32>
    %75 = vector.broadcast %74 : vector<1x128xf32> to vector<128x128xf32>
    %76 = arith.mulf %75, %38 : vector<128x128xf32>
    %77 = arith.addf %73, %76 : vector<128x128xf32>
    %c8 = arith.constant 8 : index
    %c0_37 = arith.constant 0 : index
    %78 = vector.load %arg4[%c8, %c0_37] : memref<16x128xf32, #tpu.memory_space<vmem>>, vector<1x128xf32>
    %79 = vector.broadcast %78 : vector<1x128xf32> to vector<128x128xf32>
    %80 = arith.mulf %79, %48 : vector<128x128xf32>
    %81 = arith.addf %77, %80 : vector<128x128xf32>
    %c8_i32 = arith.constant 8 : i32
    %82 = tpu.dynamic_rotate %59 by %c8_i32 dim 0 : vector<128x128xf32>, i32 -> vector<128x128xf32>
    %83 = vector.broadcast %41 : vector<128x1xf32> to vector<128x128xf32>
    %84 = arith.mulf %83, %82 : vector<128x128xf32>
    %85 = arith.addf %70, %84 : vector<128x128xf32>
    %c120_i32 = arith.constant 120 : i32
    %86 = tpu.dynamic_rotate %81 by %c120_i32 dim 0 : vector<128x128xf32>, i32 -> vector<128x128xf32>
    %87 = vector.broadcast %42 : vector<128x1xf32> to vector<128x128xf32>
    %88 = arith.mulf %87, %86 : vector<128x128xf32>
    %89 = arith.addf %85, %88 : vector<128x128xf32>
    %c3_38 = arith.constant 3 : index
    %c0_39 = arith.constant 0 : index
    %90 = vector.load %arg3[%c3_38, %c0_39] : memref<8x128xf32, #tpu.memory_space<vmem>>, vector<1x128xf32>
    %91 = vector.broadcast %90 : vector<1x128xf32> to vector<128x128xf32>
    %92 = arith.addf %89, %91 : vector<128x128xf32>
    %c4_40 = arith.constant 4 : index
    %c0_41 = arith.constant 0 : index
    %93 = vector.load %arg3[%c4_40, %c0_41] : memref<8x128xf32, #tpu.memory_space<vmem>>, vector<1x128xf32>
    %c5_42 = arith.constant 5 : index
    %c0_43 = arith.constant 0 : index
    %94 = vector.load %arg3[%c5_42, %c0_43] : memref<8x128xf32, #tpu.memory_space<vmem>>, vector<1x128xf32>
    %cst_44 = arith.constant dense<0.000000e+00> : vector<1x128xf32>
    %95 = tpu.matmul %0, %92, %cst_44 {dimension_numbers = #tpu.dot_dimension_numbers<[1], [0], [0], [1], [0, 0, 1, 1], [], []>} : vector<1x128xf32>, vector<128x128xf32>, vector<1x128xf32> -> vector<1x128xf32>
    %96 = vector.broadcast %95 : vector<1x128xf32> to vector<128x128xf32>
    %97 = arith.subf %92, %96 : vector<128x128xf32>
    %98 = arith.mulf %97, %97 : vector<128x128xf32>
    %cst_45 = arith.constant dense<0.000000e+00> : vector<1x128xf32>
    %99 = tpu.matmul %0, %98, %cst_45 {dimension_numbers = #tpu.dot_dimension_numbers<[1], [0], [0], [1], [0, 0, 1, 1], [], []>} : vector<1x128xf32>, vector<128x128xf32>, vector<1x128xf32> -> vector<1x128xf32>
    %cst_46 = arith.constant 0.000000e+00 : f32
    %100 = vector.broadcast %cst_46 : f32 to vector<1x128xf32>
    %101 = arith.maximumf %99, %100 : vector<1x128xf32>
    %cst_47 = arith.constant 9.99999974E-6 : f32
    %102 = vector.broadcast %cst_47 : f32 to vector<1x128xf32>
    %103 = arith.addf %101, %102 : vector<1x128xf32>
    %104 = math.rsqrt %103 : vector<1x128xf32>
    %105 = vector.broadcast %104 : vector<1x128xf32> to vector<128x128xf32>
    %106 = arith.mulf %97, %105 : vector<128x128xf32>
    %107 = vector.broadcast %93 : vector<1x128xf32> to vector<128x128xf32>
    %108 = arith.mulf %106, %107 : vector<128x128xf32>
    %109 = vector.broadcast %94 : vector<1x128xf32> to vector<128x128xf32>
    %110 = arith.addf %108, %109 : vector<128x128xf32>
    %cst_48 = arith.constant 5.000000e-01 : f32
    %111 = vector.broadcast %cst_48 : f32 to vector<128x128xf32>
    %112 = arith.mulf %111, %110 : vector<128x128xf32>
    %cst_49 = arith.constant 0.797884583 : f32
    %113 = vector.broadcast %cst_49 : f32 to vector<128x128xf32>
    %114 = arith.mulf %113, %110 : vector<128x128xf32>
    %cst_50 = arith.constant 4.471500e-02 : f32
    %115 = vector.broadcast %cst_50 : f32 to vector<128x128xf32>
    %116 = arith.mulf %115, %110 : vector<128x128xf32>
    %117 = arith.mulf %116, %110 : vector<128x128xf32>
    %cst_51 = arith.constant 1.000000e+00 : f32
    %118 = vector.broadcast %cst_51 : f32 to vector<128x128xf32>
    %119 = arith.addf %118, %117 : vector<128x128xf32>
    %120 = arith.mulf %114, %119 : vector<128x128xf32>
    %121 = math.tanh %120 : vector<128x128xf32>
    %cst_52 = arith.constant 1.000000e+00 : f32
    %122 = vector.broadcast %cst_52 : f32 to vector<128x128xf32>
    %123 = arith.addf %122, %121 : vector<128x128xf32>
    %124 = arith.mulf %112, %123 : vector<128x128xf32>
    %c0_53 = arith.constant 0 : index
    %c0_54 = arith.constant 0 : index
    %125 = vector.load %arg8[%c0_53, %c0_54] : memref<128x128xf32, #tpu.memory_space<vmem>>, vector<128x128xf32>
    %cst_55 = arith.constant dense<0.000000e+00> : vector<128x128xf32>
    %126 = tpu.matmul %124, %125, %cst_55 {dimension_numbers = #tpu.dot_dimension_numbers<[1], [0], [0], [1], [0, 0, 1, 1], [], []>} : vector<128x128xf32>, vector<128x128xf32>, vector<128x128xf32> -> vector<128x128xf32>
    %c0_i32 = arith.constant 0 : i32
    %127 = arith.cmpi eq, %arg0, %c0_i32 : i32
    %128 = arith.extui %127 : i1 to i32
    %c0_i32_56 = arith.constant 0 : i32
    %129 = arith.cmpi ne, %128, %c0_i32_56 : i32
    scf.if %129 {
      %c0_61 = arith.constant 0 : index
      %c0_62 = arith.constant 0 : index
      %136 = vector.load %arg10[%c0_61, %c0_62] : memref<128x128xf32, #tpu.memory_space<vmem>>, vector<128x128xf32>
      tpu.vector_store %arg10[%c0_61, %c0_62], %126 {strides = array<i32>} : memref<128x128xf32, #tpu.memory_space<vmem>>, vector<128x128xf32>,
    } else {
    }
    %c0_i32_57 = arith.constant 0 : i32
    %130 = arith.cmpi ne, %arg0, %c0_i32_57 : i32
    %131 = arith.extui %130 : i1 to i32
    %c0_i32_58 = arith.constant 0 : i32
    %132 = arith.cmpi ne, %131, %c0_i32_58 : i32
    scf.if %132 {
      %c0_61 = arith.constant 0 : index
      %c0_62 = arith.constant 0 : index
      %136 = vector.load %arg10[%c0_61, %c0_62] : memref<128x128xf32, #tpu.memory_space<vmem>>, vector<128x128xf32>
      %137 = arith.addf %136, %126 : vector<128x128xf32>
      %c0_63 = arith.constant 0 : index
      %c0_64 = arith.constant 0 : index
      %138 = vector.load %arg10[%c0_63, %c0_64] : memref<128x128xf32, #tpu.memory_space<vmem>>, vector<128x128xf32>
      tpu.vector_store %arg10[%c0_63, %c0_64], %137 {strides = array<i32>} : memref<128x128xf32, #tpu.memory_space<vmem>>, vector<128x128xf32>,
    } else {
    }
    %c0_i32_59 = arith.constant 0 : i32
    %133 = arith.cmpi eq, %arg0, %c0_i32_59 : i32
    %134 = arith.extui %133 : i1 to i32
    %c0_i32_60 = arith.constant 0 : i32
    %135 = arith.cmpi ne, %134, %c0_i32_60 : i32
    scf.if %135 {
      %c0_61 = arith.constant 0 : index
      %c0_62 = arith.constant 0 : index
      %136 = vector.load %arg10[%c0_61, %c0_62] : memref<128x128xf32, #tpu.memory_space<vmem>>, vector<128x128xf32>
      %c0_63 = arith.constant 0 : index
      %c0_64 = arith.constant 0 : index
      %137 = vector.load %arg9[%c0_63, %c0_64] : memref<8x128xf32, #tpu.memory_space<vmem>>, vector<1x128xf32>
      %138 = vector.broadcast %137 : vector<1x128xf32> to vector<128x128xf32>
      %139 = arith.addf %136, %138 : vector<128x128xf32>
      %c1_65 = arith.constant 1 : index
      %c0_66 = arith.constant 0 : index
      %140 = vector.load %arg9[%c1_65, %c0_66] : memref<8x128xf32, #tpu.memory_space<vmem>>, vector<1x128xf32>
      %c2_67 = arith.constant 2 : index
      %c0_68 = arith.constant 0 : index
      %141 = vector.load %arg9[%c2_67, %c0_68] : memref<8x128xf32, #tpu.memory_space<vmem>>, vector<1x128xf32>
      %cst_69 = arith.constant dense<0.000000e+00> : vector<1x128xf32>
      %142 = tpu.matmul %0, %139, %cst_69 {dimension_numbers = #tpu.dot_dimension_numbers<[1], [0], [0], [1], [0, 0, 1, 1], [], []>} : vector<1x128xf32>, vector<128x128xf32>, vector<1x128xf32> -> vector<1x128xf32>
      %143 = vector.broadcast %142 : vector<1x128xf32> to vector<128x128xf32>
      %144 = arith.subf %139, %143 : vector<128x128xf32>
      %145 = arith.mulf %144, %144 : vector<128x128xf32>
      %cst_70 = arith.constant dense<0.000000e+00> : vector<1x128xf32>
      %146 = tpu.matmul %0, %145, %cst_70 {dimension_numbers = #tpu.dot_dimension_numbers<[1], [0], [0], [1], [0, 0, 1, 1], [], []>} : vector<1x128xf32>, vector<128x128xf32>, vector<1x128xf32> -> vector<1x128xf32>
      %cst_71 = arith.constant 0.000000e+00 : f32
      %147 = vector.broadcast %cst_71 : f32 to vector<1x128xf32>
      %148 = arith.maximumf %146, %147 : vector<1x128xf32>
      %cst_72 = arith.constant 9.99999974E-6 : f32
      %149 = vector.broadcast %cst_72 : f32 to vector<1x128xf32>
      %150 = arith.addf %148, %149 : vector<1x128xf32>
      %151 = math.rsqrt %150 : vector<1x128xf32>
      %152 = vector.broadcast %151 : vector<1x128xf32> to vector<128x128xf32>
      %153 = arith.mulf %144, %152 : vector<128x128xf32>
      %154 = vector.broadcast %140 : vector<1x128xf32> to vector<128x128xf32>
      %155 = arith.mulf %153, %154 : vector<128x128xf32>
      %156 = vector.broadcast %141 : vector<1x128xf32> to vector<128x128xf32>
      %157 = arith.addf %155, %156 : vector<128x128xf32>
      %c0_73 = arith.constant 0 : index
      %c0_74 = arith.constant 0 : index
      %158 = vector.load %arg6[%c0_73, %c0_74] : memref<8x128xf32, #tpu.memory_space<vmem>>, vector<8x128xf32>
      %cst_75 = arith.constant dense<0.000000e+00> : vector<8x128xf32>
      %159 = tpu.matmul %158, %157, %cst_75 {dimension_numbers = #tpu.dot_dimension_numbers<[1], [0], [0], [1], [0, 0, 1, 1], [], []>} : vector<8x128xf32>, vector<128x128xf32>, vector<8x128xf32> -> vector<8x128xf32>
      %c0_76 = arith.constant 0 : index
      %c0_77 = arith.constant 0 : index
      %160 = vector.load %arg7[%c0_76, %c0_77] : memref<128x8xf32, #tpu.memory_space<vmem>>, vector<128x8xf32>
      %cst_78 = arith.constant dense<0.000000e+00> : vector<128x128xf32>
      %161 = tpu.matmul %160, %159, %cst_78 {dimension_numbers = #tpu.dot_dimension_numbers<[1], [0], [0], [1], [0, 0, 1, 1], [], []>} : vector<128x8xf32>, vector<8x128xf32>, vector<128x128xf32> -> vector<128x128xf32>
      %162 = arith.addf %157, %161 : vector<128x128xf32>
      %cst_79 = arith.constant 5.000000e-01 : f32
      %163 = vector.broadcast %cst_79 : f32 to vector<128x128xf32>
      %164 = arith.mulf %162, %163 : vector<128x128xf32>
      %c0_80 = arith.constant 0 : index
      %c0_81 = arith.constant 0 : index
      %165 = vector.load %arg10[%c0_80, %c0_81] : memref<128x128xf32, #tpu.memory_space<vmem>>, vector<128x128xf32>
      tpu.vector_store %arg10[%c0_80, %c0_81], %164 {strides = array<i32>} : memref<128x128xf32, #tpu.memory_space<vmem>>, vector<128x128xf32>,
    } else {
    }
    return
  }
  func.func @transform_0(%arg0: i32) -> (i32, i32) {
    %c0_i32 = arith.constant 0 : i32
    %c0_i32_0 = arith.constant 0 : i32
    %c0_i32_1 = arith.constant 0 : i32
    return %c0_i32, %c0_i32_0 : i32, i32
  }
  func.func @transform_1(%arg0: i32) -> (i32, i32) {
    %c0_i32 = arith.constant 0 : i32
    %c0_i32_0 = arith.constant 0 : i32
    return %c0_i32, %arg0 : i32, i32
  }
  func.func @transform_2(%arg0: i32) -> (i32, i32) {
    %c0_i32 = arith.constant 0 : i32
    %c0_i32_0 = arith.constant 0 : i32
    return %c0_i32, %arg0 : i32, i32
  }
  func.func @transform_3(%arg0: i32) -> (i32, i32) {
    %c0_i32 = arith.constant 0 : i32
    %c0_i32_0 = arith.constant 0 : i32
    return %c0_i32, %arg0 : i32, i32
  }
  func.func @transform_4(%arg0: i32) -> (i32, i32) {
    %c0_i32 = arith.constant 0 : i32
    %c0_i32_0 = arith.constant 0 : i32
    %c0_i32_1 = arith.constant 0 : i32
    return %c0_i32, %c0_i32_0 : i32, i32
  }
  func.func @transform_5(%arg0: i32) -> (i32, i32) {
    %c0_i32 = arith.constant 0 : i32
    %c0_i32_0 = arith.constant 0 : i32
    %c0_i32_1 = arith.constant 0 : i32
    return %c0_i32, %c0_i32_0 : i32, i32
  }
  func.func @transform_6(%arg0: i32) -> (i32, i32) {
    %c0_i32 = arith.constant 0 : i32
    %c0_i32_0 = arith.constant 0 : i32
    %c0_i32_1 = arith.constant 0 : i32
    return %c0_i32, %c0_i32_0 : i32, i32
  }
  func.func @transform_7(%arg0: i32) -> (i32, i32) {
    %c0_i32 = arith.constant 0 : i32
    %c0_i32_0 = arith.constant 0 : i32
    return %arg0, %c0_i32 : i32, i32
  }
  func.func @transform_8(%arg0: i32) -> (i32, i32) {
    %c0_i32 = arith.constant 0 : i32
    %c0_i32_0 = arith.constant 0 : i32
    %c0_i32_1 = arith.constant 0 : i32
    return %c0_i32, %c0_i32_0 : i32, i32
  }
  func.func @transform_9(%arg0: i32) -> (i32, i32) {
    %c0_i32 = arith.constant 0 : i32
    %c0_i32_0 = arith.constant 0 : i32
    %c0_i32_1 = arith.constant 0 : i32
    return %c0_i32, %c0_i32_0 : i32, i32
  }
}

</mosaic_0001>

<bundles_post_ra>
// kernel: tpu_custom_call.1
= control target key start
LH: loop header
LB: loop body
LE: loop exit
PB: predicated region body
PF: predicated region fallthrough
CT: control target
= control target key end

     0   :  { %14 = vsyncpa [#allocation3], 0  ;;  %s5684_s0 = inlined_call_operand.vmem [shape: f32[128,128], index: 0, kind: input, shape index: {}]   ;;  %s5685_s1 = inlined_call_operand.vmem [shape: f32[128,128], index: 1, kind: input, shape index: {}]   ;;  %s5686_s2 = inlined_call_operand.hbm [shape: f32[8,128], index: 2, kind: input, shape index: {}]   ;;  %s5687_s3 = inlined_call_operand.vmem [shape: f32[16,128], index: 3, kind: input, shape index: {}]   ;;  %s5688_s4 = inlined_call_operand.vmem [shape: f32[128,8], index: 4, kind: input, shape index: {}]   ;;  %s5689_s5 = inlined_call_operand.vmem [shape: f32[8,128], index: 5, kind: input, shape index: {}]   ;;  %s5690_s6 = inlined_call_operand.vmem [shape: f32[128,8], index: 6, kind: input, shape index: {}]   ;;  %s5691_s7 = inlined_call_operand.hbm [shape: f32[128,128], index: 7, kind: input, shape index: {}]   ;;  %s5692_s8 = inlined_call_operand.vmem [shape: f32[8,128], index: 8, kind: input, shape index: {}]   ;;  %s5693_s9 = inlined_call_operand.hbm [shape: f32[128,128], index: 9, kind: output, shape index: {}]  }
   0x1   :  { %15 = vsyncpa [#allocation6], 0 }
   0x2   :  { %16 = vsyncpa [#allocation4], 0  ;;  %s3671_s30 = smov [#allocation2]   ;;  %s3672_s11 = smov [#allocation5]  }
   0x3   :  { %s27_s10 = sshll.u32 %s3671_s30, 4  ;;  %s44_s12 = sshll.u32 %s3672_s11, 4  ;;  %s28_s10 = int_to_ptr.vmem [resolvable:$true] %s27_s10  ;;  %s3733_s12 = int_to_ptr.vmem [resolvable:$true] %s44_s12 }
   0x4   :  { %s3599_s15 = scalar_lea.hbm %s5686_s2, 128 }
   0x5   :  { %p3600_p0 = scmp.ne.s32.totalorder %s5686_s2, %s3599_s15  ;;  %p3603_p1 = scmp.lt.u32.totalorder %s3599_s15, %s5686_s2 }
   0x7   :  { %p3605_p2 = pnand %p3603_p1, %p3600_p0 }
   0x9   :  { %3608 = shalt.err (!%p3605_p2)
}
   0xa   :  { %s3609_s20 = scalar_lea.vmem %s28_s10, 128  ;;  %p3614_p4 = scmp.lt.s32.totalorder %s28_s10, %s28_s10 }
   0xb   :  { %p3610_p3 = scmp.ne.s32.totalorder %s28_s10, %s3609_s20  ;;  %p3615_p5 = scmp.lt.s32.totalorder %s3609_s20, %s3609_s20 }
   0xd   :  { %p3616_p6 = por %p3615_p5, %p3614_p4 }
   0xf   :  { %p3617_p7 = pnand %p3616_p6, %p3610_p3 }
  0x11   :  { %3620 = shalt.err (!%p3617_p7)
}
  0x12   :  { %30 = dma.hbm_to_vmem [thread:$0]  %s5686_s2, 128, %s28_s10, [#allocation3]  }
  0x13   :  { %s3621_s25 = scalar_lea.hbm %s5691_s7, 2048 }
  0x14   :  { %p3622_p8 = scmp.ne.s32.totalorder %s5691_s7, %s3621_s25  ;;  %p3625_p9 = scmp.lt.u32.totalorder %s3621_s25, %s5691_s7 }
  0x16   :  { %p3627_p10 = pnand %p3625_p9, %p3622_p8 }
  0x18   :  { %3630 = shalt.err (!%p3627_p10)
}
  0x19   :  { %s3631_s30 = scalar_lea.vmem %s3733_s12, 2048  ;;  %p3636_p12 = scmp.lt.s32.totalorder %s3733_s12, %s3733_s12 }
  0x1a   :  { %p3632_p11 = scmp.ne.s32.totalorder %s3733_s12, %s3631_s30  ;;  %p3637_p13 = scmp.lt.s32.totalorder %s3631_s30, %s3631_s30 }
  0x1c   :  { %p3638_p0 = por %p3637_p13, %p3636_p12 }
  0x1e   :  { %p3639_p1 = pnand %p3638_p0, %p3632_p11 }
  0x20   :  { %3642 = shalt.err (!%p3639_p1)
}
  0x21   :  { %s3673_s2 = smov 128   ;;  %s3674_s10 = smov 8  }
  0x22   :  { %50 = dma.hbm_to_vmem [thread:$0]  %s5691_s7, 2048, %s3733_s12, [#allocation6], %s3673_s2, %s3673_s2, %s3674_s10  }
  0x23   :  { %3665 = dma.done.wait [#allocation3], 128  }
  0x24   :  { %3666 = vsyncadd [#allocation3], 4294967168 }
  0x25   :  { %3667 = dma.done.wait [#allocation6], 2048  }
  0x26   :  { %3668 = vsyncadd [#allocation6], 4294965248  ;;  %v76_v0 = vld [vmem:[%s5685_s1] sm:$0xff]  ;;  %v77_v1 = vld [vmem:[%s5685_s1 + $0x8] sm:$0xff]  ;;  %v5696_v40 = vmov 0.0|0.0   ;;  %vm3676_vm0 = vmmov 0  }
  0x27   :  { %v78_v2 = vld [vmem:[%s5685_s1 + $0x10] sm:$0xff]  ;;  %v3248_v3 = vpack.c.bf16 %v77_v1, %v76_v0  ;;  %v79_v4 = vld [vmem:[%s5685_s1 + $0x18] sm:$0xff]  ;;  %v80_v6 = vld [vmem:[%s5685_s1 + $0x20] sm:$0xff]  ;;  %3280 = vmatprep.subr.bf16.mxu1 %v5696_v40  ;;  %v5694_v41 = vmov 0.0   ;;  %v3678_v43 = vmov 0   ;;  %v3679_v45 = vmov 1  }
  0x28   :  { %v3252_v5 = vpack.c.bf16 %v79_v4, %v78_v2  ;;  %v81_v7 = vld [vmem:[%s5685_s1 + $0x28] sm:$0xff]  ;;  %v60_v9 = vld [vmem:[%s5684_s0] sm:$0xff]  ;;  %v82_v10 = vld [vmem:[%s5685_s1 + $0x30] sm:$0xff]  ;;  %2953 = vmatprep.mubr.msk.f32.mxu1 %vm3676_vm0, %v5694_v41  ;;  %3492 = vset.pattern.permute.xlu1 %v3678_v43  ;;  %vm2371_vm3 = vcmask 64512  }
  0x29   :  { %3249 = vmatprep.subr.bf16.mxu0 %v3248_v3  ;;  %v3256_v8 = vpack.c.bf16 %v81_v7, %v80_v6  ;;  %v83_v11 = vld [vmem:[%s5685_s1 + $0x38] sm:$0xff]  ;;  %2897 = vmatprep.mubr.f32.mxu0 %v60_v9  ;;  %v84_v13 = vld [vmem:[%s5685_s1 + $0x40] sm:$0xff]  ;;  %v85_v14 = vld [vmem:[%s5685_s1 + $0x48] sm:$0xff] }
  0x2a   :  { %3251 = vmatpush3.bf16.msra.mxu0 %v3248_v3  ;;  %v3260_v12 = vpack.c.bf16 %v83_v11, %v82_v10  ;;  %v3264_v15 = vpack.c.bf16 %v85_v14, %v84_v13  ;;  %v86_v16 = vld [vmem:[%s5685_s1 + $0x50] sm:$0xff]  ;;  %v87_v17 = vld [vmem:[%s5685_s1 + $0x58] sm:$0xff]  ;;  %v88_v19 = vld [vmem:[%s5685_s1 + $0x60] sm:$0xff] }
  0x2b   :  { %3253 = vmatprep.subr.bf16.mxu0 %v3252_v5  ;;  %v3268_v18 = vpack.c.bf16 %v87_v17, %v86_v16  ;;  %v89_v20 = vld [vmem:[%s5685_s1 + $0x68] sm:$0xff]  ;;  %v90_v22 = vld [vmem:[%s5685_s1 + $0x70] sm:$0xff]  ;;  %v91_v23 = vld [vmem:[%s5685_s1 + $0x78] sm:$0xff] }
  0x2c   :  { %v3272_v21 = vpack.c.bf16 %v89_v20, %v88_v19  ;;  %v3276_v24 = vpack.c.bf16 %v91_v23, %v90_v22  ;;  %v61_v25 = vld [vmem:[%s5684_s0 + $0x8] sm:$0xff]  ;;  %v62_v26 = vld [vmem:[%s5684_s0 + $0x10] sm:$0xff]  ;;  %v63_v27 = vld [vmem:[%s5684_s0 + $0x18] sm:$0xff] }
  0x2d   :  { %v64_v28 = vld [vmem:[%s5684_s0 + $0x20] sm:$0xff]  ;;  %v65_v29 = vld [vmem:[%s5684_s0 + $0x28] sm:$0xff]  ;;  %v66_v30 = vld [vmem:[%s5684_s0 + $0x30] sm:$0xff] }
  0x2e   :  { %3255 = vmatpush3.bf16.msra.mxu0 %v3252_v5  ;;  %v67_v31 = vld [vmem:[%s5684_s0 + $0x38] sm:$0xff]  ;;  %v68_v32 = vld [vmem:[%s5684_s0 + $0x40] sm:$0xff]  ;;  %v69_v33 = vld [vmem:[%s5684_s0 + $0x48] sm:$0xff] }
  0x2f   :  { %3257 = vmatprep.subr.bf16.mxu0 %v3256_v8  ;;  %v70_v34 = vld [vmem:[%s5684_s0 + $0x50] sm:$0xff]  ;;  %v71_v35 = vld [vmem:[%s5684_s0 + $0x58] sm:$0xff]  ;;  %v72_v36 = vld [vmem:[%s5684_s0 + $0x60] sm:$0xff] }
  0x30   :  { %v73_v37 = vld [vmem:[%s5684_s0 + $0x68] sm:$0xff]  ;;  %v74_v38 = vld [vmem:[%s5684_s0 + $0x70] sm:$0xff]  ;;  %v75_v39 = vld [vmem:[%s5684_s0 + $0x78] sm:$0xff] }
  0x31   :  { %v3872_v42 = vld [vmem:[%s5688_s4 + $0x8] sm:$0xff]  ;;  %v3879_v44 = vld [vmem:[%s5688_s4 + $0x10] sm:$0xff]  ;;  %v2631_v46 = vld [vmem:[#allocation2] ss:$0 sm:$0xff] }
  0x32   :  { %3259 = vmatpush3.bf16.msra.mxu0 %v3256_v8  ;;  %685 = vperm.xlu1 %3492, %v3872_v42   ;;  %v3941_v23 = vld [vmem:[%s5689_s5] sm:$0x1] }
  0x33   :  { %3261 = vmatprep.subr.bf16.mxu0 %v3260_v12 }
  0x36   :  { %3263 = vmatpush3.bf16.msra.mxu0 %v3260_v12  ;;  %690 = vperm.xlu1 %3492, %v3879_v44  }
  0x37   :  { %3265 = vmatprep.subr.bf16.mxu0 %v3264_v15 }
  0x3a   :  { %3267 = vmatpush3.bf16.msra.mxu0 %v3264_v15  ;;  %3493 = vset.pattern.permute.xlu1 %v3679_v45 }
  0x3b   :  { %3269 = vmatprep.subr.bf16.mxu0 %v3268_v18 }
  0x3e   :  { %3271 = vmatpush3.bf16.msra.mxu0 %v3268_v18 }
  0x3f   :  { %3273 = vmatprep.subr.bf16.mxu0 %v3272_v21 }
  0x42   :  { %3275 = vmatpush3.bf16.msra.mxu0 %v3272_v21 }
  0x43   :  { %3277 = vmatprep.subr.bf16.mxu0 %v3276_v24 }
  0x46   :  { %3279 = vmatpush3.bf16.msra.mxu0 %v3276_v24  ;;  %v3950_v24 = vld [vmem:[%s5688_s4 + $0x78] sm:$0xff] }
  0x47   :  { %3304 = vmatprep.subr.bf16.mxu0 %v5696_v40  ;;  %868 = vperm.xlu1 %3493, %v3950_v24  }
  0x49   :  { %2898 = vmatmul.mubr.f32.vlgmr.msra.gmra.mrb[0].mxu0 %v61_v25  ;;  %v630_v25 = vld [vmem:[%s5688_s4 + $0x18] sm:$0xff] }
  0x4a   :  { %2900 = vmatprep.mubr.f32.mxu0 %v62_v26  ;;  %v631_v26 = vld [vmem:[%s5688_s4 + $0x20] sm:$0xff] }
  0x4b   :  { %812 = vperm.xlu1 %3493, %v3872_v42  }
  0x4d   :  { %2901 = vmatmul.mubr.f32.gmra.mrb[2].mxu0 %v63_v27  ;;  %v3680_v27 = vmov 2  }
  0x4e   :  { %2903 = vmatprep.mubr.f32.mxu0 %v64_v28  ;;  %3496 = vset.pattern.permute.xlu0 %v3680_v27  ;;  %v632_v28 = vld [vmem:[%s5688_s4 + $0x28] sm:$0xff] }
  0x4f   :  { %3494 = vset.pattern.permute.xlu1 %v3678_v43 }
  0x50   :  { %695 = vperm.xlu1 %3494, %v630_v25  }
  0x51   :  { %2904 = vmatmul.mubr.f32.gmra.mrb[4].mxu0 %v65_v29  ;;  %v3681_v29 = vmov 3  }
  0x52   :  { %2906 = vmatprep.mubr.f32.mxu0 %v66_v30  ;;  %v627_v30 = vld [vmem:[%s5688_s4] sm:$0xff] }
  0x53   :  { %1173 = vperm.xlu0 %3496, %v627_v30  }
  0x54   :  { %3495 = vset.pattern.permute.xlu1 %v3679_v45 }
  0x55   :  { %2907 = vmatmul.mubr.f32.gmra.mrb[6].mxu0 %v67_v31  ;;  %820 = vperm.xlu1 %3495, %v630_v25   ;;  %v633_v31 = vld [vmem:[%s5688_s4 + $0x30] sm:$0xff] }
  0x56   :  { %2909 = vmatprep.mubr.f32.mxu0 %v68_v32  ;;  %v634_v32 = vld [vmem:[%s5688_s4 + $0x38] sm:$0xff] }
  0x57   :  { %1185 = vperm.xlu0 %3496, %v630_v25  }
  0x59   :  { %2910 = vmatmul.mubr.f32.gmra.mrb[8].mxu0 %v69_v33  ;;  %824 = vperm.xlu1 %3495, %v631_v26   ;;  %v635_v33 = vld [vmem:[%s5688_s4 + $0x40] sm:$0xff] }
  0x5a   :  { %2912 = vmatprep.mubr.f32.mxu0 %v70_v34  ;;  %v3992_v34 = vld [vmem:[%s5688_s4 + $0x48] sm:$0xff] }
  0x5b   :  { %3502 = vset.pattern.permute.xlu0 %v3678_v43 }
  0x5c   :  { %680 = vperm.xlu0 %3502, %v627_v30  }
  0x5d   :  { %2913 = vmatmul.mubr.f32.gmra.mrb[10].mxu0 %v71_v35  ;;  %3497 = vset.pattern.permute.xlu1 %v3680_v27  ;;  %v3998_v35 = vld [vmem:[%s5688_s4 + $0x60] sm:$0xff] }
  0x5e   :  { %2915 = vmatprep.mubr.f32.mxu0 %v72_v36  ;;  %1177 = vperm.xlu1 %3497, %v3872_v42   ;;  %v4009_v36 = vld [vmem:[%s5688_s4 + $0x50] sm:$0xff] }
  0x60   :  { %755 = vperm.xlu0 %3502, %v3950_v24  }
  0x61   :  { %2916 = vmatmul.mubr.f32.gmra.mrb[12].mxu0 %v73_v37  ;;  %v4016_v37 = vld [vmem:[%s5688_s4 + $0x58] sm:$0xff] }
  0x62   :  { %2918 = vmatprep.mubr.f32.mxu0 %v74_v38  ;;  %3498 = vset.pattern.permute.xlu1 %v3678_v43  ;;  %v641_v38 = vld [vmem:[%s5688_s4 + $0x70] sm:$0xff] }
  0x63   :  { %705 = vperm.xlu1 %3498, %v632_v28  }
  0x64   :  { %700 = vperm.xlu0 %3502, %v631_v26  }
  0x65   :  { %2919 = vmatmul.mubr.f32.gmra.mrb[14].mxu0 %v75_v39  ;;  %v314_v39 = vlaneseq }
  0x66   :  { %2988 = vmatprep.mubr.msk.f32.mxu0 %vm3676_vm0, %v5694_v41 }
  0x67   :  { %3499 = vset.pattern.permute.xlu1 %v3681_v29 }
  0x68   :  { %1269 = vperm.xlu1 %3499, %v627_v30   ;;  %710 = vperm.xlu0 %3502, %v633_v31  }
  0x6c   :  { %1273 = vperm.xlu1 %3499, %v3872_v42   ;;  %725 = vperm.xlu0 %3502, %v3992_v34   ;;  %v4038_v42 = vld [vmem:[%s5688_s4 + $0x68] sm:$0xff] }
  0x70   :  { %3500 = vset.pattern.permute.xlu1 %v3679_v45  ;;  %740 = vperm.xlu0 %3502, %v3998_v35  }
  0x71   :  { %832 = vperm.xlu1 %3500, %v633_v31  }
  0x74   :  { %3512 = vset.pattern.permute.xlu0 %v3679_v45 }
  0x75   :  { %3501 = vset.pattern.permute.xlu1 %v3680_v27  ;;  %808 = vperm.xlu0 %3512, %v627_v30  }
  0x76   :  { %1181 = vperm.xlu1 %3501, %v3879_v44  }
  0x79   :  { %816 = vperm.xlu0 %3512, %v3879_v44  }
  0x7a   :  { %3503 = vset.pattern.permute.xlu1 %v3678_v43 }
  0x7b   :  { %715 = vperm.xlu1 %3503, %v634_v32  }
  0x7d   :  { %828 = vperm.xlu0 %3512, %v632_v28  }
  0x7f   :  { %720 = vperm.xlu1 %3503, %v635_v33  }
  0x81   :  { %840 = vperm.xlu0 %3512, %v635_v33  }
  0x83   :  { %3504 = vset.pattern.permute.xlu1 %v3681_v29 }
  0x84   :  { %1281 = vperm.xlu1 %3504, %v630_v25  }
  0x85   :  { %852 = vperm.xlu0 %3512, %v4016_v37  }
  0x88   :  { %3505 = vset.pattern.permute.xlu1 %v3679_v45 }
  0x89   :  { %836 = vperm.xlu1 %3505, %v634_v32   ;;  %864 = vperm.xlu0 %3512, %v641_v38  }
  0x8d   :  { %3506 = vset.pattern.permute.xlu1 %v3680_v27  ;;  %3519 = vset.pattern.permute.xlu0 %v3681_v29 }
  0x8e   :  { %1189 = vperm.xlu1 %3506, %v631_v26   ;;  %1277 = vperm.xlu0 %3519, %v3879_v44   ;;  %v4043_v44 = vshrl.u32 %v314_v39, 7 }
  0x90   :  { %vm790_vm1 = vcmp.lt.s32.totalorder %v4043_v44, 7  ;;  %vm661_vm2 = vcmp.lt.s32.totalorder %v4043_v44, 1 }
  0x92   :  { %1193 = vperm.xlu1 %3506, %v632_v28   ;;  %1289 = vperm.xlu0 %3519, %v632_v28  }
  0x96   :  { %3507 = vset.pattern.permute.xlu1 %v3678_v43  ;;  %1301 = vperm.xlu0 %3519, %v635_v33  }
  0x97   :  { %730 = vperm.xlu1 %3507, %v4009_v36  }
  0x9a   :  { %1309 = vperm.xlu0 %3519, %v4009_v36  }
  0x9b   :  { %3508 = vset.pattern.permute.xlu1 %v3681_v29 }
  0x9c   :  { %1285 = vperm.xlu1 %3508, %v631_v26  }
  0x9e   :  { %3521 = vset.pattern.permute.xlu0 %v3680_v27 }
  0x9f   :  { %1197 = vperm.xlu0 %3521, %v633_v31  }
  0xa0   :  { %3509 = vset.pattern.permute.xlu1 %v3679_v45 }
  0xa1   :  { %844 = vperm.xlu1 %3509, %v3992_v34  }
  0xa3   :  { %1209 = vperm.xlu0 %3521, %v3992_v34  }
  0xa5   :  { %848 = vperm.xlu1 %3509, %v4009_v36  }
  0xa7   :  { %1225 = vperm.xlu0 %3521, %v4038_v42  }
  0xa9   :  { %3510 = vset.pattern.permute.xlu1 %v3680_v27 }
  0xaa   :  { %1201 = vperm.xlu1 %3510, %v634_v32  }
  0xab   :  { %1229 = vperm.xlu0 %3521, %v641_v38  }
  0xae   :  { %3511 = vset.pattern.permute.xlu1 %v3678_v43 }
  0xaf   :  { %735 = vperm.xlu1 %3511, %v4016_v37   ;;  %3526 = vset.pattern.permute.xlu0 %v3681_v29 }
  0xb0   :  { %1325 = vperm.xlu0 %3526, %v641_v38  }
  0xb3   :  { %3513 = vset.pattern.permute.xlu1 %v3681_v29 }
  0xb4   :  { %1293 = vperm.xlu1 %3513, %v633_v31  }
  0xb8   :  { %1297 = vperm.xlu1 %3513, %v634_v32  }
  0xbc   :  { %3514 = vset.pattern.permute.xlu1 %v3679_v45 }
  0xbd   :  { %856 = vperm.xlu1 %3514, %v3998_v35  }
  0xc1   :  { %3515 = vset.pattern.permute.xlu1 %v3680_v27 }
  0xc2   :  { %1205 = vperm.xlu1 %3515, %v635_v33  }
  0xc6   :  { %3516 = vset.pattern.permute.xlu1 %v3678_v43 }
  0xc7   :  { %745 = vperm.xlu1 %3516, %v4038_v42  }
  0xcb   :  { %750 = vperm.xlu1 %3516, %v641_v38  }
  0xcf   :  { %3517 = vset.pattern.permute.xlu1 %v3681_v29 }
  0xd0   :  { %1305 = vperm.xlu1 %3517, %v3992_v34  }
  0xd4   :  { %3518 = vset.pattern.permute.xlu1 %v3679_v45 }
  0xd5   :  { %860 = vperm.xlu1 %3518, %v4038_v42  }
  0xd9   :  { %3520 = vset.pattern.permute.xlu1 %v3680_v27 }
  0xda   :  { %1213 = vperm.xlu1 %3520, %v4009_v36  }
  0xde   :  { %1217 = vperm.xlu1 %3520, %v4016_v37  }
  0xe2   :  { %3522 = vset.pattern.permute.xlu1 %v3681_v29 }
  0xe3   :  { %1313 = vperm.xlu1 %3522, %v4016_v37  }
  0xe7   :  { %3523 = vset.pattern.permute.xlu1 %v3680_v27 }
  0xe8   :  { %1221 = vperm.xlu1 %3523, %v3998_v35  }
  0xec   :  { %3524 = vset.pattern.permute.xlu1 %v3681_v29 }
  0xed   :  { %1317 = vperm.xlu1 %3524, %v3998_v35  }
  0xf1   :  { %1321 = vperm.xlu1 %3524, %v4038_v42  }
  0xf5   :  { %3525 = vset.pattern.permute.xlu1 %v3680_v27 }
  0xf6   :  { %1233 = vperm.xlu1 %3525, %v3950_v24  }
  0xfa   :  { %3527 = vset.pattern.permute.xlu1 %v3681_v29 }
  0xfb   :  { %1329 = vperm.xlu1 %3527, %v3950_v24  }
 0x11c   :  { %v2899_v47 = vpop.f32.mrb[0].mxu0 }
 0x11d   :  { %v3883_v48 = vadd.f32 %v2899_v47, %v2631_v46  ;;  %v163_v49 = vpop.f32.mrb[1].mxu0 }
 0x11e   :  { %v3885_v50 = vadd.f32 %v2631_v46, %v163_v49 }
 0x120   :  { %v2902_v51 = vpop.f32.mrb[2].mxu0  ;;  %v3281_v52 = vpack.c.bf16 %v3883_v48, %v3885_v50 }
 0x121   :  { %v3889_v53 = vadd.f32 %v2902_v51, %v2631_v46  ;;  %v173_v54 = vpop.f32.mrb[3].mxu0 }
 0x122   :  { %v3891_v55 = vadd.f32 %v2631_v46, %v173_v54  ;;  %3282 = vmatpush3.bf16.msra.mxu1 %v3281_v52 }
 0x123   :  { %3283 = vmatprep.subr.bf16.mxu1 %v5696_v40 }
 0x124   :  { %v3284_v56 = vpack.c.bf16 %v3889_v53, %v3891_v55  ;;  %v2905_v57 = vpop.f32.mrb[4].mxu0 }
 0x125   :  { %v3896_v58 = vadd.f32 %v2905_v57, %v2631_v46  ;;  %v183_v59 = vpop.f32.mrb[5].mxu0 }
 0x126   :  { %v3898_v60 = vadd.f32 %v2631_v46, %v183_v59  ;;  %3285 = vmatpush3.bf16.msra.mxu1 %v3284_v56 }
 0x127   :  { %3286 = vmatprep.subr.bf16.mxu1 %v5696_v40 }
 0x128   :  { %v3287_v61 = vpack.c.bf16 %v3896_v58, %v3898_v60  ;;  %v2908_v62 = vpop.f32.mrb[6].mxu0 }
 0x129   :  { %v3903_v63 = vadd.f32 %v2908_v62, %v2631_v46  ;;  %v193_v0 = vpop.f32.mrb[7].mxu0 }
 0x12a   :  { %v3905_v1 = vadd.f32 %v2631_v46, %v193_v0  ;;  %3288 = vmatpush3.bf16.msra.mxu1 %v3287_v61 }
 0x12b   :  { %3289 = vmatprep.subr.bf16.mxu1 %v5696_v40 }
 0x12c   :  { %v3290_v2 = vpack.c.bf16 %v3903_v63, %v3905_v1  ;;  %v2911_v3 = vpop.f32.mrb[8].mxu0 }
 0x12d   :  { %v3910_v4 = vadd.f32 %v2911_v3, %v2631_v46  ;;  %v203_v5 = vpop.f32.mrb[9].mxu0 }
 0x12e   :  { %v3912_v6 = vadd.f32 %v2631_v46, %v203_v5  ;;  %3291 = vmatpush3.bf16.msra.mxu1 %v3290_v2 }
 0x12f   :  { %3292 = vmatprep.subr.bf16.mxu1 %v5696_v40 }
 0x130   :  { %v3293_v7 = vpack.c.bf16 %v3910_v4, %v3912_v6  ;;  %v2914_v8 = vpop.f32.mrb[10].mxu0 }
 0x131   :  { %v3917_v9 = vadd.f32 %v2914_v8, %v2631_v46  ;;  %v213_v10 = vpop.f32.mrb[11].mxu0 }
 0x132   :  { %v3919_v11 = vadd.f32 %v2631_v46, %v213_v10  ;;  %3294 = vmatpush3.bf16.msra.mxu1 %v3293_v7 }
 0x133   :  { %3295 = vmatprep.subr.bf16.mxu1 %v5696_v40 }
 0x134   :  { %v3296_v12 = vpack.c.bf16 %v3917_v9, %v3919_v11  ;;  %v2917_v13 = vpop.f32.mrb[12].mxu0 }
 0x135   :  { %v3924_v14 = vadd.f32 %v2917_v13, %v2631_v46  ;;  %v223_v15 = vpop.f32.mrb[13].mxu0 }
 0x136   :  { %v3926_v16 = vadd.f32 %v2631_v46, %v223_v15  ;;  %3297 = vmatpush3.bf16.msra.mxu1 %v3296_v12 }
 0x137   :  { %3298 = vmatprep.subr.bf16.mxu1 %v5696_v40 }
 0x138   :  { %v3299_v17 = vpack.c.bf16 %v3924_v14, %v3926_v16  ;;  %v2920_v18 = vpop.f32.mrb[14].mxu0 }
 0x139   :  { %v3931_v19 = vadd.f32 %v2920_v18, %v2631_v46  ;;  %v233_v20 = vpop.f32.mrb[15].mxu0 }
 0x13a   :  { %v3933_v21 = vadd.f32 %v2631_v46, %v233_v20  ;;  %3300 = vmatpush3.bf16.msra.mxu1 %v3299_v17  ;;  %v4047_v46 = vsub.s32 0, %v4043_v44 }
 0x13b   :  { %3301 = vmatprep.subr.bf16.mxu1 %v5696_v40 }
 0x13c   :  { %v3302_v22 = vpack.c.bf16 %v3931_v19, %v3933_v21  ;;  %5736 = vst [vmem:[#allocation11_spill] sm:$0xff] %v4047_v46 }
 0x13e   :  { %3303 = vmatpush3.bf16.msra.mxu1 %v3302_v22 }
 0x13f   :  { %3328 = vmatprep.subr.bf16.mxu1 %v5696_v40 }
 0x141   :  { %2954 = vmatmul.mubr.f32.vlgmr.msra.gmra.mrb[0].mxu1 %v3941_v23 }
 0x142   :  { %3023 = vmatprep.mubr.msk.f32.mxu1 %vm3676_vm0, %v5694_v41 }
 0x214   :  { %v310_v47 = vpop.f32.mrb[0].mxu1 }
 0x215   :  { %v317_v49 = vrot.slane %v310_v47, %v4047_v46  ;;  %v2955_v51 = vpop.f32.mrb[1].mxu1 }
 0x217   :  { %v4054_v52 = vsub.f32 %v3885_v50, %v317_v49  ;;  %v4057_v54 = vsub.f32 %v3883_v48, %v317_v49  ;;  %v4060_v56 = vsub.f32 %v3891_v55, %v317_v49  ;;  %v4063_v57 = vsub.f32 %v3889_v53, %v317_v49 }
 0x218   :  { %v4070_v61 = vsub.f32 %v3898_v60, %v317_v49  ;;  %v4077_v53 = vsub.f32 %v3896_v58, %v317_v49  ;;  %v4081_v62 = vsub.f32 %v3905_v1, %v317_v49  ;;  %v4084_v0 = vsub.f32 %v3903_v63, %v317_v49 }
 0x219   :  { %v334_v43 = vmul.f32 %v4054_v52, %v4054_v52  ;;  %v335_v59 = vmul.f32 %v4057_v54, %v4057_v54  ;;  %v336_v48 = vmul.f32 %v4060_v56, %v4060_v56  ;;  %v337_v55 = vmul.f32 %v4063_v57, %v4063_v57 }
 0x21a   :  { %v338_v2 = vmul.f32 %v4070_v61, %v4070_v61  ;;  %v339_v3 = vmul.f32 %v4077_v53, %v4077_v53  ;;  %v340_v58 = vmul.f32 %v4081_v62, %v4081_v62  ;;  %v341_v63 = vmul.f32 %v4084_v0, %v4084_v0 }
 0x21b   :  { %v3305_v50 = vpack.c.bf16 %v335_v59, %v334_v43  ;;  %v3308_v60 = vpack.c.bf16 %v337_v55, %v336_v48  ;;  %v4098_v5 = vsub.f32 %v3912_v6, %v317_v49  ;;  %v4101_v7 = vsub.f32 %v3910_v4, %v317_v49 }
 0x21c   :  { %v3311_v1 = vpack.c.bf16 %v339_v3, %v338_v2  ;;  %v3314_v8 = vpack.c.bf16 %v341_v63, %v340_v58  ;;  %v4111_v6 = vsub.f32 %v3919_v11, %v317_v49  ;;  %v4114_v4 = vsub.f32 %v3917_v9, %v317_v49  ;;  %v4201_v2 = vld [vmem:[#allocation2 + $0x1] ss:$0 sm:$0xff] }
 0x21d   :  { %3306 = vmatpush3.bf16.msra.mxu0 %v3305_v50  ;;  %v342_v10 = vmul.f32 %v4098_v5, %v4098_v5  ;;  %v343_v12 = vmul.f32 %v4101_v7, %v4101_v7  ;;  %v4119_v45 = vsub.f32 %v3926_v16, %v317_v49  ;;  %v4127_v9 = vsub.f32 %v3924_v14, %v317_v49 }
 0x21e   :  { %3307 = vmatprep.subr.bf16.mxu0 %v5696_v40  ;;  %v344_v15 = vmul.f32 %v4111_v6, %v4111_v6  ;;  %v345_v11 = vmul.f32 %v4114_v4, %v4114_v4  ;;  %v4131_v17 = vsub.f32 %v3933_v21, %v317_v49  ;;  %v333_v22 = vsub.f32 %v3931_v19, %v317_v49  ;;  %v4158_v19 = vpop.permute.xlu1 %685  ;;  %v4188_v49 = vpop.permute.xlu0 %1173 }
 0x21f   :  { %v3317_v13 = vpack.c.bf16 %v343_v12, %v342_v10  ;;  %v346_v18 = vmul.f32 %v4119_v45, %v4119_v45  ;;  %v347_v20 = vmul.f32 %v4127_v9, %v4127_v9  ;;  %5741 = vst [vmem:[#allocation16_spill] sm:$0xff] %v4188_v49 }
 0x220   :  { %v3320_v16 = vpack.c.bf16 %v345_v11, %v344_v15  ;;  %v348_v21 = vmul.f32 %v4131_v17, %v4131_v17  ;;  %v349_v25 = vmul.f32 %v333_v22, %v333_v22 }
 0x221   :  { %3309 = vmatpush3.bf16.msra.mxu0 %v3308_v60  ;;  %v3323_v14 = vpack.c.bf16 %v347_v20, %v346_v18 }
 0x222   :  { %3310 = vmatprep.subr.bf16.mxu0 %v5696_v40  ;;  %v3326_v26 = vpack.c.bf16 %v349_v25, %v348_v21  ;;  %v4192_v59 = vpop.permute.xlu0 %1185 }
 0x225   :  { %3312 = vmatpush3.bf16.msra.mxu0 %v3311_v1 }
 0x226   :  { %3313 = vmatprep.subr.bf16.mxu0 %v5696_v40  ;;  %v4196_v55 = vpop.permute.xlu0 %680 }
 0x229   :  { %3315 = vmatpush3.bf16.msra.mxu0 %v3314_v8  ;;  %v4210_v8 = vld [vmem:[#allocation2 + $0x2] ss:$0 sm:$0xff] }
 0x22a   :  { %3316 = vmatprep.subr.bf16.mxu0 %v5696_v40 }
 0x22d   :  { %3318 = vmatpush3.bf16.msra.mxu0 %v3317_v13 }
 0x22e   :  { %3319 = vmatprep.subr.bf16.mxu0 %v5696_v40 }
 0x231   :  { %3321 = vmatpush3.bf16.msra.mxu0 %v3320_v16  ;;  %v4224_v16 = vpop.permute.xlu0 %755 }
 0x232   :  { %3322 = vmatprep.subr.bf16.mxu0 %v5696_v40 }
 0x235   :  { %3324 = vmatpush3.bf16.msra.mxu0 %v3323_v14 }
 0x236   :  { %3325 = vmatprep.subr.bf16.mxu0 %v5696_v40 }
 0x239   :  { %3327 = vmatpush3.bf16.msra.mxu0 %v3326_v26 }
 0x23a   :  { %3352 = vmatprep.subr.bf16.mxu0 %v5696_v40 }
 0x23c   :  { %2989 = vmatmul.mubr.f32.vlgmr.msra.gmra.mrb[16].mxu0 %v3941_v23  ;;  %v4160_v23 = vpop.permute.xlu1 %690 }
 0x23d   :  { %3058 = vmatprep.mubr.msk.f32.mxu0 %vm3676_vm0, %v5694_v41 }
 0x240   :  { %v4162_v28 = vpop.permute.xlu1 %868 }
 0x241   :  { %5737 = vst [vmem:[#allocation12_spill] sm:$0xff] %v4162_v28 }
 0x244   :  { %v4164_v30 = vpop.permute.xlu1 %812 }
 0x248   :  { %v4166_v31 = vpop.permute.xlu1 %695 }
 0x24c   :  { %v4168_v32 = vpop.permute.xlu1 %820 }
 0x250   :  { %v4170_v33 = vpop.permute.xlu1 %824 }
 0x254   :  { %v4172_v27 = vpop.permute.xlu1 %1177 }
 0x258   :  { %v4174_v34 = vpop.permute.xlu1 %705 }
 0x25c   :  { %v4176_v29 = vpop.permute.xlu1 %1269 }
 0x25d   :  { %5738 = vst [vmem:[#allocation13_spill] sm:$0xff] %v4176_v29 }
 0x260   :  { %v4178_v24 = vpop.permute.xlu1 %1273 }
 0x264   :  { %v4180_v35 = vpop.permute.xlu1 %832 }
 0x265   :  { %5739 = vst [vmem:[#allocation14_spill] sm:$0xff] %v4180_v35  ;;  %v4409_v35 = vld [vmem:[%s5687_s3 + $0x5] ss:$0 sm:$0xff] }
 0x268   :  { %v4182_v36 = vpop.permute.xlu1 %1181 }
 0x269   :  { %5740 = vst [vmem:[#allocation15_spill] sm:$0xff] %v4182_v36 }
 0x26c   :  { %v4184_v37 = vpop.permute.xlu1 %715 }
 0x270   :  { %v4186_v47 = vpop.permute.xlu1 %720 }
 0x274   :  { %v4190_v43 = vpop.permute.xlu1 %1281 }
 0x275   :  { %5742 = vst [vmem:[#allocation17_spill] sm:$0xff] %v4190_v43 }
 0x278   :  { %v4194_v48 = vpop.permute.xlu1 %836 }
 0x30f   :  { %v416_v38 = vpop.f32.mrb[16].mxu0 }
 0x310   :  { %v420_v39 = vmax.f32 %v416_v38, 0.0  ;;  %v2990_v42 = vpop.f32.mrb[17].mxu0 }
 0x312   :  { %v421_v51 = vadd.f32 1e-05, %v420_v39 }
 0x314   :  { %3528 = vrsqrt.f32 %v421_v51 }
 0x31e   :  { %v3529_v50 = vpop.eup %3528 }
 0x31f   :  { %v4199_v60 = vrot.slane %v3529_v50, %v4047_v46 }
 0x321   :  { %v427_v3 = vmul.f32 %v4199_v60, %v4054_v52  ;;  %v428_v58 = vmul.f32 %v4199_v60, %v4057_v54  ;;  %v442_v63 = vmul.f32 %v4199_v60, %v333_v22  ;;  %v439_v1 = vmul.f32 %v4199_v60, %v4119_v45  ;;  %v4222_v45 = vpop.permute.xlu1 %1189 }
 0x322   :  { %v440_v10 = vmul.f32 %v4199_v60, %v4127_v9  ;;  %v429_v12 = vmul.f32 %v4199_v60, %v4060_v56  ;;  %v430_v13 = vmul.f32 %v4199_v60, %v4063_v57  ;;  %5743 = vst [vmem:[#allocation18_spill] sm:$0xff] %v4222_v45  ;;  %v433_v21 = vmul.f32 %v4199_v60, %v4081_v62 }
 0x323   :  { %v447_v52 = vmul.f32 %v4201_v2, %v427_v3  ;;  %v448_v54 = vmul.f32 %v4201_v2, %v428_v58  ;;  %v462_v15 = vmul.f32 %v4201_v2, %v442_v63  ;;  %v459_v11 = vmul.f32 %v4201_v2, %v439_v1  ;;  %v4263_v63 = vpop.permute.xlu0 %700 }
 0x324   :  { %v460_v9 = vmul.f32 %v4201_v2, %v440_v10  ;;  %v449_v18 = vmul.f32 %v4201_v2, %v429_v12  ;;  %v450_v56 = vmul.f32 %v4201_v2, %v430_v13  ;;  %v434_v26 = vmul.f32 %v4199_v60, %v4084_v0  ;;  %5745 = vst [vmem:[#allocation20_spill] sm:$0xff] %v4263_v63 }
 0x325   :  { %v4230_v57 = vadd.f32 %v4210_v8, %v447_v52  ;;  %v4233_v20 = vadd.f32 %v4210_v8, %v448_v54  ;;  %v4236_v22 = vadd.f32 %v4210_v8, %v462_v15  ;;  %v4239_v14 = vadd.f32 %v4210_v8, %v459_v11  ;;  %v4261_v0 = vpop.permute.xlu1 %1193 }
 0x326   :  { %v4244_v25 = vadd.f32 %v4210_v8, %v460_v9  ;;  %v4251_v42 = vadd.f32 %v4210_v8, %v449_v18  ;;  %v4254_v51 = vadd.f32 %v4210_v8, %v450_v56  ;;  %v435_v58 = vmul.f32 %v4199_v60, %v4098_v5  ;;  %5744 = vst [vmem:[#allocation19_spill] sm:$0xff] %v4261_v0 }
 0x327   :  { %v499_v38 = vmul.f32 0.7978846, %v4230_v57  ;;  %v515_v39 = vmul.f32 0.044715, %v4230_v57  ;;  %v500_v50 = vmul.f32 0.7978846, %v4233_v20  ;;  %v453_v13 = vmul.f32 %v4201_v2, %v433_v21  ;;  %v4283_v45 = vpop.permute.xlu0 %710 }
 0x328   :  { %v516_v62 = vmul.f32 0.044715, %v4233_v20  ;;  %v530_v3 = vmul.f32 0.044715, %v4236_v22  ;;  %v514_v1 = vmul.f32 0.7978846, %v4236_v22  ;;  %v454_v0 = vmul.f32 %v4201_v2, %v434_v26 }
 0x329   :  { %v531_v10 = vmul.f32 %v515_v39, %v4230_v57  ;;  %v527_v12 = vmul.f32 0.044715, %v4239_v14  ;;  %v511_v15 = vmul.f32 0.7978846, %v4239_v14  ;;  %v528_v5 = vmul.f32 0.044715, %v4244_v25 }
 0x32a   :  { %v532_v52 = vmul.f32 %v516_v62, %v4233_v20  ;;  %v546_v54 = vmul.f32 %v530_v3, %v4236_v22  ;;  %v512_v9 = vmul.f32 0.7978846, %v4244_v25  ;;  %v501_v56 = vmul.f32 0.7978846, %v4251_v42  ;;  %5747 = vst [vmem:[#allocation22_spill] sm:$0xff] %v4283_v45 }
 0x32b   :  { %v547_v11 = vadd.f32 1.0, %v531_v10  ;;  %v543_v18 = vmul.f32 %v527_v12, %v4239_v14  ;;  %v544_v40 = vmul.f32 %v528_v5, %v4244_v25  ;;  %v502_v21 = vmul.f32 0.7978846, %v4254_v51  ;;  %v4281_v12 = vpop.permute.xlu1 %730 }
 0x32c   :  { %v548_v39 = vadd.f32 1.0, %v532_v52  ;;  %v562_v41 = vadd.f32 1.0, %v546_v54  ;;  %v517_v3 = vmul.f32 0.044715, %v4251_v42  ;;  %v518_v29 = vmul.f32 0.044715, %v4254_v51 }
 0x32d   :  { %v563_v62 = vmul.f32 %v547_v11, %v499_v38  ;;  %v559_v46 = vadd.f32 1.0, %v543_v18  ;;  %v560_v28 = vadd.f32 1.0, %v544_v40  ;;  %5746 = vst [vmem:[#allocation21_spill] sm:$0xff] %v4281_v12  ;;  %v455_v11 = vmul.f32 %v4201_v2, %v435_v58  ;;  %v4301_v58 = vpop.permute.xlu0 %725 }
 0x32e   :  { %v564_v49 = vmul.f32 %v548_v39, %v500_v50  ;;  %v578_v10 = vmul.f32 %v562_v41, %v514_v1  ;;  %v533_v54 = vmul.f32 %v517_v3, %v4251_v42  ;;  %v534_v38 = vmul.f32 %v518_v29, %v4254_v51  ;;  %5749 = vst [vmem:[#allocation24_spill] sm:$0xff] %v4301_v58 }
 0x32f   :  { %3530 = vtanh.f32 %v563_v62  ;;  %v575_v52 = vmul.f32 %v559_v46, %v511_v15  ;;  %v576_v5 = vmul.f32 %v560_v28, %v512_v9  ;;  %v4289_v50 = vadd.f32 %v4210_v8, %v453_v13 }
 0x330   :  { %3532 = vtanh.f32 %v564_v49  ;;  %v549_v40 = vadd.f32 1.0, %v533_v54  ;;  %v550_v41 = vadd.f32 1.0, %v534_v38  ;;  %v4292_v26 = vadd.f32 %v4210_v8, %v454_v0  ;;  %v4299_v49 = vpop.permute.xlu1 %1285 }
 0x331   :  { %3534 = vtanh.f32 %v578_v10  ;;  %v4295_v46 = vadd.f32 %v4210_v8, %v455_v11  ;;  %v431_v28 = vmul.f32 %v4199_v60, %v4070_v61  ;;  %5748 = vst [vmem:[#allocation23_spill] sm:$0xff] %v4299_v49  ;;  %v521_v13 = vmul.f32 0.044715, %v4289_v50 }
 0x332   :  { %3536 = vtanh.f32 %v575_v52  ;;  %v565_v1 = vmul.f32 %v549_v40, %v501_v56  ;;  %v566_v29 = vmul.f32 %v550_v41, %v502_v21  ;;  %v522_v0 = vmul.f32 0.044715, %v4292_v26 }
 0x333   :  { %3538 = vtanh.f32 %v576_v5  ;;  %v523_v15 = vmul.f32 0.044715, %v4295_v46  ;;  %v483_v9 = vmul.f32 0.5, %v4230_v57  ;;  %v484_v18 = vmul.f32 0.5, %v4233_v20 }
 0x334   :  { %3540 = vtanh.f32 %v565_v1  ;;  %v432_v61 = vmul.f32 %v4199_v60, %v4077_v53  ;;  %v498_v56 = vmul.f32 0.5, %v4236_v22  ;;  %v537_v39 = vmul.f32 %v521_v13, %v4289_v50 }
 0x335   :  { %3542 = vtanh.f32 %v566_v29  ;;  %v538_v21 = vmul.f32 %v522_v0, %v4292_v26  ;;  %v539_v62 = vmul.f32 %v523_v15, %v4295_v46  ;;  %v495_v3 = vmul.f32 0.5, %v4239_v14 }
 0x336   :  { %v496_v57 = vmul.f32 0.5, %v4244_v25  ;;  %v485_v20 = vmul.f32 0.5, %v4251_v42  ;;  %v451_v10 = vmul.f32 %v4201_v2, %v431_v28  ;;  %v505_v53 = vmul.f32 0.7978846, %v4289_v50  ;;  %v4324_v25 = vpop.permute.xlu1 %844  ;;  %v4326_v42 = vpop.permute.xlu0 %740 }
 0x337   :  { %v553_v54 = vadd.f32 1.0, %v537_v39  ;;  %v554_v38 = vadd.f32 1.0, %v538_v21  ;;  %v452_v22 = vmul.f32 %v4201_v2, %v432_v61  ;;  %v486_v40 = vmul.f32 0.5, %v4254_v51  ;;  %5750 = vst [vmem:[#allocation25_spill] sm:$0xff] %v4324_v25  ;;  %5751 = vst [vmem:[#allocation26_spill] sm:$0xff] %v4326_v42 }
 0x338   :  { %v506_v41 = vmul.f32 0.7978846, %v4292_v26  ;;  %v555_v14 = vadd.f32 1.0, %v539_v62  ;;  %v507_v28 = vmul.f32 0.7978846, %v4295_v46  ;;  %v4331_v0 = vmul.f32 %v4199_v60, %v4114_v4 }
 0x339   :  { %v3531_v52 = vpop.eup %3530  ;;  %v569_v13 = vmul.f32 %v553_v54, %v505_v53  ;;  %v4336_v51 = vadd.f32 %v4210_v8, %v451_v10  ;;  %v4340_v21 = vmul.f32 %v4199_v60, %v4101_v7 }
 0x33a   :  { %v3533_v5 = vpop.eup %3532  ;;  %v595_v11 = vadd.f32 1.0, %v3531_v52  ;;  %v4345_v52 = vld [vmem:[%s5687_s3 + $0x1] ss:$0 sm:$0xff]  ;;  %v4349_v54 = vmul.f32 %v554_v38, %v506_v41 }
 0x33b   :  { %v3535_v1 = vpop.eup %3534  ;;  %v596_v29 = vadd.f32 1.0, %v3533_v5  ;;  %3544 = vtanh.f32 %v569_v13 }
 0x33c   :  { %v3537_v15 = vpop.eup %3536  ;;  %v610_v61 = vadd.f32 1.0, %v3535_v1  ;;  %v4333_v39 = vmul.f32 %v595_v11, %v483_v9  ;;  %v4352_v9 = vadd.f32 %v4210_v8, %v452_v22  ;;  %v4358_v11 = vmul.f32 %v555_v14, %v507_v28  ;;  %v4366_v22 = vld [vmem:[%s5687_s3 + $0x4] ss:$0 sm:$0xff]  ;;  %v4372_v28 = vpop.permute.xlu1 %848 }
 0x33d   :  { %v3539_v62 = vpop.eup %3538  ;;  %v4347_v53 = vmul.f32 %v596_v29, %v484_v18  ;;  %v607_v4 = vadd.f32 1.0, %v3537_v15  ;;  %5755 = vst [vmem:[#allocation30_spill] sm:$0xff] %v4372_v28  ;;  %v809_v15 = vpop.permute.xlu0 %808  ;;  %3546 = vtanh.f32 %v4349_v54  ;;  %v456_v54 = vmul.f32 %v4201_v2, %v4340_v21 }
 0x33e   :  { %5752 = vst [vmem:[#allocation27_spill] sm:$0xff] %v4333_v39  ;;  %v4354_v10 = vmul.f32 %v610_v61, %v498_v56  ;;  %v643_v5 = vrot.slane %v4333_v39, 7  ;;  %v5700_v7 = vrot.slane %v4333_v39, 1  ;;  %v3541_v1 = vpop.eup %3540  ;;  %v608_v49 = vadd.f32 1.0, %v3539_v62  ;;  %v4404_v61 = vld [vmem:[%s5687_s3 + $0x2] ss:$0 sm:$0xff] }
 0x33f   :  { %5753 = vst [vmem:[#allocation28_spill] sm:$0xff] %v4347_v53  ;;  %v775_v42 = vrot.slane %v4347_v53, 1  ;;  %v4361_v18 = vmul.f32 %v607_v4, %v495_v3  ;;  %v3543_v38 = vpop.eup %3542  ;;  %v913_v41 = vmul.f32 %v4345_v52, %v4333_v39  ;;  %v597_v14 = vadd.f32 1.0, %v3541_v1  ;;  %v4384_v4 = vld [vmem:[%s5687_s3] ss:$0 sm:$0xff] }
 0x340   :  { %5754 = vst [vmem:[#allocation29_spill] sm:$0xff] %v4354_v10  ;;  %v5701_v56 = vrot.slane %v4354_v10, 7  ;;  %v644_v29 = vrot.slane %v4347_v53, 7  ;;  %v4378_v13 = vmul.f32 %v608_v49, %v496_v57  ;;  %v598_v62 = vadd.f32 1.0, %v3543_v38  ;;  %v4389_v1 = vld [vmem:[%s5687_s3 + $0x3] ss:$0 sm:$0xff] }
 0x341   :  { %v805_v3 = vsel %vm790_vm1, %v5700_v7, %v775_v42  ;;  %v4397_v57 = vmul.f32 %v597_v14, %v485_v20  ;;  %v1008_v20 = vmul.f32 %v4366_v22, %v4333_v39  ;;  %v1009_v25 = vmul.f32 %v4366_v22, %v4347_v53  ;;  %v817_v58 = vpop.permute.xlu0 %816 }
 0x342   :  { %5756 = vst [vmem:[#allocation31_spill] sm:$0xff] %v4378_v13  ;;  %v677_v7 = vsel %vm661_vm2, %v5701_v56, %v643_v5  ;;  %v4395_v49 = vmul.f32 %v809_v15, %v805_v3  ;;  %v676_v38 = vsel %vm661_vm2, %v643_v5, %v644_v29  ;;  %v5703_v14 = vrot.slane %v4378_v13, 1 }
 0x343   :  { %v4412_v45 = vmul.f32 %v4196_v55, %v677_v7  ;;  %v4417_v15 = vmul.f32 %v598_v62, %v486_v40  ;;  %v4421_v3 = vmul.f32 %v4158_v19, %v676_v38  ;;  %v776_v56 = vrot.slane %v4397_v57, 1 }
 0x344   :  { %5757 = vst [vmem:[#allocation32_spill] sm:$0xff] %v4395_v49  ;;  %v5760_v40 = vrot.slane %v4361_v18, 1  ;;  %v950_v38 = vmul.f32 %v4404_v61, %v4395_v49  ;;  %v1045_v5 = vmul.f32 %v4409_v35, %v4395_v49  ;;  %v5761_v43 = vrot.slane %v4397_v57, 7 }
 0x345   :  { %5758 = vst [vmem:[#allocation33_spill] sm:$0xff] %v4412_v45  ;;  %5759 = vst [vmem:[#allocation34_spill] sm:$0xff] %v4421_v3  ;;  %v892_v55 = vmul.f32 %v4384_v4, %v4412_v45  ;;  %v987_v7 = vmul.f32 %v4389_v1, %v4412_v45  ;;  %v4446_v45 = vld [vmem:[%s5687_s3 + $0x6] ss:$0 sm:$0xff]  ;;  %v5763_v36 = vrot.slane %v4417_v15, 1  ;;  %3548 = vtanh.f32 %v4358_v11 }
 0x346   :  { %v4436_v62 = vsel %vm790_vm1, %v5760_v40, %v5703_v14  ;;  %v675_v28 = vsel %vm661_vm2, %v644_v29, %v5761_v43  ;;  %v804_v40 = vsel %vm790_vm1, %v775_v42, %v776_v56  ;;  %v4454_v14 = vpop.permute.xlu1 %1201  ;;  %v4466_v43 = vld [vmem:[%s5687_s3 + $0x7] ss:$0 sm:$0xff]  ;;  %v5705_v21 = vrot.slane %v4378_v13, 7 }
 0x347   :  { %5762 = vst [vmem:[#allocation35_spill] sm:$0xff] %v4454_v14  ;;  %v929_v19 = vadd.f32 %v913_v41, %v892_v55  ;;  %v1024_v12 = vadd.f32 %v1008_v20, %v987_v7  ;;  %v4457_v49 = vmul.f32 %v4160_v23, %v675_v28  ;;  %v803_v63 = vsel %vm790_vm1, %v776_v56, %v5763_v36  ;;  %v3545_v28 = vpop.eup %3544  ;;  %v4482_v36 = vld [vmem:[%s5687_s3 + $0x8] ss:$0 sm:$0xff] }
 0x348   :  { %v4469_v42 = vmul.f32 %v4164_v30, %v804_v40  ;;  %v4471_v29 = vmul.f32 %v817_v58, %v803_v63  ;;  %v915_v41 = vmul.f32 %v4345_v52, %v4397_v57  ;;  %v988_v23 = vmul.f32 %v4389_v1, %v4421_v3 }
 0x349   :  { %v966_v20 = vadd.f32 %v950_v38, %v929_v19  ;;  %v4477_v55 = vadd.f32 %v1045_v5, %v1024_v12  ;;  %v894_v30 = vmul.f32 %v4384_v4, %v4457_v49  ;;  %v1084_v63 = vmul.f32 %v4446_v45, %v4457_v49 }
 0x34a   :  { %5764 = vst [vmem:[#allocation36_spill] sm:$0xff] %v4469_v42  ;;  %v1025_v58 = vadd.f32 %v1009_v25, %v988_v23  ;;  %v1046_v56 = vmul.f32 %v4409_v35, %v4469_v42  ;;  %v519_v7 = vmul.f32 0.044715, %v4336_v51  ;;  %v458_v12 = vmul.f32 %v4201_v2, %v4331_v0 }
 0x34b   :  { %5765 = vst [vmem:[#allocation37_spill] sm:$0xff] %v4477_v55  ;;  %v1237_v5 = vmul.f32 %v4172_v27, %v966_v20  ;;  %v931_v19 = vadd.f32 %v915_v41, %v894_v30  ;;  %v952_v38 = vmul.f32 %v4404_v61, %v4471_v29  ;;  %v1105_v40 = vmul.f32 %v4466_v43, %v4397_v57  ;;  %v4503_v55 = vpop.permute.xlu1 %735 }
 0x34c   :  { %v1062_v14 = vadd.f32 %v1046_v56, %v1025_v58  ;;  %v1142_v25 = vmul.f32 %v4482_v36, %v4471_v29  ;;  %v441_v23 = vmul.f32 %v4199_v60, %v4131_v17  ;;  %5766 = vst [vmem:[#allocation38_spill] sm:$0xff] %v4503_v55  ;;  %v520_v41 = vmul.f32 0.044715, %v4352_v9 }
 0x34d   :  { %v4505_v0 = vadd.f32 %v952_v38, %v931_v19  ;;  %v1121_v27 = vadd.f32 %v1105_v40, %v1084_v63  ;;  %v535_v30 = vmul.f32 %v519_v7, %v4336_v51  ;;  %v4511_v58 = vadd.f32 %v4210_v8, %v458_v12 }
 0x34e   :  { %v1253_v20 = vadd.f32 %v1237_v5, %v1062_v14  ;;  %v489_v17 = vmul.f32 0.5, %v4289_v50  ;;  %v536_v19 = vmul.f32 %v520_v41, %v4352_v9  ;;  %v601_v38 = vadd.f32 1.0, %v3545_v28 }
 0x34f   :  { %v1158_v56 = vadd.f32 %v1142_v25, %v1121_v27  ;;  %v503_v63 = vmul.f32 0.7978846, %v4336_v51  ;;  %v551_v11 = vadd.f32 1.0, %v535_v30  ;;  %v5706_v40 = vrot.slane %v4361_v18, 7  ;;  %v4527_v25 = vpop.permute.xlu1 %1293 }
 0x350   :  { %v504_v7 = vmul.f32 0.7978846, %v4352_v9  ;;  %v552_v12 = vadd.f32 1.0, %v536_v19  ;;  %v526_v5 = vmul.f32 0.044715, %v4511_v58  ;;  %v4524_v50 = vadd.f32 %v4210_v8, %v456_v54  ;;  %5767 = vst [vmem:[#allocation39_spill] sm:$0xff] %v4527_v25  ;;  %v3547_v19 = vpop.eup %3546 }
 0x351   :  { %v1333_v14 = vmul.f32 %v4178_v24, %v1158_v56  ;;  %v567_v55 = vmul.f32 %v551_v11, %v503_v63  ;;  %v461_v28 = vmul.f32 %v4201_v2, %v441_v23  ;;  %v4532_v30 = vmul.f32 %v601_v38, %v489_v17  ;;  %v3549_v11 = vpop.eup %3548 }
 0x352   :  { %v568_v41 = vmul.f32 %v552_v12, %v504_v7  ;;  %v542_v24 = vmul.f32 %v526_v5, %v4511_v58  ;;  %v4540_v54 = vsel %vm661_vm2, %v5706_v40, %v5705_v21  ;;  %v510_v23 = vmul.f32 0.7978846, %v4511_v58 }
 0x353   :  { %v4529_v27 = vadd.f32 %v1333_v14, %v1253_v20  ;;  %3550 = vtanh.f32 %v567_v55  ;;  %v524_v20 = vmul.f32 0.044715, %v4524_v50  ;;  %v490_v63 = vmul.f32 0.5, %v4292_v26  ;;  %v4556_v21 = vpop.permute.xlu1 %1297 }
 0x354   :  { %3552 = vtanh.f32 %v568_v41  ;;  %v558_v56 = vadd.f32 1.0, %v542_v24  ;;  %v4546_v17 = vadd.f32 %v4210_v8, %v461_v28  ;;  %v437_v55 = vmul.f32 %v4199_v60, %v4111_v6  ;;  %5769 = vst [vmem:[#allocation41_spill] sm:$0xff] %v4556_v21 }
 0x355   :  { %5768 = vst [vmem:[#allocation40_spill] sm:$0xff] %v4529_v27  ;;  %v5707_v38 = vrot.slane %v4354_v10, 1  ;;  %v491_v14 = vmul.f32 0.5, %v4295_v46  ;;  %v602_v7 = vadd.f32 1.0, %v3547_v19  ;;  %v487_v12 = vmul.f32 0.5, %v4336_v51 }
 0x356   :  { %v574_v5 = vmul.f32 %v558_v56, %v510_v23  ;;  %v603_v41 = vadd.f32 1.0, %v3549_v11  ;;  %v5708_v24 = vrot.slane %v4532_v30, 7  ;;  %v508_v26 = vmul.f32 0.7978846, %v4524_v50 }
 0x357   :  { %v540_v28 = vmul.f32 %v524_v20, %v4524_v50  ;;  %v4558_v40 = vmul.f32 %v602_v7, %v490_v63  ;;  %v529_v6 = vmul.f32 0.044715, %v4546_v17  ;;  %v646_v60 = vrot.slane %v4417_v15, 7 }
 0x358   :  { %3554 = vtanh.f32 %v574_v5  ;;  %v4562_v46 = vmul.f32 %v603_v41, %v491_v14  ;;  %v457_v23 = vmul.f32 %v4201_v2, %v437_v55  ;;  %v5771_v56 = vrot.slane %v4333_v39, 1 }
 0x359   :  { %5770 = vst [vmem:[#allocation42_spill] sm:$0xff] %v4558_v40  ;;  %v556_v51 = vadd.f32 1.0, %v540_v28  ;;  %v650_v19 = vrot.slane %v4558_v40, 7  ;;  %v5709_v63 = vrot.slane %v4558_v40, 1  ;;  %v488_v11 = vmul.f32 0.5, %v4352_v9 }
 0x35a   :  { %v4571_v20 = vsel %vm790_vm1, %v5707_v38, %v5771_v56  ;;  %v545_v14 = vmul.f32 %v529_v6, %v4546_v17  ;;  %v5711_v7 = vrot.slane %v4562_v46, 1  ;;  %v5710_v2 = vrot.slane %v4562_v46, 7 }
 0x35b   :  { %5772 = vst [vmem:[#allocation43_spill] sm:$0xff] %v4571_v20  ;;  %v572_v5 = vmul.f32 %v556_v51, %v508_v26  ;;  %v513_v55 = vmul.f32 0.7978846, %v4546_v17  ;;  %v670_v41 = vsel %vm661_vm2, %v5708_v24, %v650_v19  ;;  %v4585_v56 = vadd.f32 %v4210_v8, %v457_v23 }
 0x35c   :  { %v561_v28 = vadd.f32 1.0, %v545_v14  ;;  %v5773_v9 = vrot.slane %v4397_v57, 7  ;;  %v4592_v26 = vmul.f32 %v4184_v37, %v670_v41  ;;  %v798_v51 = vsel %vm790_vm1, %v5709_v63, %v5711_v7  ;;  %v857_v14 = vpop.permute.xlu1 %856 }
 0x35d   :  { %v3551_v38 = vpop.eup %3550  ;;  %3556 = vtanh.f32 %v572_v5  ;;  %v669_v8 = vsel %vm661_vm2, %v650_v19, %v5710_v2  ;;  %v4611_v27 = vmul.f32 %v857_v14, %v4436_v62  ;;  %v920_v63 = vmul.f32 %v4345_v52, %v4558_v40 }
 0x35e   :  { %v674_v6 = vsel %vm661_vm2, %v5773_v9, %v646_v60  ;;  %v3553_v23 = vpop.eup %3552  ;;  %v4605_v9 = vmul.f32 %v4194_v48, %v798_v51  ;;  %v599_v37 = vadd.f32 1.0, %v3551_v38  ;;  %v4608_v41 = vmul.f32 %v4186_v47, %v669_v8 }
 0x35f   :  { %v577_v24 = vmul.f32 %v561_v28, %v513_v55  ;;  %5775 = vst [vmem:[#allocation45_spill] sm:$0xff] %v4611_v27  ;;  %v899_v5 = vmul.f32 %v4384_v4, %v4592_v26  ;;  %v600_v19 = vadd.f32 1.0, %v3553_v23  ;;  %v5714_v48 = vrot.slane %v4532_v30, 1 }
 0x360   :  { %5774 = vst [vmem:[#allocation44_spill] sm:$0xff] %v4605_v9  ;;  %v4617_v2 = vmul.f32 %v599_v37, %v487_v12  ;;  %v1090_v38 = vmul.f32 %v4446_v45, %v4608_v41  ;;  %v1111_v47 = vmul.f32 %v4466_v43, %v4562_v46  ;;  %v957_v62 = vmul.f32 %v4404_v61, %v4605_v9 }
 0x361   :  { %v936_v55 = vadd.f32 %v920_v63, %v899_v5  ;;  %v4626_v28 = vmul.f32 %v600_v19, %v488_v11  ;;  %3558 = vtanh.f32 %v577_v24  ;;  %v525_v14 = vmul.f32 0.044715, %v4585_v56 }
 0x362   :  { %v3555_v51 = vpop.eup %3554  ;;  %v647_v8 = vrot.slane %v4617_v2, 7  ;;  %v778_v12 = vrot.slane %v4617_v2, 1  ;;  %v4630_v23 = vadd.f32 %v1111_v47, %v1090_v38  ;;  %v494_v5 = vmul.f32 0.5, %v4511_v58  ;;  %v829_v47 = vpop.permute.xlu0 %828 }
 0x363   :  { %v4633_v37 = vadd.f32 %v957_v62, %v936_v55  ;;  %v5713_v7 = vrot.slane %v4626_v28, 7  ;;  %v779_v63 = vrot.slane %v4626_v28, 1  ;;  %v606_v11 = vadd.f32 1.0, %v3555_v51 }
 0x364   :  { %v541_v24 = vmul.f32 %v525_v14, %v4585_v56  ;;  %v4641_v19 = vsel %vm661_vm2, %v646_v60, %v647_v8  ;;  %v4645_v38 = vmul.f32 %v4409_v35, %v4611_v27  ;;  %v4657_v60 = vpop.permute.xlu1 %1205  ;;  %v4667_v39 = vmul.f32 %v4166_v31, %v674_v6 }
 0x365   :  { %v672_v55 = vsel %vm661_vm2, %v647_v8, %v5713_v7  ;;  %v800_v58 = vsel %vm790_vm1, %v779_v63, %v5714_v48  ;;  %v801_v62 = vsel %vm790_vm1, %v778_v12, %v779_v63  ;;  %v4664_v21 = vmul.f32 %v606_v11, %v494_v5 }
 0x366   :  { %5776 = vst [vmem:[#allocation46_spill] sm:$0xff] %v4645_v38  ;;  %v4660_v51 = vmul.f32 %v4174_v34, %v672_v55  ;;  %v4662_v14 = vmul.f32 %v829_v47, %v800_v58  ;;  %v4671_v7 = vmul.f32 %v4409_v35, %v4471_v29  ;;  %v492_v48 = vmul.f32 0.5, %v4524_v50 }
 0x367   :  { %v3557_v8 = vpop.eup %3556  ;;  %v557_v63 = vadd.f32 1.0, %v541_v24  ;;  %v5777_v20 = vrot.slane %v4417_v15, 1  ;;  %v1108_v31 = vmul.f32 %v4466_v43, %v4626_v28  ;;  %v509_v6 = vmul.f32 0.7978846, %v4585_v56 }
 0x368   :  { %v1087_v5 = vmul.f32 %v4446_v45, %v4660_v51  ;;  %v893_v29 = vmul.f32 %v4384_v4, %v4421_v3  ;;  %v1145_v50 = vmul.f32 %v4482_v36, %v4662_v14  ;;  %v5718_v11 = vrot.slane %v4664_v21, 7 }
 0x369   :  { %v802_v34 = vsel %vm790_vm1, %v5777_v20, %v778_v12  ;;  %v604_v24 = vadd.f32 1.0, %v3557_v8  ;;  %v5721_v47 = vrot.slane %v4664_v21, 1  ;;  %v573_v12 = vmul.f32 %v557_v63, %v509_v6  ;;  %v841_v8 = vpop.permute.xlu0 %840 }
 0x36a   :  { %v1124_v20 = vadd.f32 %v1108_v31, %v1087_v5  ;;  %v4690_v55 = vmul.f32 %v4168_v32, %v802_v34  ;;  %v895_v58 = vmul.f32 %v4384_v4, %v4667_v39  ;;  %v5778_v9 = vrot.slane %v4361_v18, 7  ;;  %v746_v31 = vpop.permute.xlu1 %745 }
 0x36b   :  { %v3559_v25 = vpop.eup %3558  ;;  %v4702_v38 = vmul.f32 %v604_v24, %v492_v48  ;;  %v5779_v63 = vrot.slane %v4361_v18, 1  ;;  %v914_v34 = vmul.f32 %v4345_v52, %v4347_v53  ;;  %3560 = vtanh.f32 %v573_v12 }
 0x36c   :  { %v4700_v3 = vsel %vm661_vm2, %v5718_v11, %v5778_v9  ;;  %v4714_v5 = vadd.f32 %v1145_v50, %v1124_v20  ;;  %v497_v9 = vmul.f32 0.5, %v4546_v17  ;;  %v609_v6 = vadd.f32 1.0, %v3559_v25 }
 0x36d   :  { %v4710_v32 = vsel %vm790_vm1, %v5721_v47, %v5779_v63  ;;  %v771_v48 = vmul.f32 %v746_v31, %v4540_v54  ;;  %v5722_v24 = vrot.slane %v4702_v38, 1  ;;  %v916_v11 = vmul.f32 %v4345_v52, %v4417_v15 }
 0x36e   :  { %v930_v27 = vadd.f32 %v914_v34, %v893_v29  ;;  %v4723_v63 = vmul.f32 %v4192_v59, %v4505_v0  ;;  %v4725_v47 = vmul.f32 %v609_v6, %v497_v9  ;;  %v928_v50 = vmul.f32 %v4345_v52, %v4354_v10 }
 0x36f   :  { %v951_v25 = vmul.f32 %v4404_v61, %v4469_v42  ;;  %v5781_v54 = vrot.slane %v4562_v46, 1  ;;  %v932_v29 = vadd.f32 %v916_v11, %v895_v58  ;;  %v953_v59 = vmul.f32 %v4404_v61, %v4690_v55  ;;  %v853_v11 = vpop.permute.xlu0 %852 }
 0x370   :  { %5780 = vst [vmem:[#allocation47_spill] sm:$0xff] %v4725_v47  ;;  %v989_v0 = vmul.f32 %v4389_v1, %v4457_v49  ;;  %v657_v12 = vrot.slane %v4725_v47, 7  ;;  %v788_v34 = vrot.slane %v4725_v47, 1  ;;  %v4746_v9 = vmul.f32 %v4170_v33, %v801_v62 }
 0x371   :  { %v797_v17 = vsel %vm790_vm1, %v5781_v54, %v5722_v24  ;;  %v967_v31 = vadd.f32 %v951_v25, %v930_v27  ;;  %v4749_v6 = vmul.f32 %v4384_v4, %v771_v48  ;;  %v4751_v58 = vadd.f32 %v953_v59, %v932_v29 }
 0x372   :  { %v4741_v20 = vmul.f32 %v841_v8, %v797_v17  ;;  %v990_v54 = vmul.f32 %v4389_v1, %v4667_v39  ;;  %v4757_v8 = vpop.permute.xlu1 %750  ;;  %v5783_v17 = vrot.slane %v4354_v10, 7  ;;  %v5784_v27 = vrot.slane %v4378_v13, 7 }
 0x373   :  { %5782 = vst [vmem:[#allocation48_spill] sm:$0xff] %v4749_v6  ;;  %v1010_v25 = vmul.f32 %v4366_v22, %v4397_v57  ;;  %v4772_v29 = vmul.f32 %v4389_v1, %v771_v48  ;;  %v5787_v24 = vrot.slane %v4354_v10, 1  ;;  %v5788_v42 = vrot.slane %v4378_v13, 1 }
 0x374   :  { %v1148_v49 = vmul.f32 %v4482_v36, %v4741_v20  ;;  %v662_v33 = vsel %vm661_vm2, %v657_v12, %v5783_v17  ;;  %v4767_v62 = vsel %vm661_vm2, %v5784_v27, %v657_v12  ;;  %v5790_v27 = vld [vmem:[#allocation20_spill] sm:$0xff]  ;;  %v4803_v6 = vmul.f32 %v4446_v45, %v771_v48 }
 0x375   :  { %5785 = vst [vmem:[#allocation49_spill] sm:$0xff] %v4772_v29  ;;  %v4775_v59 = vmul.f32 %v4224_v16, %v662_v33  ;;  %v4781_v17 = vsel %vm790_vm1, %v788_v34, %v5787_v24  ;;  %v4787_v12 = vsel %vm790_vm1, %v5788_v42, %v788_v34  ;;  %v4794_v53 = vmul.f32 %v5790_v27, %v4641_v19  ;;  %v3561_v34 = vpop.eup %3560 }
 0x376   :  { %v4790_v57 = vadd.f32 %v1148_v49, %v4630_v23  ;;  %v1011_v16 = vmul.f32 %v4366_v22, %v4417_v15  ;;  %v1026_v33 = vadd.f32 %v1010_v25, %v989_v0  ;;  %v4800_v24 = vmul.f32 %v4657_v60, %v4633_v37  ;;  %5791 = vst [vmem:[#allocation20_spill] sm:$0xff] %v4803_v6  ;;  %v4819_v25 = vpop.permute.xlu0 %864 }
 0x377   :  { %5786 = vst [vmem:[#allocation50_spill] sm:$0xff] %v4775_v59  ;;  %v907_v42 = vmul.f32 %v4384_v4, %v4775_v59  ;;  %v493_v23 = vmul.f32 0.5, %v4585_v56  ;;  %v4810_v19 = vmul.f32 %v4409_v35, %v4746_v9  ;;  %v4814_v0 = vmul.f32 %v4409_v35, %v4662_v14 }
 0x378   :  { %5789 = vst [vmem:[#allocation51_spill] sm:$0xff] %v4790_v57  ;;  %v652_v37 = vrot.slane %v4702_v38, 7  ;;  %v1027_v60 = vadd.f32 %v1011_v16, %v990_v54  ;;  %v605_v48 = vadd.f32 1.0, %v3561_v34  ;;  %v1048_v56 = vmul.f32 %v4409_v35, %v4690_v55  ;;  %v4824_v57 = vpop.permute.xlu1 %1305 }
 0x379   :  { %v4817_v49 = vadd.f32 %v928_v50, %v907_v42  ;;  %v1063_v27 = vadd.f32 %v4671_v7, %v1026_v33  ;;  %5793 = vst [vmem:[#allocation53_spill] sm:$0xff] %v4824_v57  ;;  %v1085_v10 = vmul.f32 %v4446_v45, %v4667_v39  ;;  %v1086_v59 = vmul.f32 %v4446_v45, %v4794_v53  ;;  %v5794_v33 = vld [vmem:[#allocation15_spill] sm:$0xff] }
 0x37a   :  { %v1106_v50 = vmul.f32 %v4466_v43, %v4417_v15  ;;  %v1107_v54 = vmul.f32 %v4466_v43, %v4617_v2  ;;  %v1144_v16 = vmul.f32 %v4482_v36, %v4746_v9  ;;  %v4836_v42 = vmul.f32 %v605_v48, %v493_v23 }
 0x37b   :  { %5792 = vst [vmem:[#allocation52_spill] sm:$0xff] %v4817_v49  ;;  %v1064_v7 = vadd.f32 %v1048_v56, %v1027_v60  ;;  %v1238_v34 = vmul.f32 %v5794_v33, %v967_v31  ;;  %v1143_v39 = vmul.f32 %v4482_v36, %v4690_v55  ;;  %v5795_v29 = vrot.slane %v4562_v46, 7  ;;  %v5801_v33 = vld [vmem:[#allocation17_spill] sm:$0xff] }
 0x37c   :  { %v1122_v49 = vadd.f32 %v1106_v50, %v1085_v10  ;;  %v1123_v57 = vadd.f32 %v1107_v54, %v1086_v59  ;;  %v4846_v47 = vmul.f32 %v853_v11, %v4710_v32  ;;  %v5731_v6 = vrot.slane %v4836_v42, 7  ;;  %v5796_v59 = vld [vmem:[#allocation24_spill] sm:$0xff]  ;;  %v5800_v54 = vld [vmem:[#allocation30_spill] sm:$0xff] }
 0x37d   :  { %v668_v15 = vsel %vm661_vm2, %v5795_v29, %v652_v37  ;;  %v784_v23 = vrot.slane %v4836_v42, 1  ;;  %v1254_v60 = vadd.f32 %v1238_v34, %v1063_v27  ;;  %v1255_v10 = vadd.f32 %v4723_v63, %v1064_v7  ;;  %v1278_v29 = vpop.permute.xlu0 %1277  ;;  %v4870_v7 = vpop.permute.xlu1 %860 }
 0x37e   :  { %v1159_v48 = vadd.f32 %v1143_v39, %v1122_v49  ;;  %v1160_v31 = vadd.f32 %v1144_v16, %v1123_v57  ;;  %v4852_v56 = vmul.f32 %v5796_v59, %v668_v15  ;;  %v667_v55 = vsel %vm661_vm2, %v652_v37, %v5731_v6  ;;  %v5799_v49 = vld [vmem:[#allocation21_spill] sm:$0xff]  ;;  %v5809_v6 = vld [vmem:[#allocation22_spill] sm:$0xff] }
 0x37f   :  { %v5797_v32 = vrot.slane %v4664_v21, 1  ;;  %v5798_v27 = vrot.slane %v4702_v38, 1  ;;  %v922_v63 = vmul.f32 %v4345_v52, %v4702_v38  ;;  %v768_v50 = vmul.f32 %v5799_v49, %v667_v55  ;;  %v5802_v39 = vld [vmem:[#allocation25_spill] sm:$0xff] }
 0x380   :  { %v1334_v37 = vmul.f32 %v1278_v29, %v1159_v48  ;;  %v1335_v34 = vmul.f32 %v5801_v33, %v1160_v31  ;;  %v901_v59 = vmul.f32 %v4384_v4, %v4852_v56  ;;  %v1113_v29 = vmul.f32 %v4466_v43, %v4836_v42 }
 0x381   :  { %v795_v11 = vsel %vm790_vm1, %v784_v23, %v5797_v32  ;;  %v796_v57 = vsel %vm790_vm1, %v5798_v27, %v784_v23  ;;  %v5803_v23 = vrot.slane %v4532_v30, 7  ;;  %v5804_v32 = vrot.slane %v4626_v28, 7 }
 0x382   :  { %v881_v16 = vmul.f32 %v5800_v54, %v795_v11  ;;  %v4874_v15 = vmul.f32 %v5802_v39, %v796_v57  ;;  %v5805_v11 = vrot.slane %v4558_v40, 1  ;;  %v5806_v27 = vrot.slane %v4532_v30, 1 }
 0x383   :  { %v671_v55 = vsel %vm661_vm2, %v5804_v32, %v5803_v23  ;;  %v1092_v31 = vmul.f32 %v4446_v45, %v768_v50  ;;  %v4893_v57 = vadd.f32 %v1334_v37, %v1254_v60  ;;  %v4895_v49 = vadd.f32 %v1335_v34, %v1255_v10  ;;  %v5810_v37 = vld [vmem:[#allocation14_spill] sm:$0xff] }
 0x384   :  { %v799_v48 = vsel %vm790_vm1, %v5806_v27, %v5805_v11  ;;  %v938_v54 = vadd.f32 %v922_v63, %v901_v59  ;;  %v959_v33 = vmul.f32 %v4404_v61, %v4874_v15  ;;  %v997_v39 = vmul.f32 %v4389_v1, %v768_v50  ;;  %v5811_v59 = vld [vmem:[#allocation23_spill] sm:$0xff] }
 0x385   :  { %5807 = vst [vmem:[#allocation15_spill] sm:$0xff] %v4893_v57  ;;  %5808 = vst [vmem:[#allocation24_spill] sm:$0xff] %v4895_v49  ;;  %v1018_v23 = vmul.f32 %v4366_v22, %v4836_v42  ;;  %v1129_v32 = vadd.f32 %v1113_v29, %v1092_v31  ;;  %v1150_v11 = vmul.f32 %v4482_v36, %v881_v16  ;;  %v1214_v31 = vpop.permute.xlu1 %1213  ;;  %v5817_v40 = vrot.slane %v4836_v42, 7 }
 0x386   :  { %v1055_v27 = vmul.f32 %v4409_v35, %v881_v16  ;;  %v4905_v13 = vmul.f32 %v5809_v6, %v671_v55  ;;  %v975_v60 = vadd.f32 %v959_v33, %v938_v54  ;;  %v4908_v63 = vmul.f32 %v5810_v37, %v799_v48 }
 0x387   :  { %v1034_v10 = vadd.f32 %v1018_v23, %v997_v39  ;;  %v896_v34 = vmul.f32 %v4384_v4, %v4794_v53  ;;  %v1336_v49 = vmul.f32 %v5811_v59, %v4714_v5  ;;  %v4914_v57 = vadd.f32 %v1150_v11, %v1129_v32 }
 0x388   :  { %v898_v29 = vmul.f32 %v4384_v4, %v4905_v13  ;;  %v917_v6 = vmul.f32 %v4345_v52, %v4617_v2  ;;  %v1056_v55 = vmul.f32 %v4409_v35, %v4846_v47  ;;  %v1246_v54 = vmul.f32 %v1214_v31, %v975_v60 }
 0x389   :  { %5812 = vst [vmem:[#allocation21_spill] sm:$0xff] %v4914_v57  ;;  %v1071_v48 = vadd.f32 %v1055_v27, %v1034_v10  ;;  %v919_v33 = vmul.f32 %v4345_v52, %v4532_v30  ;;  %v954_v5 = vmul.f32 %v4404_v61, %v4746_v9  ;;  %v956_v23 = vmul.f32 %v4404_v61, %v4908_v63  ;;  %v1290_v10 = vpop.permute.xlu0 %1289 }
 0x38a   :  { %v933_v39 = vadd.f32 %v917_v6, %v896_v34  ;;  %v991_v32 = vmul.f32 %v4389_v1, %v4794_v53  ;;  %v992_v27 = vmul.f32 %v4389_v1, %v4660_v51  ;;  %v1012_v60 = vmul.f32 %v4366_v22, %v4617_v2 }
 0x38b   :  { %v4930_v11 = vadd.f32 %v1246_v54, %v1071_v48  ;;  %v935_v37 = vadd.f32 %v919_v33, %v898_v29  ;;  %v1013_v9 = vmul.f32 %v4366_v22, %v4626_v28  ;;  %v1088_v59 = vmul.f32 %v4446_v45, %v4905_v13  ;;  %v5814_v48 = vld [vmem:[#allocation18_spill] sm:$0xff] }
 0x38c   :  { %v970_v34 = vadd.f32 %v954_v5, %v933_v39  ;;  %v1109_v53 = vmul.f32 %v4466_v43, %v4532_v30  ;;  %v1028_v29 = vadd.f32 %v1012_v60, %v991_v32  ;;  %v1146_v6 = vmul.f32 %v4482_v36, %v4908_v63  ;;  %v5815_v39 = vld [vmem:[#allocation19_spill] sm:$0xff]  ;;  %v5818_v32 = vld [vmem:[#allocation38_spill] sm:$0xff] }
 0x38d   :  { %5813 = vst [vmem:[#allocation30_spill] sm:$0xff] %v4930_v11  ;;  %v4942_v31 = vadd.f32 %v956_v23, %v935_v37  ;;  %v1240_v2 = vmul.f32 %v5814_v48, %v4751_v58  ;;  %v1029_v54 = vadd.f32 %v1013_v9, %v992_v27  ;;  %v5816_v57 = vrot.slane %v4664_v21, 7 }
 0x38e   :  { %v1125_v33 = vadd.f32 %v1109_v53, %v1088_v59  ;;  %v1241_v5 = vmul.f32 %v5815_v39, %v970_v34  ;;  %v1065_v23 = vadd.f32 %v4810_v19, %v1028_v29  ;;  %v902_v60 = vmul.f32 %v4384_v4, %v768_v50  ;;  %v1218_v34 = vpop.permute.xlu1 %1217  ;;  %v1302_v29 = vpop.permute.xlu0 %1301  ;;  %v5819_v39 = vld [vmem:[#allocation26_spill] sm:$0xff] }
 0x38f   :  { %v666_v11 = vsel %vm661_vm2, %v5817_v40, %v5816_v57  ;;  %v923_v58 = vmul.f32 %v4345_v52, %v4836_v42  ;;  %v1066_v27 = vadd.f32 %v4814_v0, %v1029_v54  ;;  %v960_v59 = vmul.f32 %v4404_v61, %v881_v16 }
 0x390   :  { %v769_v37 = vmul.f32 %v5818_v32, %v666_v11  ;;  %v1162_v9 = vadd.f32 %v1146_v6, %v1125_v33  ;;  %v1019_v53 = vmul.f32 %v4366_v22, %v4664_v21  ;;  %v1256_v44 = vadd.f32 %v1240_v2, %v1065_v23 }
 0x391   :  { %v939_v40 = vadd.f32 %v923_v58, %v902_v60  ;;  %v995_v57 = vmul.f32 %v4389_v1, %v4608_v41  ;;  %v1257_v50 = vadd.f32 %v1241_v5, %v1066_v27  ;;  %v1016_v0 = vmul.f32 %v4366_v22, %v4562_v46 }
 0x392   :  { %v998_v19 = vmul.f32 %v4389_v1, %v769_v37  ;;  %v1337_v11 = vmul.f32 %v1290_v10, %v1162_v9  ;;  %v1091_v42 = vmul.f32 %v4446_v45, %v4852_v56  ;;  %v4971_v16 = vadd.f32 %v1336_v49, %v1256_v44  ;;  %v1314_v9 = vpop.permute.xlu1 %1313 }
 0x393   :  { %v976_v6 = vadd.f32 %v960_v59, %v939_v40  ;;  %v1112_v2 = vmul.f32 %v4466_v43, %v4702_v38  ;;  %v1053_v54 = vmul.f32 %v4409_v35, %v4741_v20  ;;  %v1032_v10 = vadd.f32 %v1016_v0, %v995_v57  ;;  %v5820_v57 = vld [vmem:[#allocation45_spill] sm:$0xff] }
 0x394   :  { %v1035_v48 = vadd.f32 %v1019_v53, %v998_v19  ;;  %v4977_v33 = vadd.f32 %v1337_v11, %v1257_v50  ;;  %v4981_v5 = vmul.f32 %v5819_v39, %v4700_v3  ;;  %v1149_v49 = vmul.f32 %v4482_v36, %v4874_v15  ;;  %v1310_v11 = vpop.permute.xlu0 %1309 }
 0x395   :  { %v1247_v32 = vmul.f32 %v1218_v34, %v976_v6  ;;  %v1128_v60 = vadd.f32 %v1112_v2, %v1091_v42  ;;  %v4987_v58 = vmul.f32 %v4389_v1, %v4592_v26  ;;  %v1069_v27 = vadd.f32 %v1053_v54, %v1032_v10 }
 0x396   :  { %v1072_v23 = vadd.f32 %v1056_v55, %v1035_v48  ;;  %v1094_v59 = vmul.f32 %v4446_v45, %v4981_v5  ;;  %v1115_v53 = vmul.f32 %v4466_v43, %v4361_v18  ;;  %v4995_v3 = vmul.f32 %v4757_v8, %v4767_v62 }
 0x397   :  { %v1165_v34 = vadd.f32 %v1149_v49, %v1128_v60  ;;  %v1093_v44 = vmul.f32 %v4446_v45, %v769_v37  ;;  %v1260_v40 = vadd.f32 %v4800_v24, %v1069_v27  ;;  %v1152_v50 = vmul.f32 %v4482_v36, %v5820_v57  ;;  %v1222_v60 = vpop.permute.xlu1 %1221 }
 0x398   :  { %v1263_v55 = vadd.f32 %v1247_v32, %v1072_v23  ;;  %v1131_v19 = vadd.f32 %v1115_v53, %v1094_v59  ;;  %v1114_v0 = vmul.f32 %v4466_v43, %v4664_v21  ;;  %v1151_v6 = vmul.f32 %v4482_v36, %v4846_v47 }
 0x399   :  { %v1340_v42 = vmul.f32 %v1302_v29, %v1165_v34  ;;  %v903_v8 = vmul.f32 %v4384_v4, %v769_v37  ;;  %v924_v62 = vmul.f32 %v4345_v52, %v4664_v21  ;;  %v961_v24 = vmul.f32 %v4404_v61, %v4846_v47 }
 0x39a   :  { %v1168_v48 = vadd.f32 %v1152_v50, %v1131_v19  ;;  %v1130_v2 = vadd.f32 %v1114_v0, %v1093_v44  ;;  %v999_v54 = vmul.f32 %v4389_v1, %v4981_v5  ;;  %v1020_v29 = vmul.f32 %v4366_v22, %v4361_v18  ;;  %v1198_v44 = vpop.permute.xlu0 %1197  ;;  %v5822_v50 = vld [vmem:[#allocation30_spill] sm:$0xff] }
 0x39b   :  { %v5012_v10 = vadd.f32 %v1340_v42, %v1260_v40  ;;  %v940_v39 = vadd.f32 %v924_v62, %v903_v8  ;;  %v897_v37 = vmul.f32 %v4384_v4, %v4660_v51  ;;  %v5020_v21 = vmul.f32 %v4870_v7, %v4787_v12 }
 0x39c   :  { %v1343_v23 = vmul.f32 %v1314_v9, %v1168_v48  ;;  %v1167_v32 = vadd.f32 %v1151_v6, %v1130_v2  ;;  %v918_v47 = vmul.f32 %v4345_v52, %v4626_v28  ;;  %v1036_v27 = vadd.f32 %v1020_v29, %v999_v54  ;;  %v5821_v28 = vld [vmem:[#allocation46_spill] sm:$0xff] }
 0x39d   :  { %v977_v49 = vadd.f32 %v961_v24, %v940_v39  ;;  %v955_v59 = vmul.f32 %v4404_v61, %v4662_v14  ;;  %v993_v53 = vmul.f32 %v4389_v1, %v4905_v13  ;;  %v1014_v7 = vmul.f32 %v4366_v22, %v4532_v30  ;;  %v5823_v6 = vld [vmem:[#allocation42_spill] sm:$0xff]  ;;  %v1318_v24 = vpop.permute.xlu1 %1317  ;;  %v5826_v39 = vld [vmem:[#allocation20_spill] sm:$0xff] }
 0x39e   :  { %v5028_v34 = vadd.f32 %v1343_v23, %v1263_v55  ;;  %v1342_v51 = vmul.f32 %v1310_v11, %v1167_v32  ;;  %v934_v12 = vadd.f32 %v918_v47, %v897_v37  ;;  %v885_v9 = vmul.f32 %v4819_v25, %v4781_v17  ;;  %v5824_v25 = vld [vmem:[#allocation31_spill] sm:$0xff]  ;;  %v1210_v47 = vpop.permute.xlu0 %1209 }
 0x39f   :  { %v1073_v40 = vadd.f32 %v5821_v28, %v1036_v27  ;;  %v1248_v19 = vmul.f32 %v1222_v60, %v977_v49  ;;  %v1089_v14 = vmul.f32 %v4446_v45, %v4592_v26  ;;  %v1030_v55 = vadd.f32 %v1014_v7, %v993_v53  ;;  %v5825_v26 = vld [vmem:[#allocation44_spill] sm:$0xff]  ;;  %v5828_v28 = vld [vmem:[#allocation39_spill] sm:$0xff] }
 0x3a0   :  { %v5038_v0 = vadd.f32 %v1342_v51, %v5822_v50  ;;  %v971_v13 = vadd.f32 %v955_v59, %v934_v12  ;;  %v1051_v11 = vmul.f32 %v4409_v35, %v4908_v63  ;;  %v906_v30 = vmul.f32 %v4384_v4, %v4995_v3  ;;  %v5827_v12 = vld [vmem:[#allocation47_spill] sm:$0xff] }
 0x3a1   :  { %v1264_v42 = vadd.f32 %v1248_v19, %v1073_v40  ;;  %v1110_v17 = vmul.f32 %v4466_v43, %v5823_v6  ;;  %v1116_v8 = vmul.f32 %v4466_v43, %v5824_v25  ;;  %v1147_v48 = vmul.f32 %v4482_v36, %v5825_v26  ;;  %v1322_v50 = vpop.permute.xlu1 %1321 }
 0x3a2   :  { %v1067_v62 = vadd.f32 %v1051_v11, %v1030_v55  ;;  %v1242_v2 = vmul.f32 %v1198_v44, %v971_v13  ;;  %v1153_v54 = vmul.f32 %v4482_v36, %v5020_v21  ;;  %v900_v37 = vmul.f32 %v4384_v4, %v4608_v41 }
 0x3a3   :  { %v1126_v63 = vadd.f32 %v1110_v17, %v1089_v14  ;;  %v1132_v29 = vadd.f32 %v1116_v8, %v5826_v39  ;;  %v921_v23 = vmul.f32 %v4345_v52, %v4562_v46  ;;  %v1096_v32 = vmul.f32 %v4446_v45, %v4995_v3  ;;  %v5831_v39 = vld [vmem:[#allocation53_spill] sm:$0xff] }
 0x3a4   :  { %v1258_v60 = vadd.f32 %v1242_v2, %v1067_v62  ;;  %v958_v49 = vmul.f32 %v4404_v61, %v4741_v20  ;;  %v996_v27 = vmul.f32 %v4389_v1, %v4852_v56  ;;  %v1017_v41 = vmul.f32 %v4366_v22, %v4702_v38  ;;  %v1226_v62 = vpop.permute.xlu0 %1225 }
 0x3a5   :  { %v1163_v59 = vadd.f32 %v1147_v48, %v1126_v63  ;;  %v1169_v53 = vadd.f32 %v1153_v54, %v1132_v29  ;;  %v937_v51 = vadd.f32 %v921_v23, %v900_v37  ;;  %v1058_v46 = vmul.f32 %v4409_v35, %v5020_v21  ;;  %v5830_v63 = vld [vmem:[#allocation21_spill] sm:$0xff]  ;;  %v5832_v37 = vld [vmem:[#allocation43_spill] sm:$0xff]  ;;  %v5833_v23 = vld [vmem:[#allocation12_spill] sm:$0xff] }
 0x3a6   :  { %v1054_v44 = vmul.f32 %v4409_v35, %v4874_v15  ;;  %v1117_v7 = vmul.f32 %v4466_v43, %v5827_v12  ;;  %v904_v20 = vmul.f32 %v4384_v4, %v4981_v5  ;;  %v1033_v14 = vadd.f32 %v1017_v41, %v996_v27 }
 0x3a7   :  { %v1338_v56 = vmul.f32 %v5828_v28, %v1163_v59  ;;  %v1344_v40 = vmul.f32 %v1318_v24, %v1169_v53  ;;  %v974_v19 = vadd.f32 %v958_v49, %v937_v51  ;;  %v1154_v38 = vmul.f32 %v4482_v36, %v885_v9  ;;  %v5829_v24 = vld [vmem:[#allocation49_spill] sm:$0xff]  ;;  %v5834_v51 = vld [vmem:[#allocation50_spill] sm:$0xff] }
 0x3a8   :  { %v1133_v13 = vadd.f32 %v1117_v7, %v1096_v32  ;;  %v925_v55 = vmul.f32 %v4345_v52, %v4361_v18  ;;  %v1021_v15 = vmul.f32 %v4366_v22, %v5824_v25  ;;  %v1070_v4 = vadd.f32 %v1054_v44, %v1033_v14  ;;  %v5835_v28 = vld [vmem:[#allocation29_spill] sm:$0xff]  ;;  %v1230_v14 = vpop.permute.xlu0 %1229 }
 0x3a9   :  { %v5079_v11 = vadd.f32 %v1338_v56, %v1258_v60  ;;  %v5081_v17 = vadd.f32 %v1344_v40, %v1264_v42  ;;  %v1245_v5 = vmul.f32 %v1210_v47, %v974_v19  ;;  %v962_v2 = vmul.f32 %v4404_v61, %v5820_v57 }
 0x3aa   :  { %v1170_v8 = vadd.f32 %v1154_v38, %v1133_v13  ;;  %v941_v48 = vadd.f32 %v925_v55, %v904_v20  ;;  %v1037_v54 = vadd.f32 %v1021_v15, %v5829_v24  ;;  %v1341_v18 = vmul.f32 %v5831_v39, %v5830_v63  ;;  %v1234_v20 = vpop.permute.xlu1 %1233  ;;  %v5837_v38 = vld [vmem:[#allocation33_spill] sm:$0xff]  ;;  %v5839_v24 = vld [vmem:[#allocation32_spill] sm:$0xff] }
 0x3ab   :  { %v1261_v29 = vadd.f32 %v1245_v5, %v1070_v4  ;;  %v886_v32 = vmul.f32 %v5833_v23, %v5832_v37  ;;  %v927_v42 = vmul.f32 %v4345_v52, %v5827_v12  ;;  %v1001_v60 = vmul.f32 %v4389_v1, %v4995_v3  ;;  %v5838_v4 = vld [vmem:[#allocation27_spill] sm:$0xff]  ;;  %v5840_v37 = vld [vmem:[#allocation52_spill] sm:$0xff] }
 0x3ac   :  { %v1059_v47 = vmul.f32 %v4409_v35, %v885_v9  ;;  %v978_v49 = vadd.f32 %v962_v2, %v941_v48  ;;  %v1074_v27 = vadd.f32 %v1058_v46, %v1037_v54  ;;  %v964_v53 = vmul.f32 %v4404_v61, %v885_v9 }
 0x3ad   :  { %v5095_v57 = vadd.f32 %v1341_v18, %v1261_v29  ;;  %v943_v59 = vadd.f32 %v927_v42, %v906_v30  ;;  %v1002_v41 = vmul.f32 %v4389_v1, %v5834_v51  ;;  %v1345_v44 = vmul.f32 %v1322_v50, %v1170_v8  ;;  %v5836_v50 = vld [vmem:[#allocation48_spill] sm:$0xff] }
 0x3ae   :  { %v1249_v7 = vmul.f32 %v1226_v62, %v978_v49  ;;  %v1023_v56 = vmul.f32 %v4366_v22, %v5835_v28  ;;  %v926_v3 = vmul.f32 %v4345_v52, %v5824_v25  ;;  %v1060_v46 = vmul.f32 %v4409_v35, %v886_v32  ;;  %v1330_v18 = vpop.permute.xlu1 %1329  ;;  %v5841_v49 = vld [vmem:[#allocation34_spill] sm:$0xff] }
 0x3af   :  { %v980_v40 = vadd.f32 %v964_v53, %v943_v59  ;;  %v963_v30 = vmul.f32 %v4404_v61, %v5020_v21  ;;  %v1022_v9 = vmul.f32 %v4366_v22, %v5827_v12  ;;  %v1082_v55 = vmul.f32 %v4446_v45, %v5837_v38  ;;  %v5848_v38 = vld [vmem:[#allocation51_spill] sm:$0xff] }
 0x3b0   :  { %v1265_v19 = vadd.f32 %v1249_v7, %v1074_v27  ;;  %v1039_v1 = vadd.f32 %v1023_v56, %v1002_v41  ;;  %v942_v13 = vadd.f32 %v926_v3, %v5836_v50  ;;  %v965_v15 = vmul.f32 %v4404_v61, %v886_v32  ;;  %v5843_v41 = vld [vmem:[#allocation16_spill] sm:$0xff] }
 0x3b1   :  { %v1251_v52 = vmul.f32 %v1234_v20, %v980_v40  ;;  %v1038_v25 = vadd.f32 %v1022_v9, %v1001_v60  ;;  %v1103_v5 = vmul.f32 %v4466_v43, %v5838_v4  ;;  %v1097_v12 = vmul.f32 %v4446_v45, %v5834_v51  ;;  %v1326_v51 = vpop.permute.xlu0 %1325  ;;  %v5844_v20 = vld [vmem:[#allocation36_spill] sm:$0xff] }
 0x3b2   :  { %v5115_v8 = vadd.f32 %v1345_v44, %v1265_v19  ;;  %v1076_v21 = vadd.f32 %v1060_v46, %v1039_v1  ;;  %v979_v62 = vadd.f32 %v963_v30, %v942_v13  ;;  %v1140_v54 = vmul.f32 %v4482_v36, %v5839_v24  ;;  %v5846_v30 = vld [vmem:[#allocation35_spill] sm:$0xff] }
 0x3b3   :  { %v1075_v48 = vadd.f32 %v1059_v47, %v1038_v25  ;;  %v1119_v2 = vadd.f32 %v1103_v5, %v1082_v55  ;;  %v1118_v61 = vmul.f32 %v4466_v43, %v5835_v28  ;;  %v1155_v29 = vmul.f32 %v4482_v36, %v886_v32  ;;  %v5842_v47 = vld [vmem:[#allocation28_spill] sm:$0xff]  ;;  %v5849_v55 = vld [vmem:[#allocation41_spill] sm:$0xff]  ;;  %v5851_v5 = vld [vmem:[#allocation15_spill] sm:$0xff] }
 0x3b4   :  { %v1267_v63 = vadd.f32 %v1251_v52, %v1076_v21  ;;  %v1250_v39 = vmul.f32 %v1230_v14, %v979_v62  ;;  %v981_v23 = vadd.f32 %v965_v15, %v5840_v37  ;;  %v1083_v27 = vmul.f32 %v4446_v45, %v5841_v49  ;;  %v5845_v45 = vld [vmem:[#allocation37_spill] sm:$0xff] }
 0x3b5   :  { %v1156_v42 = vadd.f32 %v1140_v54, %v1119_v2  ;;  %v1134_v60 = vadd.f32 %v1118_v61, %v1097_v12  ;;  %v1104_v59 = vmul.f32 %v4466_v43, %v5842_v47  ;;  %v1015_v7 = vmul.f32 %v4366_v22, %v5823_v6  ;;  %v2643_v22 = vld [vmem:[#allocation2 + $0x3] ss:$0 sm:$0xff] }
 0x3b6   :  { %v1266_v53 = vadd.f32 %v1250_v39, %v1075_v48  ;;  %v1236_v44 = vmul.f32 %v5843_v41, %v981_v23  ;;  %v1141_v32 = vmul.f32 %v4482_v36, %v5844_v20  ;;  %v1052_v40 = vmul.f32 %v4409_v35, %v5825_v26  ;;  %v5847_v36 = vld [vmem:[#allocation13_spill] sm:$0xff]  ;;  %v5850_v26 = vld [vmem:[#allocation40_spill] sm:$0xff] }
 0x3b7   :  { %v1347_v28 = vmul.f32 %v1330_v18, %v1156_v42  ;;  %v1171_v56 = vadd.f32 %v1155_v29, %v1134_v60  ;;  %v1120_v3 = vadd.f32 %v1104_v59, %v1083_v27  ;;  %v1031_v43 = vadd.f32 %v1015_v7, %v4987_v58 }
 0x3b8   :  { %v1252_v46 = vadd.f32 %v1236_v44, %v5845_v45  ;;  %v1243_v9 = vmul.f32 %v5846_v30, %v4942_v31  ;;  %v1339_v15 = vmul.f32 %v5849_v55, %v5848_v38  ;;  %v1370_v25 = vadd.f32 %v2643_v22, %v5850_v26  ;;  %v5852_v31 = vld [vmem:[#allocation24_spill] sm:$0xff] }
 0x3b9   :  { %v1363_v19 = vadd.f32 %v1347_v28, %v1267_v63  ;;  %v1346_v1 = vmul.f32 %v1326_v51, %v1171_v56  ;;  %v1157_v14 = vadd.f32 %v1141_v32, %v1120_v3  ;;  %v1068_v6 = vadd.f32 %v1052_v40, %v1031_v43 }
 0x3ba   :  { %v1371_v21 = vadd.f32 %v2643_v22, %v5851_v5  ;;  %v1372_v62 = vadd.f32 %v2643_v22, %v5852_v31  ;;  %v5853_v48 = vmov 0.0|0.0   ;;  %v1373_v24 = vadd.f32 %v2643_v22, %v4971_v16 }
 0x3bb   :  { %v1362_v50 = vadd.f32 %v1346_v1, %v1266_v53  ;;  %v1332_v13 = vmul.f32 %v5847_v36, %v1157_v14  ;;  %v1259_v52 = vadd.f32 %v1243_v9, %v1068_v6  ;;  %v1374_v54 = vadd.f32 %v2643_v22, %v4977_v33 }
 0x3bc   :  { %v3332_v2 = vpack.c.bf16 %v1372_v62, %v1371_v21  ;;  %v1375_v63 = vadd.f32 %v2643_v22, %v5079_v11  ;;  %v1377_v18 = vadd.f32 %v2643_v22, %v5012_v10  ;;  %v1378_v29 = vadd.f32 %v2643_v22, %v5095_v57 }
 0x3bd   :  { %v1348_v35 = vadd.f32 %v1332_v13, %v1252_v46  ;;  %v1355_v4 = vadd.f32 %v1339_v15, %v1259_v52  ;;  %v3335_v61 = vpack.c.bf16 %v1374_v54, %v1373_v24  ;;  %v1380_v16 = vadd.f32 %v2643_v22, %v5028_v34 }
 0x3be   :  { %v1379_v33 = vadd.f32 %v2643_v22, %v5038_v0  ;;  %v3341_v23 = vpack.c.bf16 %v1378_v29, %v1377_v18  ;;  %v1381_v42 = vadd.f32 %v2643_v22, %v5081_v17  ;;  %v1382_v60 = vadd.f32 %v2643_v22, %v5115_v8  ;;  %v5165_v0 = vld [vmem:[%s5689_s5] sm:$0x1]  ;;  %v5854_v8 = vld [vmem:[#allocation11_spill] sm:$0xff] }
 0x3bf   :  { %v1369_v58 = vadd.f32 %v2643_v22, %v1348_v35  ;;  %v1376_v39 = vadd.f32 %v2643_v22, %v1355_v4  ;;  %v1384_v10 = vadd.f32 %v2643_v22, %v1363_v19  ;;  %v1383_v57 = vadd.f32 %v2643_v22, %v1362_v50 }
 0x3c0   :  { %v3344_v11 = vpack.c.bf16 %v1380_v16, %v1379_v33  ;;  %v3347_v49 = vpack.c.bf16 %v1382_v60, %v1381_v42 }
 0x3c1   :  { %v3329_v12 = vpack.c.bf16 %v1370_v25, %v1369_v58  ;;  %v3338_v37 = vpack.c.bf16 %v1376_v39, %v1375_v63  ;;  %v3350_v34 = vpack.c.bf16 %v1384_v10, %v1383_v57 }
 0x3c3   :  { %3330 = vmatpush3.bf16.msra.mxu1 %v3329_v12 }
 0x3c4   :  { %3331 = vmatprep.subr.bf16.mxu1 %v5853_v48 }
 0x3c7   :  { %3333 = vmatpush3.bf16.msra.mxu1 %v3332_v2 }
 0x3c8   :  { %3334 = vmatprep.subr.bf16.mxu1 %v5853_v48 }
 0x3cb   :  { %3336 = vmatpush3.bf16.msra.mxu1 %v3335_v61  ;;  %v1771_v61 = vld [vmem:[#allocation5 + $0x8] sm:$0xff] }
 0x3cc   :  { %3337 = vmatprep.subr.bf16.mxu1 %v5853_v48 }
 0x3cf   :  { %3339 = vmatpush3.bf16.msra.mxu1 %v3338_v37  ;;  %v1774_v37 = vld [vmem:[#allocation5 + $0x20] sm:$0xff] }
 0x3d0   :  { %3340 = vmatprep.subr.bf16.mxu1 %v5853_v48 }
 0x3d3   :  { %3342 = vmatpush3.bf16.msra.mxu1 %v3341_v23  ;;  %v1776_v23 = vld [vmem:[#allocation5 + $0x30] sm:$0xff] }
 0x3d4   :  { %3343 = vmatprep.subr.bf16.mxu1 %v5853_v48 }
 0x3d7   :  { %3345 = vmatpush3.bf16.msra.mxu1 %v3344_v11  ;;  %v1777_v11 = vld [vmem:[#allocation5 + $0x38] sm:$0xff] }
 0x3d8   :  { %3346 = vmatprep.subr.bf16.mxu1 %v5853_v48 }
 0x3db   :  { %3348 = vmatpush3.bf16.msra.mxu1 %v3347_v49  ;;  %v1780_v49 = vld [vmem:[#allocation5 + $0x50] sm:$0xff] }
 0x3dc   :  { %3349 = vmatprep.subr.bf16.mxu1 %v5853_v48 }
 0x3df   :  { %3351 = vmatpush3.bf16.msra.mxu1 %v3350_v34  ;;  %v1781_v34 = vld [vmem:[#allocation5 + $0x58] sm:$0xff] }
 0x3e2   :  { %3024 = vmatmul.mubr.f32.vlgmr.msra.gmra.mrb[2].mxu1 %v5165_v0 }
 0x4b5   :  { %v1453_v17 = vpop.f32.mrb[2].mxu1 }
 0x4b6   :  { %v1460_v27 = vrot.slane %v1453_v17, %v5854_v8  ;;  %v3025_v47 = vpop.f32.mrb[3].mxu1  ;;  %v3396_v17 = vpack.c.bf16 %v1781_v34, %v1780_v49 }
 0x4b7   :  { %v1783_v47 = vld [vmem:[#allocation5 + $0x68] sm:$0xff] }
 0x4b8   :  { %v5169_v59 = vsub.f32 %v1369_v58, %v1460_v27  ;;  %v5171_v53 = vsub.f32 %v1370_v25, %v1460_v27  ;;  %v5173_v51 = vsub.f32 %v1371_v21, %v1460_v27  ;;  %v5175_v41 = vsub.f32 %v1372_v62, %v1460_v27 }
 0x4b9   :  { %v5181_v20 = vsub.f32 %v1373_v24, %v1460_v27  ;;  %v5187_v3 = vsub.f32 %v1374_v54, %v1460_v27  ;;  %v5190_v40 = vsub.f32 %v1375_v63, %v1460_v27  ;;  %v5192_v45 = vsub.f32 %v1376_v39, %v1460_v27  ;;  %v1770_v54 = vld [vmem:[#allocation5] sm:$0xff]  ;;  %v1772_v63 = vld [vmem:[#allocation5 + $0x10] sm:$0xff] }
 0x4ba   :  { %v1477_v44 = vmul.f32 %v5169_v59, %v5169_v59  ;;  %v1478_v7 = vmul.f32 %v5171_v53, %v5171_v53  ;;  %v1479_v28 = vmul.f32 %v5173_v51, %v5173_v51  ;;  %v1480_v56 = vmul.f32 %v5175_v41, %v5175_v41 }
 0x4bb   :  { %v1481_v43 = vmul.f32 %v5181_v20, %v5181_v20  ;;  %v1482_v30 = vmul.f32 %v5187_v3, %v5187_v3  ;;  %v1483_v9 = vmul.f32 %v5190_v40, %v5190_v40  ;;  %v1484_v19 = vmul.f32 %v5192_v45, %v5192_v45 }
 0x4bc   :  { %v3353_v32 = vpack.c.bf16 %v1478_v7, %v1477_v44  ;;  %v3356_v46 = vpack.c.bf16 %v1480_v56, %v1479_v28  ;;  %v5203_v14 = vsub.f32 %v1377_v18, %v1460_v27  ;;  %v5205_v22 = vsub.f32 %v1378_v29, %v1460_v27  ;;  %v1773_v18 = vld [vmem:[#allocation5 + $0x18] sm:$0xff]  ;;  %v1784_v7 = vld [vmem:[#allocation5 + $0x70] sm:$0xff] }
 0x4bd   :  { %v3359_v1 = vpack.c.bf16 %v1482_v30, %v1481_v43  ;;  %v3362_v6 = vpack.c.bf16 %v1484_v19, %v1483_v9  ;;  %v5212_v13 = vsub.f32 %v1379_v33, %v1460_v27  ;;  %v5214_v38 = vsub.f32 %v1380_v16, %v1460_v27  ;;  %v1775_v16 = vld [vmem:[#allocation5 + $0x28] sm:$0xff] }
 0x4be   :  { %3354 = vmatpush3.bf16.msra.mxu0 %v3353_v32  ;;  %v1485_v50 = vmul.f32 %v5203_v14, %v5203_v14  ;;  %v1486_v36 = vmul.f32 %v5205_v22, %v5205_v22  ;;  %v5217_v55 = vsub.f32 %v1381_v42, %v1460_v27  ;;  %v5223_v26 = vsub.f32 %v1382_v60, %v1460_v27  ;;  %v1778_v60 = vld [vmem:[#allocation5 + $0x40] sm:$0xff]  ;;  %v1785_v32 = vld [vmem:[#allocation5 + $0x78] sm:$0xff] }
 0x4bf   :  { %3355 = vmatprep.subr.bf16.mxu0 %v5853_v48  ;;  %v1487_v52 = vmul.f32 %v5212_v13, %v5212_v13  ;;  %v1488_v35 = vmul.f32 %v5214_v38, %v5214_v38  ;;  %v5226_v25 = vsub.f32 %v1383_v57, %v1460_v27  ;;  %v5232_v21 = vsub.f32 %v1384_v10, %v1460_v27  ;;  %v1779_v10 = vld [vmem:[#allocation5 + $0x48] sm:$0xff]  ;;  %v1782_v27 = vld [vmem:[#allocation5 + $0x60] sm:$0xff] }
 0x4c0   :  { %v3365_v15 = vpack.c.bf16 %v1486_v36, %v1485_v50  ;;  %v1489_v58 = vmul.f32 %v5217_v55, %v5217_v55  ;;  %v1490_v5 = vmul.f32 %v5223_v26, %v5223_v26  ;;  %v5855_v24 = vmov 0.0  }
 0x4c1   :  { %v3368_v4 = vpack.c.bf16 %v1488_v35, %v1487_v52  ;;  %v1491_v62 = vmul.f32 %v5226_v25, %v5226_v25  ;;  %v1492_v12 = vmul.f32 %v5232_v21, %v5232_v21  ;;  %v3376_v39 = vpack.c.bf16 %v1771_v61, %v1770_v54  ;;  %v5258_v52 = vld [vmem:[#allocation2 + $0x5] ss:$0 sm:$0xff] }
 0x4c2   :  { %3357 = vmatpush3.bf16.msra.mxu0 %v3356_v46  ;;  %v3371_v31 = vpack.c.bf16 %v1490_v5, %v1489_v58  ;;  %v3380_v29 = vpack.c.bf16 %v1773_v18, %v1772_v63  ;;  %v3384_v33 = vpack.c.bf16 %v1775_v16, %v1774_v37  ;;  %v3388_v42 = vpack.c.bf16 %v1777_v11, %v1776_v23 }
 0x4c3   :  { %3358 = vmatprep.subr.bf16.mxu0 %v5853_v48  ;;  %v3374_v2 = vpack.c.bf16 %v1492_v12, %v1491_v62  ;;  %3377 = vmatprep.subr.bf16.mxu1 %v3376_v39  ;;  %v3392_v57 = vpack.c.bf16 %v1779_v10, %v1778_v60  ;;  %v3400_v44 = vpack.c.bf16 %v1783_v47, %v1782_v27 }
 0x4c4   :  { %3379 = vmatpush3.bf16.msra.mxu1 %v3376_v39  ;;  %v3404_v28 = vpack.c.bf16 %v1785_v32, %v1784_v7 }
 0x4c5   :  { %3381 = vmatprep.subr.bf16.mxu1 %v3380_v29 }
 0x4c6   :  { %3360 = vmatpush3.bf16.msra.mxu0 %v3359_v1  ;;  %v5248_v1 = vld [vmem:[#allocation2 + $0x4] ss:$0 sm:$0xff] }
 0x4c7   :  { %3361 = vmatprep.subr.bf16.mxu0 %v5853_v48 }
 0x4c8   :  { %3383 = vmatpush3.bf16.msra.mxu1 %v3380_v29 }
 0x4c9   :  { %3385 = vmatprep.subr.bf16.mxu1 %v3384_v33 }
 0x4ca   :  { %3363 = vmatpush3.bf16.msra.mxu0 %v3362_v6 }
 0x4cb   :  { %3364 = vmatprep.subr.bf16.mxu0 %v5853_v48 }
 0x4cc   :  { %3387 = vmatpush3.bf16.msra.mxu1 %v3384_v33 }
 0x4cd   :  { %3389 = vmatprep.subr.bf16.mxu1 %v3388_v42 }
 0x4ce   :  { %3366 = vmatpush3.bf16.msra.mxu0 %v3365_v15 }
 0x4cf   :  { %3367 = vmatprep.subr.bf16.mxu0 %v5853_v48 }
 0x4d0   :  { %3391 = vmatpush3.bf16.msra.mxu1 %v3388_v42 }
 0x4d1   :  { %3393 = vmatprep.subr.bf16.mxu1 %v3392_v57 }
 0x4d2   :  { %3369 = vmatpush3.bf16.msra.mxu0 %v3368_v4 }
 0x4d3   :  { %3370 = vmatprep.subr.bf16.mxu0 %v5853_v48 }
 0x4d4   :  { %3395 = vmatpush3.bf16.msra.mxu1 %v3392_v57 }
 0x4d5   :  { %3397 = vmatprep.subr.bf16.mxu1 %v3396_v17 }
 0x4d6   :  { %3372 = vmatpush3.bf16.msra.mxu0 %v3371_v31 }
 0x4d7   :  { %3373 = vmatprep.subr.bf16.mxu0 %v5853_v48 }
 0x4d8   :  { %3399 = vmatpush3.bf16.msra.mxu1 %v3396_v17 }
 0x4d9   :  { %3401 = vmatprep.subr.bf16.mxu1 %v3400_v44 }
 0x4da   :  { %3375 = vmatpush3.bf16.msra.mxu0 %v3374_v2 }
 0x4db   :  { %3408 = vmatprep.subr.bf16.mxu0 %v5853_v48 }
 0x4dc   :  { %3403 = vmatpush3.bf16.msra.mxu1 %v3400_v44 }
 0x4dd   :  { %3059 = vmatmul.mubr.f32.vlgmr.msra.gmra.mrb[18].mxu0 %v5165_v0  ;;  %3405 = vmatprep.subr.bf16.mxu1 %v3404_v28 }
 0x4de   :  { %3149 = vmatprep.mubr.msk.f32.mxu0 %vm3676_vm0, %v5855_v24 }
 0x4e0   :  { %3407 = vmatpush3.bf16.msra.mxu1 %v3404_v28 }
 0x4e1   :  { %3432 = vmatprep.subr.bf16.mxu1 %v5853_v48 }
 0x5b0   :  { %v1559_v56 = vpop.f32.mrb[18].mxu0 }
 0x5b1   :  { %v1563_v46 = vmax.f32 %v1559_v56, 0.0  ;;  %v3060_v43 = vpop.f32.mrb[19].mxu0 }
 0x5b3   :  { %v1564_v30 = vadd.f32 1e-05, %v1563_v46 }
 0x5b5   :  { %3562 = vrsqrt.f32 %v1564_v30 }
 0x5bf   :  { %v3563_v9 = vpop.eup %3562 }
 0x5c0   :  { %v5246_v19 = vrot.slane %v3563_v9, %v5854_v8 }
 0x5c2   :  { %v1570_v6 = vmul.f32 %v5246_v19, %v5169_v59  ;;  %v1571_v50 = vmul.f32 %v5246_v19, %v5171_v53  ;;  %v1572_v36 = vmul.f32 %v5246_v19, %v5173_v51  ;;  %v1573_v15 = vmul.f32 %v5246_v19, %v5175_v41 }
 0x5c3   :  { %v1574_v35 = vmul.f32 %v5246_v19, %v5181_v20  ;;  %v1575_v4 = vmul.f32 %v5246_v19, %v5187_v3  ;;  %v1576_v59 = vmul.f32 %v5246_v19, %v5190_v40  ;;  %v1577_v53 = vmul.f32 %v5246_v19, %v5192_v45 }
 0x5c4   :  { %v1590_v58 = vmul.f32 %v5248_v1, %v1570_v6  ;;  %v1591_v51 = vmul.f32 %v5248_v1, %v1571_v50  ;;  %v1592_v41 = vmul.f32 %v5248_v1, %v1572_v36  ;;  %v1593_v5 = vmul.f32 %v5248_v1, %v1573_v15 }
 0x5c5   :  { %v1594_v31 = vmul.f32 %v5248_v1, %v1574_v35  ;;  %v1595_v20 = vmul.f32 %v5248_v1, %v1575_v4  ;;  %v1596_v45 = vmul.f32 %v5248_v1, %v1576_v59  ;;  %v1597_v2 = vmul.f32 %v5248_v1, %v1577_v53 }
 0x5c6   :  { %v1610_v3 = vadd.f32 %v5258_v52, %v1590_v58  ;;  %v5276_v62 = vadd.f32 %v5258_v52, %v1591_v51  ;;  %v5279_v40 = vadd.f32 %v5258_v52, %v1592_v41  ;;  %v5283_v12 = vadd.f32 %v5258_v52, %v1593_v5 }
 0x5c7   :  { %v5287_v61 = vadd.f32 %v5258_v52, %v1594_v31  ;;  %v5291_v39 = vadd.f32 %v5258_v52, %v1595_v20  ;;  %v5295_v37 = vadd.f32 %v5258_v52, %v1596_v45  ;;  %v5300_v11 = vadd.f32 %v5258_v52, %v1597_v2 }
 0x5c8   :  { %v1658_v54 = vmul.f32 0.044715, %v1610_v3  ;;  %v1659_v63 = vmul.f32 0.044715, %v5276_v62  ;;  %v1660_v29 = vmul.f32 0.044715, %v5279_v40  ;;  %v1578_v51 = vmul.f32 %v5246_v19, %v5203_v14 }
 0x5c9   :  { %v1642_v16 = vmul.f32 0.7978846, %v1610_v3  ;;  %v1661_v23 = vmul.f32 0.044715, %v5283_v12  ;;  %v1643_v60 = vmul.f32 0.7978846, %v5276_v62  ;;  %v1579_v5 = vmul.f32 %v5246_v19, %v5205_v22 }
 0x5ca   :  { %v1674_v18 = vmul.f32 %v1658_v54, %v1610_v3  ;;  %v1675_v33 = vmul.f32 %v1659_v63, %v5276_v62  ;;  %v1676_v10 = vmul.f32 %v1660_v29, %v5279_v40  ;;  %v1662_v57 = vmul.f32 0.044715, %v5287_v61 }
 0x5cb   :  { %v1644_v34 = vmul.f32 0.7978846, %v5279_v40  ;;  %v1677_v17 = vmul.f32 %v1661_v23, %v5283_v12  ;;  %v1663_v27 = vmul.f32 0.044715, %v5291_v39  ;;  %v1645_v7 = vmul.f32 0.7978846, %v5283_v12 }
 0x5cc   :  { %v1690_v42 = vadd.f32 1.0, %v1674_v18  ;;  %v1691_v49 = vadd.f32 1.0, %v1675_v33  ;;  %v1692_v44 = vadd.f32 1.0, %v1676_v10  ;;  %v1678_v32 = vmul.f32 %v1662_v57, %v5287_v61 }
 0x5cd   :  { %v1693_v56 = vadd.f32 1.0, %v1677_v17  ;;  %v1646_v46 = vmul.f32 0.7978846, %v5287_v61  ;;  %v1679_v43 = vmul.f32 %v1663_v27, %v5291_v39  ;;  %v1664_v6 = vmul.f32 0.044715, %v5295_v37 }
 0x5ce   :  { %v1706_v47 = vmul.f32 %v1690_v42, %v1642_v16  ;;  %v1707_v28 = vmul.f32 %v1691_v49, %v1643_v60  ;;  %v1708_v30 = vmul.f32 %v1692_v44, %v1644_v34  ;;  %v1694_v9 = vadd.f32 1.0, %v1678_v32 }
 0x5cf   :  { %v1709_v50 = vmul.f32 %v1693_v56, %v1645_v7  ;;  %v1647_v36 = vmul.f32 0.7978846, %v5291_v39  ;;  %v1695_v15 = vadd.f32 1.0, %v1679_v43  ;;  %v1648_v4 = vmul.f32 0.7978846, %v5295_v37 }
 0x5d0   :  { %3564 = vtanh.f32 %v1706_v47  ;;  %v1710_v35 = vmul.f32 %v1694_v9, %v1646_v46  ;;  %v1680_v59 = vmul.f32 %v1664_v6, %v5295_v37  ;;  %v1665_v58 = vmul.f32 0.044715, %v5300_v11 }
 0x5d1   :  { %3566 = vtanh.f32 %v1707_v28  ;;  %v1711_v53 = vmul.f32 %v1695_v15, %v1647_v36  ;;  %v1580_v31 = vmul.f32 %v5246_v19, %v5212_v13  ;;  %v1598_v45 = vmul.f32 %v5248_v1, %v1578_v51 }
 0x5d2   :  { %3568 = vtanh.f32 %v1708_v30  ;;  %v1696_v41 = vadd.f32 1.0, %v1680_v59  ;;  %v1681_v20 = vmul.f32 %v1665_v58, %v5300_v11  ;;  %v1581_v2 = vmul.f32 %v5246_v19, %v5214_v38 }
 0x5d3   :  { %3570 = vtanh.f32 %v1709_v50  ;;  %v1599_v63 = vmul.f32 %v5248_v1, %v1579_v5  ;;  %v1600_v14 = vmul.f32 %v5248_v1, %v1580_v31  ;;  %v1582_v18 = vmul.f32 %v5246_v19, %v5217_v55 }
 0x5d4   :  { %3572 = vtanh.f32 %v1710_v35  ;;  %v1712_v54 = vmul.f32 %v1696_v41, %v1648_v4  ;;  %v1626_v22 = vmul.f32 0.5, %v1610_v3  ;;  %v1649_v29 = vmul.f32 0.7978846, %v5300_v11 }
 0x5d5   :  { %3574 = vtanh.f32 %v1711_v53  ;;  %v1697_v13 = vadd.f32 1.0, %v1681_v20  ;;  %v5333_v16 = vadd.f32 %v5258_v52, %v1598_v45  ;;  %v1627_v33 = vmul.f32 0.5, %v5276_v62 }
 0x5d6   :  { %3576 = vtanh.f32 %v1712_v54  ;;  %v5337_v38 = vadd.f32 %v5258_v52, %v1599_v63  ;;  %v5340_v23 = vadd.f32 %v5258_v52, %v1600_v14  ;;  %v1628_v42 = vmul.f32 0.5, %v5279_v40 }
 0x5d7   :  { %v1713_v60 = vmul.f32 %v1697_v13, %v1649_v29  ;;  %v1666_v55 = vmul.f32 0.044715, %v5333_v16  ;;  %v1601_v3 = vmul.f32 %v5248_v1, %v1581_v2  ;;  %v1629_v57 = vmul.f32 0.5, %v5283_v12 }
 0x5d8   :  { %v1630_v49 = vmul.f32 0.5, %v5287_v61  ;;  %v1667_v62 = vmul.f32 0.044715, %v5337_v38  ;;  %v1602_v34 = vmul.f32 %v5248_v1, %v1582_v18  ;;  %v1650_v47 = vmul.f32 0.7978846, %v5333_v16 }
 0x5d9   :  { %3578 = vtanh.f32 %v1713_v60  ;;  %v1682_v40 = vmul.f32 %v1666_v55, %v5333_v16  ;;  %v1651_v32 = vmul.f32 0.7978846, %v5337_v38  ;;  %v1668_v12 = vmul.f32 0.044715, %v5340_v23 }
 0x5da   :  { %v3565_v10 = vpop.eup %3564  ;;  %v1683_v28 = vmul.f32 %v1667_v62, %v5337_v38  ;;  %v5355_v30 = vadd.f32 %v5258_v52, %v1601_v3  ;;  %v5359_v58 = vadd.f32 %v5258_v52, %v1602_v34  ;;  %v1652_v41 = vmul.f32 0.7978846, %v5340_v23 }
 0x5db   :  { %v3567_v17 = vpop.eup %3566  ;;  %v1738_v27 = vadd.f32 1.0, %v3565_v10  ;;  %v1698_v43 = vadd.f32 1.0, %v1682_v40  ;;  %v1684_v15 = vmul.f32 %v1668_v12, %v5340_v23  ;;  %v1583_v31 = vmul.f32 %v5246_v19, %v5223_v26 }
 0x5dc   :  { %v3569_v44 = vpop.eup %3568  ;;  %v1739_v7 = vadd.f32 1.0, %v3567_v17  ;;  %v1699_v36 = vadd.f32 1.0, %v1683_v28  ;;  %v1631_v20 = vmul.f32 0.5, %v5291_v39  ;;  %v1669_v2 = vmul.f32 0.044715, %v5355_v30 }
 0x5dd   :  { %v3571_v61 = vpop.eup %3570  ;;  %v1754_v56 = vmul.f32 %v1738_v27, %v1626_v22  ;;  %v1740_v46 = vadd.f32 1.0, %v3569_v44  ;;  %v1714_v53 = vmul.f32 %v1698_v43, %v1650_v47  ;;  %v1700_v5 = vadd.f32 1.0, %v1684_v15 }
 0x5de   :  { %v3573_v9 = vpop.eup %3572  ;;  %v1755_v6 = vmul.f32 %v1739_v7, %v1627_v33  ;;  %v1741_v50 = vadd.f32 1.0, %v3571_v61  ;;  %v1715_v51 = vmul.f32 %v1699_v36, %v1651_v32  ;;  %v1632_v14 = vmul.f32 0.5, %v5295_v37 }
 0x5df   :  { %v3575_v35 = vpop.eup %3574  ;;  %3093 = vmatprep.mubr.f32.mxu1 %v1754_v56  ;;  %v1756_v4 = vmul.f32 %v1740_v46, %v1628_v42  ;;  %v1742_v59 = vadd.f32 1.0, %v3573_v9  ;;  %3580 = vtanh.f32 %v1714_v53  ;;  %v1716_v18 = vmul.f32 %v1700_v5, %v1652_v41 }
 0x5e0   :  { %3094 = vmatmul.mubr.f32.vlgmr.msra.gmra.mrb[4].mxu1 %v1755_v6  ;;  %v1743_v45 = vadd.f32 1.0, %v3575_v35  ;;  %v3577_v54 = vpop.eup %3576  ;;  %v1757_v63 = vmul.f32 %v1741_v50, %v1629_v57  ;;  %3582 = vtanh.f32 %v1715_v51  ;;  %v1685_v13 = vmul.f32 %v1669_v2, %v5355_v30 }
 0x5e1   :  { %3096 = vmatprep.mubr.f32.mxu1 %v1756_v4  ;;  %v1758_v22 = vmul.f32 %v1742_v59, %v1630_v49  ;;  %v1744_v29 = vadd.f32 1.0, %v3577_v54  ;;  %v1670_v33 = vmul.f32 0.044715, %v5359_v58  ;;  %3584 = vtanh.f32 %v1716_v18 }
 0x5e2   :  { %v1603_v26 = vmul.f32 %v5248_v1, %v1583_v31  ;;  %v1584_v39 = vmul.f32 %v5246_v19, %v5226_v25  ;;  %v1585_v42 = vmul.f32 %v5246_v19, %v5232_v21  ;;  %v1759_v37 = vmul.f32 %v1743_v45, %v1631_v20 }
 0x5e3   :  { %v3579_v60 = vpop.eup %3578  ;;  %v1653_v55 = vmul.f32 0.7978846, %v5355_v30  ;;  %v1701_v3 = vadd.f32 1.0, %v1685_v13  ;;  %v1686_v10 = vmul.f32 %v1670_v33, %v5359_v58  ;;  %v1760_v17 = vmul.f32 %v1744_v29, %v1632_v14 }
 0x5e4   :  { %3097 = vmatmul.mubr.f32.gmra.mrb[6].mxu1 %v1757_v63  ;;  %v1745_v57 = vadd.f32 1.0, %v3579_v60  ;;  %v1623_v49 = vadd.f32 %v5258_v52, %v1603_v26  ;;  %v1604_v62 = vmul.f32 %v5248_v1, %v1584_v39  ;;  %v1605_v34 = vmul.f32 %v5248_v1, %v1585_v42 }
 0x5e5   :  { %3099 = vmatprep.mubr.f32.mxu1 %v1758_v22  ;;  %v1717_v25 = vmul.f32 %v1701_v3, %v1653_v55  ;;  %v1654_v27 = vmul.f32 0.7978846, %v5359_v58  ;;  %v1702_v21 = vadd.f32 1.0, %v1686_v10  ;;  %v1633_v19 = vmul.f32 0.5, %v5300_v11 }
 0x5e6   :  { %v1671_v47 = vmul.f32 0.044715, %v1623_v49  ;;  %v1624_v44 = vadd.f32 %v5258_v52, %v1604_v62  ;;  %v1625_v7 = vadd.f32 %v5258_v52, %v1605_v34  ;;  %v1634_v56 = vmul.f32 0.5, %v5333_v16 }
 0x5e7   :  { %3586 = vtanh.f32 %v1717_v25  ;;  %v1718_v40 = vmul.f32 %v1702_v21, %v1654_v27  ;;  %v1761_v32 = vmul.f32 %v1745_v57, %v1633_v19  ;;  %v1655_v43 = vmul.f32 0.7978846, %v1623_v49 }
 0x5e8   :  { %3100 = vmatmul.mubr.f32.gmra.mrb[8].mxu1 %v1759_v37  ;;  %v1687_v28 = vmul.f32 %v1671_v47, %v1623_v49  ;;  %v1672_v1 = vmul.f32 0.044715, %v1624_v44  ;;  %v1635_v9 = vmul.f32 0.5, %v5337_v38  ;;  %v1673_v36 = vmul.f32 0.044715, %v1625_v7 }
 0x5e9   :  { %3102 = vmatprep.mubr.f32.mxu1 %v1760_v17  ;;  %v3581_v12 = vpop.eup %3580  ;;  %3588 = vtanh.f32 %v1718_v40  ;;  %v1636_v52 = vmul.f32 0.5, %v5340_v23  ;;  %v1656_v59 = vmul.f32 0.7978846, %v1624_v44  ;;  %v1657_v20 = vmul.f32 0.7978846, %v1625_v7 }
 0x5ea   :  { %v3583_v61 = vpop.eup %3582  ;;  %v1746_v46 = vadd.f32 1.0, %v3581_v12  ;;  %v1703_v11 = vadd.f32 1.0, %v1687_v28  ;;  %v1688_v50 = vmul.f32 %v1672_v1, %v1624_v44  ;;  %v1689_v5 = vmul.f32 %v1673_v36, %v1625_v7 }
 0x5eb   :  { %v1747_v6 = vadd.f32 1.0, %v3583_v61  ;;  %v3585_v15 = vpop.eup %3584  ;;  %v1637_v54 = vmul.f32 0.5, %v5355_v30  ;;  %v1638_v18 = vmul.f32 0.5, %v5359_v58  ;;  %v1639_v33 = vmul.f32 0.5, %v1623_v49  ;;  %v2646_v58 = vld [vmem:[%s5692_s8] ss:$0 sm:$0xff] }
 0x5ec   :  { %3103 = vmatmul.mubr.f32.gmra.mrb[10].mxu1 %v1761_v32  ;;  %v1762_v35 = vmul.f32 %v1746_v46, %v1634_v56  ;;  %v1719_v4 = vmul.f32 %v1703_v11, %v1655_v43  ;;  %v1748_v51 = vadd.f32 1.0, %v3585_v15  ;;  %v1704_v41 = vadd.f32 1.0, %v1688_v50 }
 0x5ed   :  { %v1763_v53 = vmul.f32 %v1747_v6, %v1635_v9  ;;  %v1705_v38 = vadd.f32 1.0, %v1689_v5  ;;  %v1640_v60 = vmul.f32 0.5, %v1624_v44  ;;  %v1641_v3 = vmul.f32 0.5, %v1625_v7 }
 0x5ee   :  { %3105 = vmatprep.mubr.f32.mxu1 %v1762_v35  ;;  %3590 = vtanh.f32 %v1719_v4  ;;  %v1764_v16 = vmul.f32 %v1748_v51, %v1636_v52  ;;  %v1720_v31 = vmul.f32 %v1704_v41, %v1656_v59 }
 0x5ef   :  { %v1721_v2 = vmul.f32 %v1705_v38, %v1657_v20 }
 0x5f0   :  { %3106 = vmatmul.mubr.f32.gmra.mrb[12].mxu1 %v1763_v53  ;;  %3592 = vtanh.f32 %v1720_v31 }
 0x5f1   :  { %v3587_v45 = vpop.eup %3586  ;;  %3108 = vmatprep.mubr.f32.mxu1 %v1764_v16  ;;  %3594 = vtanh.f32 %v1721_v2 }
 0x5f2   :  { %v1749_v23 = vadd.f32 1.0, %v3587_v45 }
 0x5f3   :  { %v3589_v63 = vpop.eup %3588 }
 0x5f4   :  { %v1765_v14 = vmul.f32 %v1749_v23, %v1637_v54  ;;  %v1750_v22 = vadd.f32 1.0, %v3589_v63 }
 0x5f6   :  { %3109 = vmatmul.mubr.f32.gmra.mrb[14].mxu1 %v1765_v14  ;;  %v1766_v29 = vmul.f32 %v1750_v22, %v1638_v18 }
 0x5f8   :  { %v3591_v13 = vpop.eup %3590  ;;  %3111 = vmatprep.mubr.f32.mxu1 %v1766_v29 }
 0x5f9   :  { %v1751_v26 = vadd.f32 1.0, %v3591_v13 }
 0x5fa   :  { %v3593_v39 = vpop.eup %3592 }
 0x5fb   :  { %v1767_v42 = vmul.f32 %v1751_v26, %v1639_v33  ;;  %v1752_v37 = vadd.f32 1.0, %v3593_v39  ;;  %v3595_v55 = vpop.eup %3594 }
 0x5fc   :  { %v1753_v10 = vadd.f32 1.0, %v3595_v55 }
 0x5fd   :  { %3112 = vmatmul.mubr.f32.gmra.mrb[16].mxu1 %v1767_v42  ;;  %v1768_v30 = vmul.f32 %v1752_v37, %v1640_v60 }
 0x5fe   :  { %v1769_v57 = vmul.f32 %v1753_v10, %v1641_v3 }
 0x5ff   :  { %3114 = vmatprep.mubr.f32.mxu1 %v1768_v30 }
 0x601   :  { %3115 = vmatmul.mubr.f32.gmra.mrb[18].mxu1 %v1769_v57 }
 0x602   :  { %3184 = vmatprep.mubr.msk.f32.mxu1 %vm3676_vm0, %v5855_v24 }
 0x6b3   :  { %v3095_v49 = vpop.f32.mrb[4].mxu1 }
 0x6b4   :  { %v1852_v62 = vpop.f32.mrb[5].mxu1  ;;  %v2028_v34 = vadd.f32 %v3095_v49, %v2646_v58 }
 0x6b5   :  { %v2027_v17 = vadd.f32 %v2646_v58, %v1852_v62 }
 0x6b7   :  { %v3098_v25 = vpop.f32.mrb[6].mxu1  ;;  %v3409_v27 = vpack.c.bf16 %v2028_v34, %v2027_v17 }
 0x6b8   :  { %v1862_v21 = vpop.f32.mrb[7].mxu1  ;;  %v2030_v19 = vadd.f32 %v3098_v25, %v2646_v58 }
 0x6b9   :  { %3410 = vmatpush3.bf16.msra.mxu0 %v3409_v27  ;;  %v2029_v47 = vadd.f32 %v2646_v58, %v1862_v21 }
 0x6ba   :  { %3411 = vmatprep.subr.bf16.mxu0 %v5853_v48 }
 0x6bb   :  { %v3101_v40 = vpop.f32.mrb[8].mxu1  ;;  %v3412_v44 = vpack.c.bf16 %v2030_v19, %v2029_v47 }
 0x6bc   :  { %v1872_v7 = vpop.f32.mrb[9].mxu1  ;;  %v2032_v32 = vadd.f32 %v3101_v40, %v2646_v58 }
 0x6bd   :  { %3413 = vmatpush3.bf16.msra.mxu0 %v3412_v44  ;;  %v2031_v28 = vadd.f32 %v2646_v58, %v1872_v7 }
 0x6be   :  { %3414 = vmatprep.subr.bf16.mxu0 %v5853_v48 }
 0x6bf   :  { %v3104_v12 = vpop.f32.mrb[10].mxu1  ;;  %v3415_v1 = vpack.c.bf16 %v2032_v32, %v2031_v28 }
 0x6c0   :  { %v1882_v61 = vpop.f32.mrb[11].mxu1  ;;  %v2034_v56 = vadd.f32 %v3104_v12, %v2646_v58 }
 0x6c1   :  { %3416 = vmatpush3.bf16.msra.mxu0 %v3415_v1  ;;  %v2033_v46 = vadd.f32 %v2646_v58, %v1882_v61 }
 0x6c2   :  { %3417 = vmatprep.subr.bf16.mxu0 %v5853_v48 }
 0x6c3   :  { %v3418_v43 = vpack.c.bf16 %v2034_v56, %v2033_v46  ;;  %v3107_v11 = vpop.f32.mrb[12].mxu1 }
 0x6c4   :  { %v1892_v9 = vpop.f32.mrb[13].mxu1  ;;  %v2036_v6 = vadd.f32 %v3107_v11, %v2646_v58 }
 0x6c5   :  { %3419 = vmatpush3.bf16.msra.mxu0 %v3418_v43  ;;  %v2035_v50 = vadd.f32 %v2646_v58, %v1892_v9 }
 0x6c6   :  { %3420 = vmatprep.subr.bf16.mxu0 %v5853_v48 }
 0x6c7   :  { %v3421_v36 = vpack.c.bf16 %v2036_v6, %v2035_v50 }
 0x6c9   :  { %3422 = vmatpush3.bf16.msra.mxu0 %v3421_v36  ;;  %v3110_v15 = vpop.f32.mrb[14].mxu1 }
 0x6ca   :  { %3423 = vmatprep.subr.bf16.mxu0 %v5853_v48  ;;  %v1902_v35 = vpop.f32.mrb[15].mxu1  ;;  %v2038_v52 = vadd.f32 %v3110_v15, %v2646_v58 }
 0x6cb   :  { %v2037_v4 = vadd.f32 %v2646_v58, %v1902_v35 }
 0x6cd   :  { %v3424_v59 = vpack.c.bf16 %v2038_v52, %v2037_v4 }
 0x6cf   :  { %3425 = vmatpush3.bf16.msra.mxu0 %v3424_v59 }
 0x6d0   :  { %v3113_v53 = vpop.f32.mrb[16].mxu1  ;;  %3426 = vmatprep.subr.bf16.mxu0 %v5853_v48 }
 0x6d1   :  { %v1912_v51 = vpop.f32.mrb[17].mxu1  ;;  %v2040_v41 = vadd.f32 %v3113_v53, %v2646_v58 }
 0x6d2   :  { %v2039_v5 = vadd.f32 %v2646_v58, %v1912_v51 }
 0x6d4   :  { %v3427_v16 = vpack.c.bf16 %v2040_v41, %v2039_v5  ;;  %v3116_v31 = vpop.f32.mrb[18].mxu1 }
 0x6d5   :  { %v1922_v20 = vpop.f32.mrb[19].mxu1  ;;  %v2042_v38 = vadd.f32 %v3116_v31, %v2646_v58 }
 0x6d6   :  { %3428 = vmatpush3.bf16.msra.mxu0 %v3427_v16  ;;  %v2041_v45 = vadd.f32 %v2646_v58, %v1922_v20 }
 0x6d7   :  { %3429 = vmatprep.subr.bf16.mxu0 %v5853_v48 }
 0x6d8   :  { %v3430_v2 = vpack.c.bf16 %v2042_v38, %v2041_v45 }
 0x6da   :  { %3431 = vmatpush3.bf16.msra.mxu0 %v3430_v2 }
 0x6db   :  { %3456 = vmatprep.subr.bf16.mxu0 %v5853_v48 }
 0x6dd   :  { %3150 = vmatmul.mubr.f32.vlgmr.msra.gmra.mrb[20].mxu0 %v5165_v0 }
 0x6de   :  { %3219 = vmatprep.mubr.msk.f32.mxu0 %vm3676_vm0, %v5855_v24 }
 0x7b0   :  { %v2111_v54 = vpop.f32.mrb[20].mxu0 }
 0x7b1   :  { %v2118_v23 = vrot.slane %v2111_v54, %v5854_v8  ;;  %v3151_v63 = vpop.f32.mrb[21].mxu0 }
 0x7b3   :  { %v5405_v14 = vsub.f32 %v2027_v17, %v2118_v23  ;;  %v5407_v18 = vsub.f32 %v2028_v34, %v2118_v23  ;;  %v5409_v22 = vsub.f32 %v2029_v47, %v2118_v23  ;;  %v5411_v29 = vsub.f32 %v2030_v19, %v2118_v23 }
 0x7b4   :  { %v5417_v26 = vsub.f32 %v2031_v28, %v2118_v23  ;;  %v2124_v60 = vsub.f32 %v2032_v32, %v2118_v23  ;;  %v5424_v37 = vsub.f32 %v2033_v46, %v2118_v23  ;;  %v5426_v55 = vsub.f32 %v2034_v56, %v2118_v23 }
 0x7b5   :  { %v2135_v13 = vmul.f32 %v5405_v14, %v5405_v14  ;;  %v2136_v33 = vmul.f32 %v5407_v18, %v5407_v18  ;;  %v2137_v39 = vmul.f32 %v5409_v22, %v5409_v22  ;;  %v2138_v42 = vmul.f32 %v5411_v29, %v5411_v29 }
 0x7b6   :  { %v2139_v3 = vmul.f32 %v5417_v26, %v5417_v26  ;;  %v2140_v10 = vmul.f32 %v2124_v60, %v2124_v60  ;;  %v2141_v57 = vmul.f32 %v5424_v37, %v5424_v37  ;;  %v2142_v58 = vmul.f32 %v5426_v55, %v5426_v55 }
 0x7b7   :  { %v3433_v24 = vpack.c.bf16 %v2136_v33, %v2135_v13  ;;  %v3436_v30 = vpack.c.bf16 %v2138_v42, %v2137_v39  ;;  %v5435_v62 = vsub.f32 %v2035_v50, %v2118_v23  ;;  %v5437_v34 = vsub.f32 %v2036_v6, %v2118_v23 }
 0x7b8   :  { %v3439_v49 = vpack.c.bf16 %v2140_v10, %v2139_v3  ;;  %v3442_v17 = vpack.c.bf16 %v2142_v58, %v2141_v57  ;;  %v5444_v21 = vsub.f32 %v2037_v4, %v2118_v23  ;;  %v5446_v19 = vsub.f32 %v2038_v52, %v2118_v23  ;;  %v5477_v4 = vld [vmem:[%s5692_s8 + $0x1] ss:$0 sm:$0xff] }
 0x7b9   :  { %3434 = vmatpush3.bf16.msra.mxu1 %v3433_v24  ;;  %v2143_v25 = vmul.f32 %v5435_v62, %v5435_v62  ;;  %v2144_v27 = vmul.f32 %v5437_v34, %v5437_v34  ;;  %v5449_v47 = vsub.f32 %v2039_v5, %v2118_v23  ;;  %v5455_v32 = vsub.f32 %v2040_v41, %v2118_v23  ;;  %v5486_v41 = vld [vmem:[%s5692_s8 + $0x2] ss:$0 sm:$0xff] }
 0x7ba   :  { %3435 = vmatprep.subr.bf16.mxu1 %v5853_v48  ;;  %v2145_v44 = vmul.f32 %v5444_v21, %v5444_v21  ;;  %v2146_v7 = vmul.f32 %v5446_v19, %v5446_v19  ;;  %v5458_v28 = vsub.f32 %v2041_v45, %v2118_v23  ;;  %v5464_v56 = vsub.f32 %v2042_v38, %v2118_v23 }
 0x7bb   :  { %v3445_v40 = vpack.c.bf16 %v2144_v27, %v2143_v25  ;;  %v2147_v1 = vmul.f32 %v5449_v47, %v5449_v47  ;;  %v2148_v61 = vmul.f32 %v5455_v32, %v5455_v32 }
 0x7bc   :  { %v3448_v12 = vpack.c.bf16 %v2146_v7, %v2145_v44  ;;  %v2149_v43 = vmul.f32 %v5458_v28, %v5458_v28  ;;  %v2150_v11 = vmul.f32 %v5464_v56, %v5464_v56 }
 0x7bd   :  { %3437 = vmatpush3.bf16.msra.mxu1 %v3436_v30  ;;  %v3451_v46 = vpack.c.bf16 %v2148_v61, %v2147_v1 }
 0x7be   :  { %3438 = vmatprep.subr.bf16.mxu1 %v5853_v48  ;;  %v3454_v9 = vpack.c.bf16 %v2150_v11, %v2149_v43 }
 0x7c1   :  { %3440 = vmatpush3.bf16.msra.mxu1 %v3439_v49 }
 0x7c2   :  { %3441 = vmatprep.subr.bf16.mxu1 %v5853_v48 }
 0x7c5   :  { %3443 = vmatpush3.bf16.msra.mxu1 %v3442_v17 }
 0x7c6   :  { %3444 = vmatprep.subr.bf16.mxu1 %v5853_v48 }
 0x7c9   :  { %3446 = vmatpush3.bf16.msra.mxu1 %v3445_v40 }
 0x7ca   :  { %3447 = vmatprep.subr.bf16.mxu1 %v5853_v48 }
 0x7cd   :  { %3449 = vmatpush3.bf16.msra.mxu1 %v3448_v12 }
 0x7ce   :  { %3450 = vmatprep.subr.bf16.mxu1 %v5853_v48 }
 0x7d1   :  { %3452 = vmatpush3.bf16.msra.mxu1 %v3451_v46 }
 0x7d2   :  { %3453 = vmatprep.subr.bf16.mxu1 %v5853_v48 }
 0x7d5   :  { %3455 = vmatpush3.bf16.msra.mxu1 %v3454_v9 }
 0x7d8   :  { %3185 = vmatmul.mubr.f32.vlgmr.msra.gmra.mrb[20].mxu1 %v5165_v0 }
 0x8ab   :  { %v2217_v6 = vpop.f32.mrb[20].mxu1 }
 0x8ac   :  { %v2221_v50 = vmax.f32 %v2217_v6, 0.0  ;;  %v3186_v36 = vpop.f32.mrb[21].mxu1 }
 0x8ad   :  { %v2355_v36 = vld [vmem:[%s5690_s6] sm:$0xff] }
 0x8ae   :  { %v2222_v15 = vadd.f32 1e-05, %v2221_v50  ;;  %v2284_v50 = vld [vmem:[%s5689_s5] sm:$0xff]  ;;  %3224 = vmatprep.mubr.msk.f32.mxu1 %vm2371_vm3, %v2355_v36 }
 0x8b0   :  { %3596 = vrsqrt.f32 %v2222_v15 }
 0x8ba   :  { %v3597_v35 = vpop.eup %3596 }
 0x8bb   :  { %v2227_v52 = vrot.slane %v3597_v35, %v5854_v8 }
 0x8bd   :  { %v2228_v59 = vmul.f32 %v2227_v52, %v5405_v14  ;;  %v2229_v53 = vmul.f32 %v2227_v52, %v5407_v18  ;;  %v2230_v51 = vmul.f32 %v2227_v52, %v5409_v22  ;;  %v2231_v0 = vmul.f32 %v2227_v52, %v5411_v29 }
 0x8be   :  { %v2232_v8 = vmul.f32 %v2227_v52, %v5417_v26  ;;  %v2233_v5 = vmul.f32 %v2227_v52, %v2124_v60  ;;  %v2234_v63 = vmul.f32 %v2227_v52, %v5424_v37  ;;  %v2235_v14 = vmul.f32 %v2227_v52, %v5426_v55 }
 0x8bf   :  { %v2248_v16 = vmul.f32 %v5477_v4, %v2228_v59  ;;  %v2249_v31 = vmul.f32 %v5477_v4, %v2229_v53  ;;  %v2250_v20 = vmul.f32 %v5477_v4, %v2230_v51  ;;  %v2251_v38 = vmul.f32 %v5477_v4, %v2231_v0  ;;  %v2359_v59 = vld [vmem:[%s5690_s6 + $0x20] sm:$0xff]  ;;  %v2360_v53 = vld [vmem:[%s5690_s6 + $0x28] sm:$0xff]  ;;  %v2361_v51 = vld [vmem:[%s5690_s6 + $0x30] sm:$0xff] }
 0x8c0   :  { %v2252_v54 = vmul.f32 %v5477_v4, %v2232_v8  ;;  %v2253_v23 = vmul.f32 %v5477_v4, %v2233_v5  ;;  %v2254_v26 = vmul.f32 %v5477_v4, %v2234_v63  ;;  %v2255_v24 = vmul.f32 %v5477_v4, %v2235_v14  ;;  %v2362_v0 = vld [vmem:[%s5690_s6 + $0x38] sm:$0xff]  ;;  %v2364_v8 = vld [vmem:[%s5690_s6 + $0x48] sm:$0xff]  ;;  %v2365_v5 = vld [vmem:[%s5690_s6 + $0x50] sm:$0xff] }
 0x8c1   :  { %v5494_v45 = vadd.f32 %v5486_v41, %v2248_v16  ;;  %v5497_v2 = vadd.f32 %v5486_v41, %v2249_v31  ;;  %v5506_v22 = vadd.f32 %v5486_v41, %v2250_v20  ;;  %v5509_v29 = vadd.f32 %v5486_v41, %v2251_v38  ;;  %v2366_v16 = vld [vmem:[%s5690_s6 + $0x58] sm:$0xff]  ;;  %v2367_v31 = vld [vmem:[%s5690_s6 + $0x60] sm:$0xff]  ;;  %v2368_v20 = vld [vmem:[%s5690_s6 + $0x68] sm:$0xff] }
 0x8c2   :  { %v5513_v13 = vadd.f32 %v5486_v41, %v2252_v54  ;;  %v5516_v33 = vadd.f32 %v5486_v41, %v2253_v23  ;;  %v2236_v42 = vmul.f32 %v2227_v52, %v5435_v62  ;;  %v2237_v60 = vmul.f32 %v2227_v52, %v5437_v34  ;;  %v2369_v38 = vld [vmem:[%s5690_s6 + $0x70] sm:$0xff]  ;;  %v2370_v54 = vld [vmem:[%s5690_s6 + $0x78] sm:$0xff] }
 0x8c3   :  { %v3457_v18 = vpack.c.bf16 %v5497_v2, %v5494_v45  ;;  %v3460_v39 = vpack.c.bf16 %v5509_v29, %v5506_v22  ;;  %v5528_v55 = vadd.f32 %v5486_v41, %v2254_v26  ;;  %v5531_v30 = vadd.f32 %v5486_v41, %v2255_v24 }
 0x8c4   :  { %v3463_v37 = vpack.c.bf16 %v5516_v33, %v5513_v13  ;;  %v2256_v3 = vmul.f32 %v5477_v4, %v2236_v42  ;;  %v2257_v10 = vmul.f32 %v5477_v4, %v2237_v60  ;;  %v2238_v57 = vmul.f32 %v2227_v52, %v5444_v21 }
 0x8c5   :  { %3458 = vmatpush3.bf16.msra.mxu0 %v3457_v18  ;;  %v2239_v58 = vmul.f32 %v2227_v52, %v5446_v19  ;;  %v3466_v49 = vpack.c.bf16 %v5531_v30, %v5528_v55  ;;  %v2240_v62 = vmul.f32 %v2227_v52, %v5449_v47  ;;  %v2241_v34 = vmul.f32 %v2227_v52, %v5455_v32 }
 0x8c6   :  { %3459 = vmatprep.subr.bf16.mxu0 %v5853_v48  ;;  %v5543_v17 = vadd.f32 %v5486_v41, %v2256_v3  ;;  %v5546_v25 = vadd.f32 %v5486_v41, %v2257_v10  ;;  %v2258_v27 = vmul.f32 %v5477_v4, %v2238_v57  ;;  %v2242_v40 = vmul.f32 %v2227_v52, %v5458_v28 }
 0x8c7   :  { %v2259_v21 = vmul.f32 %v5477_v4, %v2239_v58  ;;  %v2260_v19 = vmul.f32 %v5477_v4, %v2240_v62  ;;  %v2243_v47 = vmul.f32 %v2227_v52, %v5464_v56  ;;  %v2261_v12 = vmul.f32 %v5477_v4, %v2241_v34  ;;  %v2357_v52 = vld [vmem:[%s5690_s6 + $0x10] sm:$0xff] }
 0x8c8   :  { %v3469_v44 = vpack.c.bf16 %v5546_v25, %v5543_v17  ;;  %v5557_v7 = vadd.f32 %v5486_v41, %v2258_v27  ;;  %v2262_v1 = vmul.f32 %v5477_v4, %v2242_v40 }
 0x8c9   :  { %3461 = vmatpush3.bf16.msra.mxu0 %v3460_v39  ;;  %v5560_v32 = vadd.f32 %v5486_v41, %v2259_v21  ;;  %v5568_v61 = vadd.f32 %v5486_v41, %v2260_v19  ;;  %v5571_v56 = vadd.f32 %v5486_v41, %v2261_v12  ;;  %v2263_v46 = vmul.f32 %v5477_v4, %v2243_v47  ;;  %v2358_v4 = vld [vmem:[%s5690_s6 + $0x18] sm:$0xff] }
 0x8ca   :  { %3462 = vmatprep.subr.bf16.mxu0 %v5853_v48  ;;  %v5578_v11 = vadd.f32 %v5486_v41, %v2262_v1 }
 0x8cb   :  { %v3472_v28 = vpack.c.bf16 %v5560_v32, %v5557_v7  ;;  %v3475_v43 = vpack.c.bf16 %v5571_v56, %v5568_v61  ;;  %v5581_v9 = vadd.f32 %v5486_v41, %v2263_v46  ;;  %v2363_v41 = vld [vmem:[%s5690_s6 + $0x40] sm:$0xff] }
 0x8cd   :  { %3464 = vmatpush3.bf16.msra.mxu0 %v3463_v37  ;;  %v3478_v6 = vpack.c.bf16 %v5581_v9, %v5578_v11 }
 0x8ce   :  { %3465 = vmatprep.subr.bf16.mxu0 %v5853_v48 }
 0x8d1   :  { %3467 = vmatpush3.bf16.msra.mxu0 %v3466_v49 }
 0x8d2   :  { %3468 = vmatprep.subr.bf16.mxu0 %v5853_v48 }
 0x8d5   :  { %3470 = vmatpush3.bf16.msra.mxu0 %v3469_v44 }
 0x8d6   :  { %3471 = vmatprep.subr.bf16.mxu0 %v5853_v48 }
 0x8d9   :  { %3473 = vmatpush3.bf16.msra.mxu0 %v3472_v28 }
 0x8da   :  { %3474 = vmatprep.subr.bf16.mxu0 %v5853_v48 }
 0x8dd   :  { %3476 = vmatpush3.bf16.msra.mxu0 %v3475_v43 }
 0x8de   :  { %3477 = vmatprep.subr.bf16.mxu0 %v5853_v48  ;;  %v2356_v48 = vld [vmem:[%s5690_s6 + $0x8] sm:$0xff]  ;;  %s3682_s6 = smov [#allocation7]  }
 0x8df   :  { %s2618_s27 = sshll.u32 %s3682_s6, 4  ;;  %s2619_s27 = int_to_ptr.vmem [resolvable:$true] %s2618_s27 }
 0x8e0   :  { %s3643_s5 = scalar_lea.vmem %s2619_s27, 2048  ;;  %p3648_p3 = scmp.lt.s32.totalorder %s2619_s27, %s2619_s27 }
 0x8e1   :  { %3479 = vmatpush3.bf16.msra.mxu0 %v3478_v6  ;;  %p3644_p2 = scmp.ne.s32.totalorder %s2619_s27, %s3643_s5  ;;  %p3649_p4 = scmp.lt.s32.totalorder %s3643_s5, %s3643_s5 }
 0x8e3   :  { %p3650_p5 = por %p3649_p4, %p3648_p3 }
 0x8e4   :  { %3220 = vmatmul.mubr.f32.vlgmr.msra.gmra.mrb[22].mxu0 %v2284_v50 }
 0x8e5   :  { %p3651_p6 = pnand %p3650_p5, %p3644_p2 }
 0x9b7   :  { %v2351_v15 = vpop.f32.mrb[22].mxu0 }
 0x9b8   :  { %v3221_v35 = vpop.f32.mrb[23].mxu0  ;;  %3222 = vmatprep.subr.mxu1 %v2351_v15 }
 0x9b9   :  { %3223 = vmatpush3.msra.mxu1 %v2351_v15 }
 0x9ba   :  { %3225 = vmatmul.mubr.msk.f32.vlgmr.msra.gmra.mrb[22].mxu1 %vm2371_vm3, %v2356_v48 }
 0x9bb   :  { %3227 = vmatprep.mubr.msk.f32.mxu1 %vm2371_vm3, %v2357_v52 }
 0x9be   :  { %3228 = vmatmul.mubr.msk.f32.gmra.mrb[24].mxu1 %vm2371_vm3, %v2358_v4 }
 0x9bf   :  { %3230 = vmatprep.mubr.msk.f32.mxu1 %vm2371_vm3, %v2359_v59 }
 0x9c2   :  { %3231 = vmatmul.mubr.msk.f32.gmra.mrb[26].mxu1 %vm2371_vm3, %v2360_v53 }
 0x9c3   :  { %3233 = vmatprep.mubr.msk.f32.mxu1 %vm2371_vm3, %v2361_v51 }
 0x9c6   :  { %3234 = vmatmul.mubr.msk.f32.gmra.mrb[28].mxu1 %vm2371_vm3, %v2362_v0 }
 0x9c7   :  { %3236 = vmatprep.mubr.msk.f32.mxu1 %vm2371_vm3, %v2363_v41 }
 0x9ca   :  { %3237 = vmatmul.mubr.msk.f32.gmra.mrb[30].mxu1 %vm2371_vm3, %v2364_v8 }
 0x9cb   :  { %3239 = vmatprep.mubr.msk.f32.mxu1 %vm2371_vm3, %v2365_v5 }
 0x9ce   :  { %3240 = vmatmul.mubr.msk.f32.gmra.mrb[32].mxu1 %vm2371_vm3, %v2366_v16 }
 0x9cf   :  { %3242 = vmatprep.mubr.msk.f32.mxu1 %vm2371_vm3, %v2367_v31 }
 0x9d2   :  { %3243 = vmatmul.mubr.msk.f32.gmra.mrb[34].mxu1 %vm2371_vm3, %v2368_v20 }
 0x9d3   :  { %3245 = vmatprep.mubr.msk.f32.mxu1 %vm2371_vm3, %v2369_v38 }
 0x9d6   :  { %3246 = vmatmul.mubr.msk.f32.gmra.mrb[36].mxu1 %vm2371_vm3, %v2370_v54 }
 0xa8d   :  { %v3226_v23 = vpop.f32.mrb[22].mxu1 }
 0xa8e   :  { %v2566_v63 = vadd.f32 %v3226_v23, %v5497_v2  ;;  %v2486_v14 = vpop.f32.mrb[23].mxu1 }
 0xa8f   :  { %v2565_v18 = vadd.f32 %v2486_v14, %v5494_v45 }
 0xa90   :  { %v2582_v26 = vmul.f32 0.5, %v2566_v63 }
 0xa91   :  { %v2581_v24 = vmul.f32 0.5, %v2565_v18  ;;  %v3229_v39 = vpop.f32.mrb[24].mxu1 }
 0xa92   :  { %2598 = vst [vmem:[#allocation7 + $0x8] sm:$0xff] %v2582_v26  ;;  %v2568_v42 = vadd.f32 %v3229_v39, %v5509_v29  ;;  %v2496_v60 = vpop.f32.mrb[25].mxu1 }
 0xa93   :  { %2597 = vst [vmem:[#allocation7] sm:$0xff] %v2581_v24  ;;  %v2567_v37 = vadd.f32 %v2496_v60, %v5506_v22 }
 0xa94   :  { %v2584_v3 = vmul.f32 0.5, %v2568_v42 }
 0xa95   :  { %v2583_v10 = vmul.f32 0.5, %v2567_v37  ;;  %v3232_v57 = vpop.f32.mrb[26].mxu1 }
 0xa96   :  { %2600 = vst [vmem:[#allocation7 + $0x18] sm:$0xff] %v2584_v3  ;;  %v2570_v58 = vadd.f32 %v3232_v57, %v5516_v33  ;;  %v2506_v2 = vpop.f32.mrb[27].mxu1 }
 0xa97   :  { %2599 = vst [vmem:[#allocation7 + $0x10] sm:$0xff] %v2583_v10  ;;  %v2569_v45 = vadd.f32 %v2506_v2, %v5513_v13 }
 0xa98   :  { %v2586_v49 = vmul.f32 0.5, %v2570_v58 }
 0xa99   :  { %v2585_v62 = vmul.f32 0.5, %v2569_v45  ;;  %v3235_v34 = vpop.f32.mrb[28].mxu1 }
 0xa9a   :  { %2602 = vst [vmem:[#allocation7 + $0x28] sm:$0xff] %v2586_v49  ;;  %v2572_v29 = vadd.f32 %v3235_v34, %v5531_v30  ;;  %v2516_v27 = vpop.f32.mrb[29].mxu1 }
 0xa9b   :  { %2601 = vst [vmem:[#allocation7 + $0x20] sm:$0xff] %v2585_v62  ;;  %v2571_v22 = vadd.f32 %v2516_v27, %v5528_v55 }
 0xa9c   :  { %v2588_v21 = vmul.f32 0.5, %v2572_v29 }
 0xa9d   :  { %v2587_v19 = vmul.f32 0.5, %v2571_v22  ;;  %v3238_v40 = vpop.f32.mrb[30].mxu1 }
 0xa9e   :  { %2604 = vst [vmem:[#allocation7 + $0x38] sm:$0xff] %v2588_v21  ;;  %v2574_v33 = vadd.f32 %v3238_v40, %v5546_v25  ;;  %v2526_v47 = vpop.f32.mrb[31].mxu1 }
 0xa9f   :  { %2603 = vst [vmem:[#allocation7 + $0x30] sm:$0xff] %v2587_v19  ;;  %v2573_v13 = vadd.f32 %v2526_v47, %v5543_v17 }
 0xaa0   :  { %v2590_v44 = vmul.f32 0.5, %v2574_v33 }
 0xaa1   :  { %v2589_v12 = vmul.f32 0.5, %v2573_v13  ;;  %v3241_v1 = vpop.f32.mrb[32].mxu1 }
 0xaa2   :  { %2606 = vst [vmem:[#allocation7 + $0x48] sm:$0xff] %v2590_v44  ;;  %v2576_v30 = vadd.f32 %v3241_v1, %v5560_v32  ;;  %v2536_v28 = vpop.f32.mrb[33].mxu1 }
 0xaa3   :  { %2605 = vst [vmem:[#allocation7 + $0x40] sm:$0xff] %v2589_v12  ;;  %v2575_v55 = vadd.f32 %v2536_v28, %v5557_v7 }
 0xaa4   :  { %v2592_v46 = vmul.f32 0.5, %v2576_v30 }
 0xaa5   :  { %v2591_v43 = vmul.f32 0.5, %v2575_v55  ;;  %v3244_v6 = vpop.f32.mrb[34].mxu1 }
 0xaa6   :  { %2608 = vst [vmem:[#allocation7 + $0x58] sm:$0xff] %v2592_v46  ;;  %v2578_v25 = vadd.f32 %v3244_v6, %v5571_v56  ;;  %v2546_v50 = vpop.f32.mrb[35].mxu1 }
 0xaa7   :  { %2607 = vst [vmem:[#allocation7 + $0x50] sm:$0xff] %v2591_v43  ;;  %v2577_v17 = vadd.f32 %v2546_v50, %v5568_v61 }
 0xaa8   :  { %v2594_v36 = vmul.f32 0.5, %v2578_v25 }
 0xaa9   :  { %v2593_v15 = vmul.f32 0.5, %v2577_v17  ;;  %v3247_v48 = vpop.f32.mrb[36].mxu1 }
 0xaaa   :  { %2610 = vst [vmem:[#allocation7 + $0x68] sm:$0xff] %v2594_v36  ;;  %v2580_v32 = vadd.f32 %v3247_v48, %v5581_v9  ;;  %v2556_v35 = vpop.f32.mrb[37].mxu1 }
 0xaab   :  { %2609 = vst [vmem:[#allocation7 + $0x60] sm:$0xff] %v2593_v15  ;;  %v2579_v7 = vadd.f32 %v2556_v35, %v5578_v11 }
 0xaac   :  { %v2596_v52 = vmul.f32 0.5, %v2580_v32 }
 0xaad   :  { %v2595_v4 = vmul.f32 0.5, %v2579_v7 }
 0xaae   :  { %2612 = vst [vmem:[#allocation7 + $0x78] sm:$0xff] %v2596_v52 }
 0xaaf   :  { %2611 = vst [vmem:[#allocation7 + $0x70] sm:$0xff] %v2595_v4 }
 0xab0   :  { %3654 = shalt.err (!%p3651_p6)
}
 0xab1   :  { %s3655_s30 = scalar_lea.hbm %s5693_s9, 2048 }
 0xab2   :  { %p3656_p7 = scmp.ne.s32.totalorder %s5693_s9, %s3655_s30  ;;  %p3659_p8 = scmp.lt.u32.totalorder %s3655_s30, %s5693_s9 }
 0xab4   :  { %p3661_p9 = pnand %p3659_p8, %p3656_p7 }
 0xab6   :  { %3664 = shalt.err (!%p3661_p9)
}
 0xab7   :  { %2624 = dma.vmem_to_hbm [thread:$0]  %s2619_s27, 2048, %s5693_s9, [#allocation4], %s3673_s2, %s3673_s2, %s3674_s10  }
 0xab8   :  { %3669 = dma.done.wait [#allocation4], 2048  }
 0xab9   :  { %3670 = vsyncadd [#allocation4], 4294965248 }
 0xaba   :  { %2628 = vsyncpa [#allocation3], 1 }
 0xabb   :  { %2629 = vsyncpa [#allocation6], 1 }
 0xabc   :  { %2630 = vsyncpa [#allocation4], 1 }

</bundles_post_ra>
